<compile_context>
chip_gen: v7x
topology: tpu7x:2x2x1
jax: 0.10.0
libtpu: 0.0.40
codegen_flags: <defaults>
</compile_context>

<pallas_src>
import functools
import math

import jax
import jax.numpy as jnp
from jax.experimental import pallas as pl
from jax.experimental.pallas import tpu as pltpu


def _round_up(x, m):
    return ((x + m - 1) // m) * m


def _pad_to(a, shape):
    pads = [(0, t - s) for s, t in zip(a.shape, shape)]
    if all(p == (0, 0) for p in pads):
        return a
    return jnp.pad(a, pads)


# --------------------------------------------------------------------------- kernel
def _cn_link_predictor_kernel(
    # scalar-prefetch (SMEM): per-edge endpoint node ids
    src_ref, dst_ref,
    # inputs
    adj_ref,            # HBM  [N, np4]    int32 : 4 {0,1} adjacency bytes per word
    xp_ref,             # VMEM [4, np4, D] bf16  : x rows, byte-of-word major
    xi_ref, xj_ref,     # VMEM [TE, D]     bf16  : x at edge endpoints
    wdh_ref,            # VMEM [2, D, H]   bf16  : (xij_w1, xcn_w1)
    whh_ref,            # VMEM [4, H, H]   bf16  : (xij_w2, xcn_w2, xcn_w3*beta, lin_w1)
    wout_ref,           # VMEM [C, H]      bf16  : lin_w2^T (pre-transposed)
    bh_ref,             # VMEM [6, H]      f32   : (xij_b1, xij_b2, xcn_b1, xcn_b2,
                        #                           xcn_b3*beta, lin_b1)
    bout_ref,           # VMEM [C, 1]      f32   : lin_b2
    # output
    out_ref,            # VMEM [1, C, TE]  f32   : lane-dense (edges on lane axis)
    # scratch
    rows_i, rows_j,     # VMEM [TE, np4]   int32 : gathered packed adjacency rows
    acc_ref,            # VMEM [TE, D]     f32   : xcn (never round-trips to HBM)
    copy_sems,          # DMA semaphores   [n_sub]
    *, sub_e,
):
    f32, bf16 = jnp.float32, jnp.bfloat16
    tile_e, np4 = rows_i.shape
    n_sub = tile_e // sub_e
    base = pl.program_id(0) * tile_e

    # ---- 1. issue ALL adjacency row-gather DMAs for this edge tile ---------------
    # Each edge needs rows adj[src[e]] and adj[dst[e]]; rows land in per-edge sublane
    # slots of rows_i / rows_j.  Sub-block s signals copy_sems[s] so compute on early
    # sub-blocks overlaps with the later rows still streaming from HBM.
    for s in range(n_sub):
        @pl.loop(s * sub_e, (s + 1) * sub_e)
        def _issue(e, s=s):
            pltpu.make_async_copy(
                adj_ref.at[pl.ds(src_ref[base + e], 1), :],
                rows_i.at[pl.ds(e, 1), :], copy_sems.at[s]).start()
            pltpu.make_async_copy(
                adj_ref.at[pl.ds(dst_ref[base + e], 1), :],
                rows_j.at[pl.ds(e, 1), :], copy_sems.at[s]).start()

    # ---- 2. fused adjoverlap + spmm_add, one sub-block at a time -----------------
    for s in range(n_sub):
        # Wait for this sub-block's 2*sub_e row copies.  All copies move identical
        # byte counts, so a representative descriptor is reused for the waits.
        @pl.loop(0, 2 * sub_e)
        def _drain(_, s=s):
            pltpu.make_async_copy(
                adj_ref.at[pl.ds(0, 1), :],
                rows_i.at[pl.ds(0, 1), :], copy_sems.at[s]).wait()

        lo = s * sub_e
        # Bytes are {0,1}, so the bitwise AND of the packed words IS the common-
        # neighbour mask product (done 4 entries per 32-bit lane on the VPU).
        pk = rows_i[lo:lo + sub_e, :] & rows_j[lo:lo + sub_e, :]      # [sub, np4] int32

        xcn_s = jnp.zeros((sub_e, acc_ref.shape[1]), f32)
        for b in range(4):                                            # unpack byte b
            m = ((pk >> (8 * b)) & 1).astype(f32).astype(bf16)        # {0,1} mask
            xcn_s += jnp.dot(m, xp_ref[b], preferred_element_type=f32)  # MXU, f32 acc
        acc_ref[lo:lo + sub_e, :] = xcn_s

    # ---- 3. fused MLP head on the whole edge tile (xcn never leaves VMEM) --------
    def mm(a, w):                                                     # bf16 MXU, f32 acc
        return jnp.dot(a.astype(bf16), w, preferred_element_type=f32)

    bh = bh_ref[...]
    xcn = acc_ref[...]                                                # [TE, D] f32

    # xcnlin = Lin3(ReLU(Lin2(ReLU(Lin1(xcn)))))    (beta folded into Lin3)
    h = jnp.maximum(mm(xcn, wdh_ref[1]) + bh[2], 0.0)
    h = jnp.maximum(mm(h, whh_ref[1]) + bh[3], 0.0)
    xcnh_beta = mm(h, whh_ref[2]) + bh[4]

    # xijlin = Lin2(ReLU(Lin1(xi * xj)))
    xij_in = xi_ref[...].astype(f32) * xj_ref[...].astype(f32)
    g = jnp.maximum(mm(xij_in, wdh_ref[0]) + bh[0], 0.0)
    xij = mm(g, whh_ref[0]) + bh[1]

    # lin = LinB(ReLU(LinA(xcnh*beta + xij)))
    u = jnp.maximum(mm(xcnh_beta + xij, whh_ref[3]) + bh[5], 0.0)

    # Lane-dense score tile [C, TE] (edges on the lane axis) via an NT matmul so the
    # store is a full-width vst rather than a 1-wide masked store.
    scores_t = jax.lax.dot_general(
        wout_ref[...], u.astype(bf16),
        dimension_numbers=(((1,), (1,)), ((), ())),
        preferred_element_type=f32,
    ) + bout_ref[...]                                                 # [C, TE] f32
    out_ref[0] = scores_t


# --------------------------------------------------------------------------- wrapper
def cn_link_predictor_forward(params, x, adj, tar_ei, *, tile_e=256, interpret=False):
    """Eval-mode CNLinkPredictor forward. Returns [E, out_channels] f32 scores."""
    f32, bf16 = jnp.float32, jnp.bfloat16
    N, D = x.shape
    H = params["xcn_w1"].shape[1]
    C = params["lin_w2"].shape[1]
    E = tar_ei.shape[1]

    # ---- tiling -------------------------------------------------------------------
    sub_e = 32                                    # gather/compute overlap granularity
    tile_e = max(sub_e, min(tile_e, _round_up(E, 128)))
    tile_e = (tile_e // sub_e) * sub_e
    n_sub = tile_e // sub_e
    e_pad = _round_up(E, tile_e)
    n_et = e_pad // tile_e
    n_pad = _round_up(N, 512)                     # np4 becomes a multiple of 128 lanes
    np4 = n_pad // 4

    src = tar_ei[0].astype(jnp.int32)
    dst = tar_ei[1].astype(jnp.int32)
    src_pad = _pad_to(src, (e_pad,))              # padded edges read node 0; sliced off
    dst_pad = _pad_to(dst, (e_pad,))

    # ---- compact adjacency: 4 {0,1} bytes packed per int32 word (1 B / entry) ------
    # Explicit shift/or packing fixes the byte order independent of bitcast endianness.
    adj01 = _pad_to((adj != 0).astype(jnp.int32), (N, n_pad))
    a4 = adj01.reshape(N, np4, 4)
    adj_pk = a4[..., 0] | (a4[..., 1] << 8) | (a4[..., 2] << 16) | (a4[..., 3] << 24)

    # ---- node features, laid out to match the packed-byte order --------------------
    x_bf = x.astype(bf16)
    x_perm = _pad_to(x_bf, (n_pad, D)).reshape(np4, 4, D).transpose(1, 0, 2)  # [4,np4,D]
    xi = _pad_to(jnp.take(x_bf, src, axis=0), (e_pad, D))                     # [Ep, D]
    xj = _pad_to(jnp.take(x_bf, dst, axis=0), (e_pad, D))

    # ---- packed MLP weights (bf16 MXU operands, f32 biases, beta folded) -----------
    beta = jnp.asarray(params["beta"], f32).reshape(())
    wdh = jnp.stack([params["xij_w1"], params["xcn_w1"]]).astype(bf16)           # [2,D,H]
    whh = jnp.stack([params["xij_w2"], params["xcn_w2"],
                     params["xcn_w3"] * beta, params["lin_w1"]]).astype(bf16)    # [4,H,H]
    wout = params["lin_w2"].T.astype(bf16)                                       # [C,H]
    bh = jnp.stack([params["xij_b1"], params["xij_b2"],
                    params["xcn_b1"], params["xcn_b2"],
                    params["xcn_b3"] * beta, params["lin_b1"]]).astype(f32)      # [6,H]
    bout = params["lin_b2"].reshape(C, 1).astype(f32)                            # [C,1]

    pin2 = lambda i, s, d: (0, 0)                 # VMEM-resident operands
    pin3 = lambda i, s, d: (0, 0, 0)

    grid_spec = pltpu.PrefetchScalarGridSpec(
        num_scalar_prefetch=2,                    # src, dst -> SMEM
        grid=(n_et,),                             # one step per edge tile
        in_specs=[
            pl.BlockSpec(memory_space=pl.ANY),                        # adj_pk stays in HBM
            pl.BlockSpec((4, np4, D), pin3),                          # x_perm (read once)
            pl.BlockSpec((tile_e, D), lambda i, s, d: (i, 0)),        # xi
            pl.BlockSpec((tile_e, D), lambda i, s, d: (i, 0)),        # xj
            pl.BlockSpec((2, D, H), pin3),                            # D->H weights
            pl.BlockSpec((4, H, H), pin3),                            # H->H weights
            pl.BlockSpec((C, H), pin2),                               # output weight^T
            pl.BlockSpec((6, H), pin2),                               # hidden biases
            pl.BlockSpec((C, 1), pin2),                               # output bias
        ],
        out_specs=pl.BlockSpec((1, C, tile_e), lambda i, s, d: (i, 0, 0)),
        scratch_shapes=[
            pltpu.VMEM((tile_e, np4), jnp.int32),     # gathered packed rows @ src
            pltpu.VMEM((tile_e, np4), jnp.int32),     # gathered packed rows @ dst
            pltpu.VMEM((tile_e, D), jnp.float32),     # xcn
            pltpu.SemaphoreType.DMA((n_sub,)),        # per-sub-block gather completion
        ],
    )

    out_tiles = pl.pallas_call(
        functools.partial(_cn_link_predictor_kernel, sub_e=sub_e),
        out_shape=jax.ShapeDtypeStruct((n_et, C, tile_e), jnp.float32),
        grid_spec=grid_spec,
        compiler_params=pltpu.CompilerParams(
            # Edge tiles are fully independent -> megacore-shardable on v7x.
            dimension_semantics=("parallel",),
            # Above the 16/32 MiB defaults, under v7x's 64 MiB physical VMEM;
            # on v5e/v6e (128 MiB) this can be raised toward ~96 MiB for large N.
            vmem_limit_bytes=48 * 1024 * 1024,
        ),
        interpret=interpret,
    )(src_pad, dst_pad, adj_pk, x_perm, xi, xj, wdh, whh, wout, bh, bout)

    scores = out_tiles.transpose(0, 2, 1).reshape(e_pad, C)           # edges back to rows
    return scores[:E]


# --------------------------------------------------------------------------- reference
def cn_link_predictor_reference(params, x, adj, tar_ei):
    """Pure-JAX reference using the same bf16-operand / f32-accumulate policy."""
    f32, bf16 = jnp.float32, jnp.bfloat16

    def mm(a, w):
        return jnp.dot(a.astype(bf16), w.astype(bf16), preferred_element_type=f32)

    adj_bf = adj.astype(bf16)
    x_bf = x.astype(bf16)
    src, dst = tar_ei[0], tar_ei[1]

    p = adj_bf[src] * adj_bf[dst]                      # [E, N] common-neighbour mask
    xcn = mm(p, x_bf)                                  # spmm_add(cn, x)

    h = jax.nn.relu(mm(xcn, params["xcn_w1"]) + params["xcn_b1"])
    h = jax.nn.relu(mm(h, params["xcn_w2"]) + params["xcn_b2"])
    xcnh = mm(h, params["xcn_w3"]) + params["xcn_b3"]

    xi = x_bf[src].astype(f32)
    xj = x_bf[dst].astype(f32)
    g = jax.nn.relu(mm(xi * xj, params["xij_w1"]) + params["xij_b1"])
    xij = mm(g, params["xij_w2"]) + params["xij_b2"]

    z = xcnh * params["beta"] + xij
    u = jax.nn.relu(mm(z, params["lin_w1"]) + params["lin_b1"])
    return mm(u, params["lin_w2"]) + params["lin_b2"]  # [E, C]


# --------------------------------------------------------------------------- demo
if __name__ == "__main__":
    key = jax.random.PRNGKey(0)
    N, D, H, C, E = 1024, 128, 128, 1, 300         # nodes, in_ch, hidden, out_ch, edges

    k_adj, k_ei, k_x, k_p = jax.random.split(key, 4)

    # Symmetric 0/1 adjacency, no self loops.
    a = (jax.random.uniform(k_adj, (N, N)) < 0.03).astype(jnp.float32)
    adj = jnp.maximum(a, a.T) * (1.0 - jnp.eye(N, dtype=jnp.float32))

    x = 0.5 * jax.random.normal(k_x, (N, D), jnp.float32)
    tar_ei = jax.random.randint(k_ei, (2, E), 0, N, dtype=jnp.int32)

    def linear_init(k, fan_in, fan_out):
        # nn.Linear default init (weights stored as [in, out], i.e. pre-transposed).
        kw, kb = jax.random.split(k)
        bound = 1.0 / math.sqrt(fan_in)
        w = jax.random.uniform(kw, (fan_in, fan_out), jnp.float32, -bound, bound)
        b = jax.random.uniform(kb, (fan_out,), jnp.float32, -bound, bound)
        return w, b

    keys = jax.random.split(k_p, 7)
    params = {}
    params["xij_w1"], params["xij_b1"] = linear_init(keys[0], D, H)
    params["xij_w2"], params["xij_b2"] = linear_init(keys[1], H, H)
    params["xcn_w1"], params["xcn_b1"] = linear_init(keys[2], D, H)
    params["xcn_w2"], params["xcn_b2"] = linear_init(keys[3], H, H)
    params["xcn_w3"], params["xcn_b3"] = linear_init(keys[4], H, H)
    params["lin_w1"], params["lin_b1"] = linear_init(keys[5], H, H)
    params["lin_w2"], params["lin_b2"] = linear_init(keys[6], H, C)
    params["beta"] = jnp.float32(1.0)

    fwd = jax.jit(lambda p_, x_, a_, e_: cn_link_predictor_forward(
        p_, x_, a_, e_, tile_e=128))

    out = fwd(params, x, adj, tar_ei)
    jax.block_until_ready(out)

    ref = cn_link_predictor_reference(params, x, adj, tar_ei)
    err = float(jnp.max(jnp.abs(out - ref)))
    scale = float(jnp.max(jnp.abs(ref)))
    assert out.shape == (E, C), out.shape
    assert err <= 1e-2 * scale + 1e-2, f"max |kernel - ref| = {err} (scale {scale})"
    print("KERNEL_OK")
</pallas_src>

<mosaic_0001>
module attributes {stable_mosaic.version = 11 : i64} {
  func.func @_cn_link_predictor_kernel(%arg0: i32, %arg1: memref<384xi32, #tpu.memory_space<smem>>, %arg2: memref<384xi32, #tpu.memory_space<smem>>, %arg3: memref<1024x256xi32, #tpu.memory_space<any>>, %arg4: memref<4x256x128xbf16, #tpu.memory_space<vmem>>, %arg5: memref<128x128xbf16, #tpu.memory_space<vmem>>, %arg6: memref<128x128xbf16, #tpu.memory_space<vmem>>, %arg7: memref<2x128x128xbf16, #tpu.memory_space<vmem>>, %arg8: memref<4x128x128xbf16, #tpu.memory_space<vmem>>, %arg9: memref<1x128xbf16, #tpu.memory_space<vmem>>, %arg10: memref<6x128xf32, #tpu.memory_space<vmem>>, %arg11: memref<1x1xf32, #tpu.memory_space<vmem>>, %arg12: memref<1x1x128xf32, #tpu.memory_space<vmem>>, %arg13: memref<128x256xi32, #tpu.memory_space<vmem>>, %arg14: memref<128x256xi32, #tpu.memory_space<vmem>>, %arg15: memref<128x128xf32, #tpu.memory_space<vmem>>, %arg16: memref<4x!tpu.dma_semaphore, #tpu.memory_space<semaphore_mem>>) attributes {dimension_semantics = [#tpu.dimension_semantics<parallel>], iteration_bounds = array<i64: 3>, scalar_prefetch = 2 : i64, scratch_operands = 4 : i64, tpu.core_type = #tpu.core_type<tc>, window_params = [{}, {pipeline_mode = #tpu.pipeline_mode<synchronous>, transform_indices = @transform_1, window_bounds = array<i64: 4, 256, 128>}, {transform_indices = @transform_2, window_bounds = array<i64: 128, 128>}, {transform_indices = @transform_3, window_bounds = array<i64: 128, 128>}, {pipeline_mode = #tpu.pipeline_mode<synchronous>, transform_indices = @transform_4, window_bounds = array<i64: 2, 128, 128>}, {pipeline_mode = #tpu.pipeline_mode<synchronous>, transform_indices = @transform_5, window_bounds = array<i64: 4, 128, 128>}, {pipeline_mode = #tpu.pipeline_mode<synchronous>, transform_indices = @transform_6, window_bounds = array<i64: 1, 128>}, {pipeline_mode = #tpu.pipeline_mode<synchronous>, transform_indices = @transform_7, window_bounds = array<i64: 6, 128>}, {pipeline_mode = #tpu.pipeline_mode<synchronous>, transform_indices = @transform_8, window_bounds = array<i64: 1, 1>}, {transform_indices = @transform_9, window_bounds = array<i64: 1, 1, 128>}]} {
    %c128_i32 = arith.constant 128 : i32
    %0 = arith.muli %arg0, %c128_i32 : i32
    %c0_i32 = arith.constant 0 : i32
    %c32_i32 = arith.constant 32 : i32
    %1 = arith.addi %c0_i32, %c32_i32 : i32
    %c1_i32 = arith.constant 1 : i32
    scf.for %arg17 = %c0_i32 to %1 step %c1_i32  : i32 {
      %c1_i32_181 = arith.constant 1 : i32
      %268 = arith.muli %arg17, %c1_i32_181 : i32
      %c0_i32_182 = arith.constant 0 : i32
      %269 = arith.addi %c0_i32_182, %268 : i32
      %270 = arith.addi %0, %269 : i32
      %271 = arith.index_cast %270 : i32 to index
      %272 = memref.load %arg1[%271] : memref<384xi32, #tpu.memory_space<smem>>
      %c0_i32_183 = arith.constant 0 : i32
      %c0_i32_184 = arith.constant 0 : i32
      %273 = tpu.memref_slice %arg3[%272, %c0_i32_184] : memref<1024x256xi32, #tpu.memory_space<any>> -> memref<1x256xi32, #tpu.memory_space<any>>
      %c0_i32_185 = arith.constant 0 : i32
      %274 = tpu.memref_slice %arg13[%269, %c0_i32_185] : memref<128x256xi32, #tpu.memory_space<vmem>> -> memref<1x256xi32, #tpu.memory_space<vmem>>
      %275 = tpu.memref_slice %arg16[%c0_i32_183] : memref<4x!tpu.dma_semaphore, #tpu.memory_space<semaphore_mem>> -> memref<1x!tpu.dma_semaphore, #tpu.memory_space<semaphore_mem>>
      %276 = tpu.memref_squeeze %275 : memref<1x!tpu.dma_semaphore, #tpu.memory_space<semaphore_mem>> -> memref<!tpu.dma_semaphore, #tpu.memory_space<semaphore_mem>>
      tpu.enqueue_dma source(%273 : memref<1x256xi32, #tpu.memory_space<any>>) target(%274 : memref<1x256xi32, #tpu.memory_space<vmem>>) target_semaphore(%276 : memref<!tpu.dma_semaphore, #tpu.memory_space<semaphore_mem>>)
      %277 = arith.addi %0, %269 : i32
      %278 = arith.index_cast %277 : i32 to index
      %279 = memref.load %arg2[%278] : memref<384xi32, #tpu.memory_space<smem>>
      %c0_i32_186 = arith.constant 0 : i32
      %c0_i32_187 = arith.constant 0 : i32
      %280 = tpu.memref_slice %arg3[%279, %c0_i32_187] : memref<1024x256xi32, #tpu.memory_space<any>> -> memref<1x256xi32, #tpu.memory_space<any>>
      %c0_i32_188 = arith.constant 0 : i32
      %281 = tpu.memref_slice %arg14[%269, %c0_i32_188] : memref<128x256xi32, #tpu.memory_space<vmem>> -> memref<1x256xi32, #tpu.memory_space<vmem>>
      %282 = tpu.memref_slice %arg16[%c0_i32_186] : memref<4x!tpu.dma_semaphore, #tpu.memory_space<semaphore_mem>> -> memref<1x!tpu.dma_semaphore, #tpu.memory_space<semaphore_mem>>
      %283 = tpu.memref_squeeze %282 : memref<1x!tpu.dma_semaphore, #tpu.memory_space<semaphore_mem>> -> memref<!tpu.dma_semaphore, #tpu.memory_space<semaphore_mem>>
      tpu.enqueue_dma source(%280 : memref<1x256xi32, #tpu.memory_space<any>>) target(%281 : memref<1x256xi32, #tpu.memory_space<vmem>>) target_semaphore(%283 : memref<!tpu.dma_semaphore, #tpu.memory_space<semaphore_mem>>)
    }
    %c32_i32_0 = arith.constant 32 : i32
    %c0_i32_1 = arith.constant 0 : i32
    %c32_i32_2 = arith.constant 32 : i32
    %2 = arith.addi %c0_i32_1, %c32_i32_2 : i32
    %c1_i32_3 = arith.constant 1 : i32
    scf.for %arg17 = %c0_i32_1 to %2 step %c1_i32_3  : i32 {
      %c1_i32_181 = arith.constant 1 : i32
      %268 = arith.muli %arg17, %c1_i32_181 : i32
      %c32_i32_182 = arith.constant 32 : i32
      %269 = arith.addi %c32_i32_182, %268 : i32
      %270 = arith.addi %0, %269 : i32
      %271 = arith.index_cast %270 : i32 to index
      %272 = memref.load %arg1[%271] : memref<384xi32, #tpu.memory_space<smem>>
      %c1_i32_183 = arith.constant 1 : i32
      %c0_i32_184 = arith.constant 0 : i32
      %273 = tpu.memref_slice %arg3[%272, %c0_i32_184] : memref<1024x256xi32, #tpu.memory_space<any>> -> memref<1x256xi32, #tpu.memory_space<any>>
      %c0_i32_185 = arith.constant 0 : i32
      %274 = tpu.memref_slice %arg13[%269, %c0_i32_185] : memref<128x256xi32, #tpu.memory_space<vmem>> -> memref<1x256xi32, #tpu.memory_space<vmem>>
      %275 = tpu.memref_slice %arg16[%c1_i32_183] : memref<4x!tpu.dma_semaphore, #tpu.memory_space<semaphore_mem>> -> memref<1x!tpu.dma_semaphore, #tpu.memory_space<semaphore_mem>>
      %276 = tpu.memref_squeeze %275 : memref<1x!tpu.dma_semaphore, #tpu.memory_space<semaphore_mem>> -> memref<!tpu.dma_semaphore, #tpu.memory_space<semaphore_mem>>
      tpu.enqueue_dma source(%273 : memref<1x256xi32, #tpu.memory_space<any>>) target(%274 : memref<1x256xi32, #tpu.memory_space<vmem>>) target_semaphore(%276 : memref<!tpu.dma_semaphore, #tpu.memory_space<semaphore_mem>>)
      %277 = arith.addi %0, %269 : i32
      %278 = arith.index_cast %277 : i32 to index
      %279 = memref.load %arg2[%278] : memref<384xi32, #tpu.memory_space<smem>>
      %c1_i32_186 = arith.constant 1 : i32
      %c0_i32_187 = arith.constant 0 : i32
      %280 = tpu.memref_slice %arg3[%279, %c0_i32_187] : memref<1024x256xi32, #tpu.memory_space<any>> -> memref<1x256xi32, #tpu.memory_space<any>>
      %c0_i32_188 = arith.constant 0 : i32
      %281 = tpu.memref_slice %arg14[%269, %c0_i32_188] : memref<128x256xi32, #tpu.memory_space<vmem>> -> memref<1x256xi32, #tpu.memory_space<vmem>>
      %282 = tpu.memref_slice %arg16[%c1_i32_186] : memref<4x!tpu.dma_semaphore, #tpu.memory_space<semaphore_mem>> -> memref<1x!tpu.dma_semaphore, #tpu.memory_space<semaphore_mem>>
      %283 = tpu.memref_squeeze %282 : memref<1x!tpu.dma_semaphore, #tpu.memory_space<semaphore_mem>> -> memref<!tpu.dma_semaphore, #tpu.memory_space<semaphore_mem>>
      tpu.enqueue_dma source(%280 : memref<1x256xi32, #tpu.memory_space<any>>) target(%281 : memref<1x256xi32, #tpu.memory_space<vmem>>) target_semaphore(%283 : memref<!tpu.dma_semaphore, #tpu.memory_space<semaphore_mem>>)
    }
    %c32_i32_4 = arith.constant 32 : i32
    %c0_i32_5 = arith.constant 0 : i32
    %c32_i32_6 = arith.constant 32 : i32
    %3 = arith.addi %c0_i32_5, %c32_i32_6 : i32
    %c1_i32_7 = arith.constant 1 : i32
    scf.for %arg17 = %c0_i32_5 to %3 step %c1_i32_7  : i32 {
      %c1_i32_181 = arith.constant 1 : i32
      %268 = arith.muli %arg17, %c1_i32_181 : i32
      %c64_i32_182 = arith.constant 64 : i32
      %269 = arith.addi %c64_i32_182, %268 : i32
      %270 = arith.addi %0, %269 : i32
      %271 = arith.index_cast %270 : i32 to index
      %272 = memref.load %arg1[%271] : memref<384xi32, #tpu.memory_space<smem>>
      %c2_i32 = arith.constant 2 : i32
      %c0_i32_183 = arith.constant 0 : i32
      %273 = tpu.memref_slice %arg3[%272, %c0_i32_183] : memref<1024x256xi32, #tpu.memory_space<any>> -> memref<1x256xi32, #tpu.memory_space<any>>
      %c0_i32_184 = arith.constant 0 : i32
      %274 = tpu.memref_slice %arg13[%269, %c0_i32_184] : memref<128x256xi32, #tpu.memory_space<vmem>> -> memref<1x256xi32, #tpu.memory_space<vmem>>
      %275 = tpu.memref_slice %arg16[%c2_i32] : memref<4x!tpu.dma_semaphore, #tpu.memory_space<semaphore_mem>> -> memref<1x!tpu.dma_semaphore, #tpu.memory_space<semaphore_mem>>
      %276 = tpu.memref_squeeze %275 : memref<1x!tpu.dma_semaphore, #tpu.memory_space<semaphore_mem>> -> memref<!tpu.dma_semaphore, #tpu.memory_space<semaphore_mem>>
      tpu.enqueue_dma source(%273 : memref<1x256xi32, #tpu.memory_space<any>>) target(%274 : memref<1x256xi32, #tpu.memory_space<vmem>>) target_semaphore(%276 : memref<!tpu.dma_semaphore, #tpu.memory_space<semaphore_mem>>)
      %277 = arith.addi %0, %269 : i32
      %278 = arith.index_cast %277 : i32 to index
      %279 = memref.load %arg2[%278] : memref<384xi32, #tpu.memory_space<smem>>
      %c2_i32_185 = arith.constant 2 : i32
      %c0_i32_186 = arith.constant 0 : i32
      %280 = tpu.memref_slice %arg3[%279, %c0_i32_186] : memref<1024x256xi32, #tpu.memory_space<any>> -> memref<1x256xi32, #tpu.memory_space<any>>
      %c0_i32_187 = arith.constant 0 : i32
      %281 = tpu.memref_slice %arg14[%269, %c0_i32_187] : memref<128x256xi32, #tpu.memory_space<vmem>> -> memref<1x256xi32, #tpu.memory_space<vmem>>
      %282 = tpu.memref_slice %arg16[%c2_i32_185] : memref<4x!tpu.dma_semaphore, #tpu.memory_space<semaphore_mem>> -> memref<1x!tpu.dma_semaphore, #tpu.memory_space<semaphore_mem>>
      %283 = tpu.memref_squeeze %282 : memref<1x!tpu.dma_semaphore, #tpu.memory_space<semaphore_mem>> -> memref<!tpu.dma_semaphore, #tpu.memory_space<semaphore_mem>>
      tpu.enqueue_dma source(%280 : memref<1x256xi32, #tpu.memory_space<any>>) target(%281 : memref<1x256xi32, #tpu.memory_space<vmem>>) target_semaphore(%283 : memref<!tpu.dma_semaphore, #tpu.memory_space<semaphore_mem>>)
    }
    %c32_i32_8 = arith.constant 32 : i32
    %c0_i32_9 = arith.constant 0 : i32
    %c32_i32_10 = arith.constant 32 : i32
    %4 = arith.addi %c0_i32_9, %c32_i32_10 : i32
    %c1_i32_11 = arith.constant 1 : i32
    scf.for %arg17 = %c0_i32_9 to %4 step %c1_i32_11  : i32 {
      %c1_i32_181 = arith.constant 1 : i32
      %268 = arith.muli %arg17, %c1_i32_181 : i32
      %c96_i32 = arith.constant 96 : i32
      %269 = arith.addi %c96_i32, %268 : i32
      %270 = arith.addi %0, %269 : i32
      %271 = arith.index_cast %270 : i32 to index
      %272 = memref.load %arg1[%271] : memref<384xi32, #tpu.memory_space<smem>>
      %c3_i32 = arith.constant 3 : i32
      %c0_i32_182 = arith.constant 0 : i32
      %273 = tpu.memref_slice %arg3[%272, %c0_i32_182] : memref<1024x256xi32, #tpu.memory_space<any>> -> memref<1x256xi32, #tpu.memory_space<any>>
      %c0_i32_183 = arith.constant 0 : i32
      %274 = tpu.memref_slice %arg13[%269, %c0_i32_183] : memref<128x256xi32, #tpu.memory_space<vmem>> -> memref<1x256xi32, #tpu.memory_space<vmem>>
      %275 = tpu.memref_slice %arg16[%c3_i32] : memref<4x!tpu.dma_semaphore, #tpu.memory_space<semaphore_mem>> -> memref<1x!tpu.dma_semaphore, #tpu.memory_space<semaphore_mem>>
      %276 = tpu.memref_squeeze %275 : memref<1x!tpu.dma_semaphore, #tpu.memory_space<semaphore_mem>> -> memref<!tpu.dma_semaphore, #tpu.memory_space<semaphore_mem>>
      tpu.enqueue_dma source(%273 : memref<1x256xi32, #tpu.memory_space<any>>) target(%274 : memref<1x256xi32, #tpu.memory_space<vmem>>) target_semaphore(%276 : memref<!tpu.dma_semaphore, #tpu.memory_space<semaphore_mem>>)
      %277 = arith.addi %0, %269 : i32
      %278 = arith.index_cast %277 : i32 to index
      %279 = memref.load %arg2[%278] : memref<384xi32, #tpu.memory_space<smem>>
      %c3_i32_184 = arith.constant 3 : i32
      %c0_i32_185 = arith.constant 0 : i32
      %280 = tpu.memref_slice %arg3[%279, %c0_i32_185] : memref<1024x256xi32, #tpu.memory_space<any>> -> memref<1x256xi32, #tpu.memory_space<any>>
      %c0_i32_186 = arith.constant 0 : i32
      %281 = tpu.memref_slice %arg14[%269, %c0_i32_186] : memref<128x256xi32, #tpu.memory_space<vmem>> -> memref<1x256xi32, #tpu.memory_space<vmem>>
      %282 = tpu.memref_slice %arg16[%c3_i32_184] : memref<4x!tpu.dma_semaphore, #tpu.memory_space<semaphore_mem>> -> memref<1x!tpu.dma_semaphore, #tpu.memory_space<semaphore_mem>>
      %283 = tpu.memref_squeeze %282 : memref<1x!tpu.dma_semaphore, #tpu.memory_space<semaphore_mem>> -> memref<!tpu.dma_semaphore, #tpu.memory_space<semaphore_mem>>
      tpu.enqueue_dma source(%280 : memref<1x256xi32, #tpu.memory_space<any>>) target(%281 : memref<1x256xi32, #tpu.memory_space<vmem>>) target_semaphore(%283 : memref<!tpu.dma_semaphore, #tpu.memory_space<semaphore_mem>>)
    }
    %c32_i32_12 = arith.constant 32 : i32
    %c0_i32_13 = arith.constant 0 : i32
    %c64_i32 = arith.constant 64 : i32
    %5 = arith.addi %c0_i32_13, %c64_i32 : i32
    %c1_i32_14 = arith.constant 1 : i32
    scf.for %arg17 = %c0_i32_13 to %5 step %c1_i32_14  : i32 {
      %c0_i32_181 = arith.constant 0 : i32
      %c0_i32_182 = arith.constant 0 : i32
      %c0_i32_183 = arith.constant 0 : i32
      %268 = tpu.memref_slice %arg3[%c0_i32_182, %c0_i32_183] : memref<1024x256xi32, #tpu.memory_space<any>> -> memref<1x256xi32, #tpu.memory_space<any>>
      %c0_i32_184 = arith.constant 0 : i32
      %c0_i32_185 = arith.constant 0 : i32
      %269 = tpu.memref_slice %arg13[%c0_i32_184, %c0_i32_185] : memref<128x256xi32, #tpu.memory_space<vmem>> -> memref<1x256xi32, #tpu.memory_space<vmem>>
      %270 = tpu.memref_slice %arg16[%c0_i32_181] : memref<4x!tpu.dma_semaphore, #tpu.memory_space<semaphore_mem>> -> memref<1x!tpu.dma_semaphore, #tpu.memory_space<semaphore_mem>>
      %271 = tpu.memref_squeeze %270 : memref<1x!tpu.dma_semaphore, #tpu.memory_space<semaphore_mem>> -> memref<!tpu.dma_semaphore, #tpu.memory_space<semaphore_mem>>
      tpu.wait_dma2 semaphore(%271 : memref<!tpu.dma_semaphore, #tpu.memory_space<semaphore_mem>>) src(%268 : memref<1x256xi32, #tpu.memory_space<any>>) dst(%269 : memref<1x256xi32, #tpu.memory_space<vmem>>)
    }
    %c0 = arith.constant 0 : index
    %c0_15 = arith.constant 0 : index
    %6 = vector.load %arg13[%c0, %c0_15] : memref<128x256xi32, #tpu.memory_space<vmem>>, vector<32x256xi32>
    %c0_16 = arith.constant 0 : index
    %c0_17 = arith.constant 0 : index
    %7 = vector.load %arg14[%c0_16, %c0_17] : memref<128x256xi32, #tpu.memory_space<vmem>>, vector<32x256xi32>
    %8 = arith.andi %6, %7 : vector<32x256xi32>
    %cst = arith.constant 0.000000e+00 : f32
    %9 = vector.broadcast %cst : f32 to vector<32x128xf32>
    %c0_i32_18 = arith.constant 0 : i32
    %10 = vector.broadcast %c0_i32_18 : i32 to vector<32x256xi32>
    %11 = arith.shrsi %8, %10 : vector<32x256xi32>
    %c1_i32_19 = arith.constant 1 : i32
    %12 = vector.broadcast %c1_i32_19 : i32 to vector<32x256xi32>
    %13 = arith.andi %11, %12 : vector<32x256xi32>
    %14 = arith.sitofp %13 : vector<32x256xi32> to vector<32x256xf32>
    %15 = arith.truncf %14 : vector<32x256xf32> to vector<32x256xbf16>
    %c0_20 = arith.constant 0 : index
    %c0_21 = arith.constant 0 : index
    %c0_22 = arith.constant 0 : index
    %16 = vector.load %arg4[%c0_20, %c0_21, %c0_22] : memref<4x256x128xbf16, #tpu.memory_space<vmem>>, vector<1x256x128xbf16>
    %17 = vector.shape_cast %16 : vector<1x256x128xbf16> to vector<256x128xbf16>
    %cst_23 = arith.constant dense<0.000000e+00> : vector<32x128xf32>
    %18 = tpu.matmul %15, %17, %cst_23 {dimension_numbers = #tpu.dot_dimension_numbers<[1], [0], [0], [1], [0, 0, 1, 1], [], []>} : vector<32x256xbf16>, vector<256x128xbf16>, vector<32x128xf32> -> vector<32x128xf32>
    %19 = arith.addf %9, %18 : vector<32x128xf32>
    %c8_i32 = arith.constant 8 : i32
    %20 = vector.broadcast %c8_i32 : i32 to vector<32x256xi32>
    %21 = arith.shrsi %8, %20 : vector<32x256xi32>
    %c1_i32_24 = arith.constant 1 : i32
    %22 = vector.broadcast %c1_i32_24 : i32 to vector<32x256xi32>
    %23 = arith.andi %21, %22 : vector<32x256xi32>
    %24 = arith.sitofp %23 : vector<32x256xi32> to vector<32x256xf32>
    %25 = arith.truncf %24 : vector<32x256xf32> to vector<32x256xbf16>
    %c1 = arith.constant 1 : index
    %c0_25 = arith.constant 0 : index
    %c0_26 = arith.constant 0 : index
    %26 = vector.load %arg4[%c1, %c0_25, %c0_26] : memref<4x256x128xbf16, #tpu.memory_space<vmem>>, vector<1x256x128xbf16>
    %27 = vector.shape_cast %26 : vector<1x256x128xbf16> to vector<256x128xbf16>
    %cst_27 = arith.constant dense<0.000000e+00> : vector<32x128xf32>
    %28 = tpu.matmul %25, %27, %cst_27 {dimension_numbers = #tpu.dot_dimension_numbers<[1], [0], [0], [1], [0, 0, 1, 1], [], []>} : vector<32x256xbf16>, vector<256x128xbf16>, vector<32x128xf32> -> vector<32x128xf32>
    %29 = arith.addf %19, %28 : vector<32x128xf32>
    %c16_i32 = arith.constant 16 : i32
    %30 = vector.broadcast %c16_i32 : i32 to vector<32x256xi32>
    %31 = arith.shrsi %8, %30 : vector<32x256xi32>
    %c1_i32_28 = arith.constant 1 : i32
    %32 = vector.broadcast %c1_i32_28 : i32 to vector<32x256xi32>
    %33 = arith.andi %31, %32 : vector<32x256xi32>
    %34 = arith.sitofp %33 : vector<32x256xi32> to vector<32x256xf32>
    %35 = arith.truncf %34 : vector<32x256xf32> to vector<32x256xbf16>
    %c2 = arith.constant 2 : index
    %c0_29 = arith.constant 0 : index
    %c0_30 = arith.constant 0 : index
    %36 = vector.load %arg4[%c2, %c0_29, %c0_30] : memref<4x256x128xbf16, #tpu.memory_space<vmem>>, vector<1x256x128xbf16>
    %37 = vector.shape_cast %36 : vector<1x256x128xbf16> to vector<256x128xbf16>
    %cst_31 = arith.constant dense<0.000000e+00> : vector<32x128xf32>
    %38 = tpu.matmul %35, %37, %cst_31 {dimension_numbers = #tpu.dot_dimension_numbers<[1], [0], [0], [1], [0, 0, 1, 1], [], []>} : vector<32x256xbf16>, vector<256x128xbf16>, vector<32x128xf32> -> vector<32x128xf32>
    %39 = arith.addf %29, %38 : vector<32x128xf32>
    %c24_i32 = arith.constant 24 : i32
    %40 = vector.broadcast %c24_i32 : i32 to vector<32x256xi32>
    %41 = arith.shrsi %8, %40 : vector<32x256xi32>
    %c1_i32_32 = arith.constant 1 : i32
    %42 = vector.broadcast %c1_i32_32 : i32 to vector<32x256xi32>
    %43 = arith.andi %41, %42 : vector<32x256xi32>
    %44 = arith.sitofp %43 : vector<32x256xi32> to vector<32x256xf32>
    %45 = arith.truncf %44 : vector<32x256xf32> to vector<32x256xbf16>
    %c3 = arith.constant 3 : index
    %c0_33 = arith.constant 0 : index
    %c0_34 = arith.constant 0 : index
    %46 = vector.load %arg4[%c3, %c0_33, %c0_34] : memref<4x256x128xbf16, #tpu.memory_space<vmem>>, vector<1x256x128xbf16>
    %47 = vector.shape_cast %46 : vector<1x256x128xbf16> to vector<256x128xbf16>
    %cst_35 = arith.constant dense<0.000000e+00> : vector<32x128xf32>
    %48 = tpu.matmul %45, %47, %cst_35 {dimension_numbers = #tpu.dot_dimension_numbers<[1], [0], [0], [1], [0, 0, 1, 1], [], []>} : vector<32x256xbf16>, vector<256x128xbf16>, vector<32x128xf32> -> vector<32x128xf32>
    %49 = arith.addf %39, %48 : vector<32x128xf32>
    %c0_36 = arith.constant 0 : index
    %c0_37 = arith.constant 0 : index
    %50 = vector.load %arg15[%c0_36, %c0_37] : memref<128x128xf32, #tpu.memory_space<vmem>>, vector<32x128xf32>
    tpu.vector_store %arg15[%c0_36, %c0_37], %49 {strides = array<i32>} : memref<128x128xf32, #tpu.memory_space<vmem>>, vector<32x128xf32>,
    %c0_i32_38 = arith.constant 0 : i32
    %c64_i32_39 = arith.constant 64 : i32
    %51 = arith.addi %c0_i32_38, %c64_i32_39 : i32
    %c1_i32_40 = arith.constant 1 : i32
    scf.for %arg17 = %c0_i32_38 to %51 step %c1_i32_40  : i32 {
      %c1_i32_181 = arith.constant 1 : i32
      %c0_i32_182 = arith.constant 0 : i32
      %c0_i32_183 = arith.constant 0 : i32
      %268 = tpu.memref_slice %arg3[%c0_i32_182, %c0_i32_183] : memref<1024x256xi32, #tpu.memory_space<any>> -> memref<1x256xi32, #tpu.memory_space<any>>
      %c0_i32_184 = arith.constant 0 : i32
      %c0_i32_185 = arith.constant 0 : i32
      %269 = tpu.memref_slice %arg13[%c0_i32_184, %c0_i32_185] : memref<128x256xi32, #tpu.memory_space<vmem>> -> memref<1x256xi32, #tpu.memory_space<vmem>>
      %270 = tpu.memref_slice %arg16[%c1_i32_181] : memref<4x!tpu.dma_semaphore, #tpu.memory_space<semaphore_mem>> -> memref<1x!tpu.dma_semaphore, #tpu.memory_space<semaphore_mem>>
      %271 = tpu.memref_squeeze %270 : memref<1x!tpu.dma_semaphore, #tpu.memory_space<semaphore_mem>> -> memref<!tpu.dma_semaphore, #tpu.memory_space<semaphore_mem>>
      tpu.wait_dma2 semaphore(%271 : memref<!tpu.dma_semaphore, #tpu.memory_space<semaphore_mem>>) src(%268 : memref<1x256xi32, #tpu.memory_space<any>>) dst(%269 : memref<1x256xi32, #tpu.memory_space<vmem>>)
    }
    %c32 = arith.constant 32 : index
    %c0_41 = arith.constant 0 : index
    %52 = vector.load %arg13[%c32, %c0_41] : memref<128x256xi32, #tpu.memory_space<vmem>>, vector<32x256xi32>
    %c32_42 = arith.constant 32 : index
    %c0_43 = arith.constant 0 : index
    %53 = vector.load %arg14[%c32_42, %c0_43] : memref<128x256xi32, #tpu.memory_space<vmem>>, vector<32x256xi32>
    %54 = arith.andi %52, %53 : vector<32x256xi32>
    %cst_44 = arith.constant 0.000000e+00 : f32
    %55 = vector.broadcast %cst_44 : f32 to vector<32x128xf32>
    %c0_i32_45 = arith.constant 0 : i32
    %56 = vector.broadcast %c0_i32_45 : i32 to vector<32x256xi32>
    %57 = arith.shrsi %54, %56 : vector<32x256xi32>
    %c1_i32_46 = arith.constant 1 : i32
    %58 = vector.broadcast %c1_i32_46 : i32 to vector<32x256xi32>
    %59 = arith.andi %57, %58 : vector<32x256xi32>
    %60 = arith.sitofp %59 : vector<32x256xi32> to vector<32x256xf32>
    %61 = arith.truncf %60 : vector<32x256xf32> to vector<32x256xbf16>
    %c0_47 = arith.constant 0 : index
    %c0_48 = arith.constant 0 : index
    %c0_49 = arith.constant 0 : index
    %62 = vector.load %arg4[%c0_47, %c0_48, %c0_49] : memref<4x256x128xbf16, #tpu.memory_space<vmem>>, vector<1x256x128xbf16>
    %63 = vector.shape_cast %62 : vector<1x256x128xbf16> to vector<256x128xbf16>
    %cst_50 = arith.constant dense<0.000000e+00> : vector<32x128xf32>
    %64 = tpu.matmul %61, %63, %cst_50 {dimension_numbers = #tpu.dot_dimension_numbers<[1], [0], [0], [1], [0, 0, 1, 1], [], []>} : vector<32x256xbf16>, vector<256x128xbf16>, vector<32x128xf32> -> vector<32x128xf32>
    %65 = arith.addf %55, %64 : vector<32x128xf32>
    %c8_i32_51 = arith.constant 8 : i32
    %66 = vector.broadcast %c8_i32_51 : i32 to vector<32x256xi32>
    %67 = arith.shrsi %54, %66 : vector<32x256xi32>
    %c1_i32_52 = arith.constant 1 : i32
    %68 = vector.broadcast %c1_i32_52 : i32 to vector<32x256xi32>
    %69 = arith.andi %67, %68 : vector<32x256xi32>
    %70 = arith.sitofp %69 : vector<32x256xi32> to vector<32x256xf32>
    %71 = arith.truncf %70 : vector<32x256xf32> to vector<32x256xbf16>
    %c1_53 = arith.constant 1 : index
    %c0_54 = arith.constant 0 : index
    %c0_55 = arith.constant 0 : index
    %72 = vector.load %arg4[%c1_53, %c0_54, %c0_55] : memref<4x256x128xbf16, #tpu.memory_space<vmem>>, vector<1x256x128xbf16>
    %73 = vector.shape_cast %72 : vector<1x256x128xbf16> to vector<256x128xbf16>
    %cst_56 = arith.constant dense<0.000000e+00> : vector<32x128xf32>
    %74 = tpu.matmul %71, %73, %cst_56 {dimension_numbers = #tpu.dot_dimension_numbers<[1], [0], [0], [1], [0, 0, 1, 1], [], []>} : vector<32x256xbf16>, vector<256x128xbf16>, vector<32x128xf32> -> vector<32x128xf32>
    %75 = arith.addf %65, %74 : vector<32x128xf32>
    %c16_i32_57 = arith.constant 16 : i32
    %76 = vector.broadcast %c16_i32_57 : i32 to vector<32x256xi32>
    %77 = arith.shrsi %54, %76 : vector<32x256xi32>
    %c1_i32_58 = arith.constant 1 : i32
    %78 = vector.broadcast %c1_i32_58 : i32 to vector<32x256xi32>
    %79 = arith.andi %77, %78 : vector<32x256xi32>
    %80 = arith.sitofp %79 : vector<32x256xi32> to vector<32x256xf32>
    %81 = arith.truncf %80 : vector<32x256xf32> to vector<32x256xbf16>
    %c2_59 = arith.constant 2 : index
    %c0_60 = arith.constant 0 : index
    %c0_61 = arith.constant 0 : index
    %82 = vector.load %arg4[%c2_59, %c0_60, %c0_61] : memref<4x256x128xbf16, #tpu.memory_space<vmem>>, vector<1x256x128xbf16>
    %83 = vector.shape_cast %82 : vector<1x256x128xbf16> to vector<256x128xbf16>
    %cst_62 = arith.constant dense<0.000000e+00> : vector<32x128xf32>
    %84 = tpu.matmul %81, %83, %cst_62 {dimension_numbers = #tpu.dot_dimension_numbers<[1], [0], [0], [1], [0, 0, 1, 1], [], []>} : vector<32x256xbf16>, vector<256x128xbf16>, vector<32x128xf32> -> vector<32x128xf32>
    %85 = arith.addf %75, %84 : vector<32x128xf32>
    %c24_i32_63 = arith.constant 24 : i32
    %86 = vector.broadcast %c24_i32_63 : i32 to vector<32x256xi32>
    %87 = arith.shrsi %54, %86 : vector<32x256xi32>
    %c1_i32_64 = arith.constant 1 : i32
    %88 = vector.broadcast %c1_i32_64 : i32 to vector<32x256xi32>
    %89 = arith.andi %87, %88 : vector<32x256xi32>
    %90 = arith.sitofp %89 : vector<32x256xi32> to vector<32x256xf32>
    %91 = arith.truncf %90 : vector<32x256xf32> to vector<32x256xbf16>
    %c3_65 = arith.constant 3 : index
    %c0_66 = arith.constant 0 : index
    %c0_67 = arith.constant 0 : index
    %92 = vector.load %arg4[%c3_65, %c0_66, %c0_67] : memref<4x256x128xbf16, #tpu.memory_space<vmem>>, vector<1x256x128xbf16>
    %93 = vector.shape_cast %92 : vector<1x256x128xbf16> to vector<256x128xbf16>
    %cst_68 = arith.constant dense<0.000000e+00> : vector<32x128xf32>
    %94 = tpu.matmul %91, %93, %cst_68 {dimension_numbers = #tpu.dot_dimension_numbers<[1], [0], [0], [1], [0, 0, 1, 1], [], []>} : vector<32x256xbf16>, vector<256x128xbf16>, vector<32x128xf32> -> vector<32x128xf32>
    %95 = arith.addf %85, %94 : vector<32x128xf32>
    %c32_69 = arith.constant 32 : index
    %c0_70 = arith.constant 0 : index
    %96 = vector.load %arg15[%c32_69, %c0_70] : memref<128x128xf32, #tpu.memory_space<vmem>>, vector<32x128xf32>
    tpu.vector_store %arg15[%c32_69, %c0_70], %95 {strides = array<i32>} : memref<128x128xf32, #tpu.memory_space<vmem>>, vector<32x128xf32>,
    %c0_i32_71 = arith.constant 0 : i32
    %c64_i32_72 = arith.constant 64 : i32
    %97 = arith.addi %c0_i32_71, %c64_i32_72 : i32
    %c1_i32_73 = arith.constant 1 : i32
    scf.for %arg17 = %c0_i32_71 to %97 step %c1_i32_73  : i32 {
      %c2_i32 = arith.constant 2 : i32
      %c0_i32_181 = arith.constant 0 : i32
      %c0_i32_182 = arith.constant 0 : i32
      %268 = tpu.memref_slice %arg3[%c0_i32_181, %c0_i32_182] : memref<1024x256xi32, #tpu.memory_space<any>> -> memref<1x256xi32, #tpu.memory_space<any>>
      %c0_i32_183 = arith.constant 0 : i32
      %c0_i32_184 = arith.constant 0 : i32
      %269 = tpu.memref_slice %arg13[%c0_i32_183, %c0_i32_184] : memref<128x256xi32, #tpu.memory_space<vmem>> -> memref<1x256xi32, #tpu.memory_space<vmem>>
      %270 = tpu.memref_slice %arg16[%c2_i32] : memref<4x!tpu.dma_semaphore, #tpu.memory_space<semaphore_mem>> -> memref<1x!tpu.dma_semaphore, #tpu.memory_space<semaphore_mem>>
      %271 = tpu.memref_squeeze %270 : memref<1x!tpu.dma_semaphore, #tpu.memory_space<semaphore_mem>> -> memref<!tpu.dma_semaphore, #tpu.memory_space<semaphore_mem>>
      tpu.wait_dma2 semaphore(%271 : memref<!tpu.dma_semaphore, #tpu.memory_space<semaphore_mem>>) src(%268 : memref<1x256xi32, #tpu.memory_space<any>>) dst(%269 : memref<1x256xi32, #tpu.memory_space<vmem>>)
    }
    %c64 = arith.constant 64 : index
    %c0_74 = arith.constant 0 : index
    %98 = vector.load %arg13[%c64, %c0_74] : memref<128x256xi32, #tpu.memory_space<vmem>>, vector<32x256xi32>
    %c64_75 = arith.constant 64 : index
    %c0_76 = arith.constant 0 : index
    %99 = vector.load %arg14[%c64_75, %c0_76] : memref<128x256xi32, #tpu.memory_space<vmem>>, vector<32x256xi32>
    %100 = arith.andi %98, %99 : vector<32x256xi32>
    %cst_77 = arith.constant 0.000000e+00 : f32
    %101 = vector.broadcast %cst_77 : f32 to vector<32x128xf32>
    %c0_i32_78 = arith.constant 0 : i32
    %102 = vector.broadcast %c0_i32_78 : i32 to vector<32x256xi32>
    %103 = arith.shrsi %100, %102 : vector<32x256xi32>
    %c1_i32_79 = arith.constant 1 : i32
    %104 = vector.broadcast %c1_i32_79 : i32 to vector<32x256xi32>
    %105 = arith.andi %103, %104 : vector<32x256xi32>
    %106 = arith.sitofp %105 : vector<32x256xi32> to vector<32x256xf32>
    %107 = arith.truncf %106 : vector<32x256xf32> to vector<32x256xbf16>
    %c0_80 = arith.constant 0 : index
    %c0_81 = arith.constant 0 : index
    %c0_82 = arith.constant 0 : index
    %108 = vector.load %arg4[%c0_80, %c0_81, %c0_82] : memref<4x256x128xbf16, #tpu.memory_space<vmem>>, vector<1x256x128xbf16>
    %109 = vector.shape_cast %108 : vector<1x256x128xbf16> to vector<256x128xbf16>
    %cst_83 = arith.constant dense<0.000000e+00> : vector<32x128xf32>
    %110 = tpu.matmul %107, %109, %cst_83 {dimension_numbers = #tpu.dot_dimension_numbers<[1], [0], [0], [1], [0, 0, 1, 1], [], []>} : vector<32x256xbf16>, vector<256x128xbf16>, vector<32x128xf32> -> vector<32x128xf32>
    %111 = arith.addf %101, %110 : vector<32x128xf32>
    %c8_i32_84 = arith.constant 8 : i32
    %112 = vector.broadcast %c8_i32_84 : i32 to vector<32x256xi32>
    %113 = arith.shrsi %100, %112 : vector<32x256xi32>
    %c1_i32_85 = arith.constant 1 : i32
    %114 = vector.broadcast %c1_i32_85 : i32 to vector<32x256xi32>
    %115 = arith.andi %113, %114 : vector<32x256xi32>
    %116 = arith.sitofp %115 : vector<32x256xi32> to vector<32x256xf32>
    %117 = arith.truncf %116 : vector<32x256xf32> to vector<32x256xbf16>
    %c1_86 = arith.constant 1 : index
    %c0_87 = arith.constant 0 : index
    %c0_88 = arith.constant 0 : index
    %118 = vector.load %arg4[%c1_86, %c0_87, %c0_88] : memref<4x256x128xbf16, #tpu.memory_space<vmem>>, vector<1x256x128xbf16>
    %119 = vector.shape_cast %118 : vector<1x256x128xbf16> to vector<256x128xbf16>
    %cst_89 = arith.constant dense<0.000000e+00> : vector<32x128xf32>
    %120 = tpu.matmul %117, %119, %cst_89 {dimension_numbers = #tpu.dot_dimension_numbers<[1], [0], [0], [1], [0, 0, 1, 1], [], []>} : vector<32x256xbf16>, vector<256x128xbf16>, vector<32x128xf32> -> vector<32x128xf32>
    %121 = arith.addf %111, %120 : vector<32x128xf32>
    %c16_i32_90 = arith.constant 16 : i32
    %122 = vector.broadcast %c16_i32_90 : i32 to vector<32x256xi32>
    %123 = arith.shrsi %100, %122 : vector<32x256xi32>
    %c1_i32_91 = arith.constant 1 : i32
    %124 = vector.broadcast %c1_i32_91 : i32 to vector<32x256xi32>
    %125 = arith.andi %123, %124 : vector<32x256xi32>
    %126 = arith.sitofp %125 : vector<32x256xi32> to vector<32x256xf32>
    %127 = arith.truncf %126 : vector<32x256xf32> to vector<32x256xbf16>
    %c2_92 = arith.constant 2 : index
    %c0_93 = arith.constant 0 : index
    %c0_94 = arith.constant 0 : index
    %128 = vector.load %arg4[%c2_92, %c0_93, %c0_94] : memref<4x256x128xbf16, #tpu.memory_space<vmem>>, vector<1x256x128xbf16>
    %129 = vector.shape_cast %128 : vector<1x256x128xbf16> to vector<256x128xbf16>
    %cst_95 = arith.constant dense<0.000000e+00> : vector<32x128xf32>
    %130 = tpu.matmul %127, %129, %cst_95 {dimension_numbers = #tpu.dot_dimension_numbers<[1], [0], [0], [1], [0, 0, 1, 1], [], []>} : vector<32x256xbf16>, vector<256x128xbf16>, vector<32x128xf32> -> vector<32x128xf32>
    %131 = arith.addf %121, %130 : vector<32x128xf32>
    %c24_i32_96 = arith.constant 24 : i32
    %132 = vector.broadcast %c24_i32_96 : i32 to vector<32x256xi32>
    %133 = arith.shrsi %100, %132 : vector<32x256xi32>
    %c1_i32_97 = arith.constant 1 : i32
    %134 = vector.broadcast %c1_i32_97 : i32 to vector<32x256xi32>
    %135 = arith.andi %133, %134 : vector<32x256xi32>
    %136 = arith.sitofp %135 : vector<32x256xi32> to vector<32x256xf32>
    %137 = arith.truncf %136 : vector<32x256xf32> to vector<32x256xbf16>
    %c3_98 = arith.constant 3 : index
    %c0_99 = arith.constant 0 : index
    %c0_100 = arith.constant 0 : index
    %138 = vector.load %arg4[%c3_98, %c0_99, %c0_100] : memref<4x256x128xbf16, #tpu.memory_space<vmem>>, vector<1x256x128xbf16>
    %139 = vector.shape_cast %138 : vector<1x256x128xbf16> to vector<256x128xbf16>
    %cst_101 = arith.constant dense<0.000000e+00> : vector<32x128xf32>
    %140 = tpu.matmul %137, %139, %cst_101 {dimension_numbers = #tpu.dot_dimension_numbers<[1], [0], [0], [1], [0, 0, 1, 1], [], []>} : vector<32x256xbf16>, vector<256x128xbf16>, vector<32x128xf32> -> vector<32x128xf32>
    %141 = arith.addf %131, %140 : vector<32x128xf32>
    %c64_102 = arith.constant 64 : index
    %c0_103 = arith.constant 0 : index
    %142 = vector.load %arg15[%c64_102, %c0_103] : memref<128x128xf32, #tpu.memory_space<vmem>>, vector<32x128xf32>
    tpu.vector_store %arg15[%c64_102, %c0_103], %141 {strides = array<i32>} : memref<128x128xf32, #tpu.memory_space<vmem>>, vector<32x128xf32>,
    %c0_i32_104 = arith.constant 0 : i32
    %c64_i32_105 = arith.constant 64 : i32
    %143 = arith.addi %c0_i32_104, %c64_i32_105 : i32
    %c1_i32_106 = arith.constant 1 : i32
    scf.for %arg17 = %c0_i32_104 to %143 step %c1_i32_106  : i32 {
      %c3_i32 = arith.constant 3 : i32
      %c0_i32_181 = arith.constant 0 : i32
      %c0_i32_182 = arith.constant 0 : i32
      %268 = tpu.memref_slice %arg3[%c0_i32_181, %c0_i32_182] : memref<1024x256xi32, #tpu.memory_space<any>> -> memref<1x256xi32, #tpu.memory_space<any>>
      %c0_i32_183 = arith.constant 0 : i32
      %c0_i32_184 = arith.constant 0 : i32
      %269 = tpu.memref_slice %arg13[%c0_i32_183, %c0_i32_184] : memref<128x256xi32, #tpu.memory_space<vmem>> -> memref<1x256xi32, #tpu.memory_space<vmem>>
      %270 = tpu.memref_slice %arg16[%c3_i32] : memref<4x!tpu.dma_semaphore, #tpu.memory_space<semaphore_mem>> -> memref<1x!tpu.dma_semaphore, #tpu.memory_space<semaphore_mem>>
      %271 = tpu.memref_squeeze %270 : memref<1x!tpu.dma_semaphore, #tpu.memory_space<semaphore_mem>> -> memref<!tpu.dma_semaphore, #tpu.memory_space<semaphore_mem>>
      tpu.wait_dma2 semaphore(%271 : memref<!tpu.dma_semaphore, #tpu.memory_space<semaphore_mem>>) src(%268 : memref<1x256xi32, #tpu.memory_space<any>>) dst(%269 : memref<1x256xi32, #tpu.memory_space<vmem>>)
    }
    %c96 = arith.constant 96 : index
    %c0_107 = arith.constant 0 : index
    %144 = vector.load %arg13[%c96, %c0_107] : memref<128x256xi32, #tpu.memory_space<vmem>>, vector<32x256xi32>
    %c96_108 = arith.constant 96 : index
    %c0_109 = arith.constant 0 : index
    %145 = vector.load %arg14[%c96_108, %c0_109] : memref<128x256xi32, #tpu.memory_space<vmem>>, vector<32x256xi32>
    %146 = arith.andi %144, %145 : vector<32x256xi32>
    %cst_110 = arith.constant 0.000000e+00 : f32
    %147 = vector.broadcast %cst_110 : f32 to vector<32x128xf32>
    %c0_i32_111 = arith.constant 0 : i32
    %148 = vector.broadcast %c0_i32_111 : i32 to vector<32x256xi32>
    %149 = arith.shrsi %146, %148 : vector<32x256xi32>
    %c1_i32_112 = arith.constant 1 : i32
    %150 = vector.broadcast %c1_i32_112 : i32 to vector<32x256xi32>
    %151 = arith.andi %149, %150 : vector<32x256xi32>
    %152 = arith.sitofp %151 : vector<32x256xi32> to vector<32x256xf32>
    %153 = arith.truncf %152 : vector<32x256xf32> to vector<32x256xbf16>
    %c0_113 = arith.constant 0 : index
    %c0_114 = arith.constant 0 : index
    %c0_115 = arith.constant 0 : index
    %154 = vector.load %arg4[%c0_113, %c0_114, %c0_115] : memref<4x256x128xbf16, #tpu.memory_space<vmem>>, vector<1x256x128xbf16>
    %155 = vector.shape_cast %154 : vector<1x256x128xbf16> to vector<256x128xbf16>
    %cst_116 = arith.constant dense<0.000000e+00> : vector<32x128xf32>
    %156 = tpu.matmul %153, %155, %cst_116 {dimension_numbers = #tpu.dot_dimension_numbers<[1], [0], [0], [1], [0, 0, 1, 1], [], []>} : vector<32x256xbf16>, vector<256x128xbf16>, vector<32x128xf32> -> vector<32x128xf32>
    %157 = arith.addf %147, %156 : vector<32x128xf32>
    %c8_i32_117 = arith.constant 8 : i32
    %158 = vector.broadcast %c8_i32_117 : i32 to vector<32x256xi32>
    %159 = arith.shrsi %146, %158 : vector<32x256xi32>
    %c1_i32_118 = arith.constant 1 : i32
    %160 = vector.broadcast %c1_i32_118 : i32 to vector<32x256xi32>
    %161 = arith.andi %159, %160 : vector<32x256xi32>
    %162 = arith.sitofp %161 : vector<32x256xi32> to vector<32x256xf32>
    %163 = arith.truncf %162 : vector<32x256xf32> to vector<32x256xbf16>
    %c1_119 = arith.constant 1 : index
    %c0_120 = arith.constant 0 : index
    %c0_121 = arith.constant 0 : index
    %164 = vector.load %arg4[%c1_119, %c0_120, %c0_121] : memref<4x256x128xbf16, #tpu.memory_space<vmem>>, vector<1x256x128xbf16>
    %165 = vector.shape_cast %164 : vector<1x256x128xbf16> to vector<256x128xbf16>
    %cst_122 = arith.constant dense<0.000000e+00> : vector<32x128xf32>
    %166 = tpu.matmul %163, %165, %cst_122 {dimension_numbers = #tpu.dot_dimension_numbers<[1], [0], [0], [1], [0, 0, 1, 1], [], []>} : vector<32x256xbf16>, vector<256x128xbf16>, vector<32x128xf32> -> vector<32x128xf32>
    %167 = arith.addf %157, %166 : vector<32x128xf32>
    %c16_i32_123 = arith.constant 16 : i32
    %168 = vector.broadcast %c16_i32_123 : i32 to vector<32x256xi32>
    %169 = arith.shrsi %146, %168 : vector<32x256xi32>
    %c1_i32_124 = arith.constant 1 : i32
    %170 = vector.broadcast %c1_i32_124 : i32 to vector<32x256xi32>
    %171 = arith.andi %169, %170 : vector<32x256xi32>
    %172 = arith.sitofp %171 : vector<32x256xi32> to vector<32x256xf32>
    %173 = arith.truncf %172 : vector<32x256xf32> to vector<32x256xbf16>
    %c2_125 = arith.constant 2 : index
    %c0_126 = arith.constant 0 : index
    %c0_127 = arith.constant 0 : index
    %174 = vector.load %arg4[%c2_125, %c0_126, %c0_127] : memref<4x256x128xbf16, #tpu.memory_space<vmem>>, vector<1x256x128xbf16>
    %175 = vector.shape_cast %174 : vector<1x256x128xbf16> to vector<256x128xbf16>
    %cst_128 = arith.constant dense<0.000000e+00> : vector<32x128xf32>
    %176 = tpu.matmul %173, %175, %cst_128 {dimension_numbers = #tpu.dot_dimension_numbers<[1], [0], [0], [1], [0, 0, 1, 1], [], []>} : vector<32x256xbf16>, vector<256x128xbf16>, vector<32x128xf32> -> vector<32x128xf32>
    %177 = arith.addf %167, %176 : vector<32x128xf32>
    %c24_i32_129 = arith.constant 24 : i32
    %178 = vector.broadcast %c24_i32_129 : i32 to vector<32x256xi32>
    %179 = arith.shrsi %146, %178 : vector<32x256xi32>
    %c1_i32_130 = arith.constant 1 : i32
    %180 = vector.broadcast %c1_i32_130 : i32 to vector<32x256xi32>
    %181 = arith.andi %179, %180 : vector<32x256xi32>
    %182 = arith.sitofp %181 : vector<32x256xi32> to vector<32x256xf32>
    %183 = arith.truncf %182 : vector<32x256xf32> to vector<32x256xbf16>
    %c3_131 = arith.constant 3 : index
    %c0_132 = arith.constant 0 : index
    %c0_133 = arith.constant 0 : index
    %184 = vector.load %arg4[%c3_131, %c0_132, %c0_133] : memref<4x256x128xbf16, #tpu.memory_space<vmem>>, vector<1x256x128xbf16>
    %185 = vector.shape_cast %184 : vector<1x256x128xbf16> to vector<256x128xbf16>
    %cst_134 = arith.constant dense<0.000000e+00> : vector<32x128xf32>
    %186 = tpu.matmul %183, %185, %cst_134 {dimension_numbers = #tpu.dot_dimension_numbers<[1], [0], [0], [1], [0, 0, 1, 1], [], []>} : vector<32x256xbf16>, vector<256x128xbf16>, vector<32x128xf32> -> vector<32x128xf32>
    %187 = arith.addf %177, %186 : vector<32x128xf32>
    %c96_135 = arith.constant 96 : index
    %c0_136 = arith.constant 0 : index
    %188 = vector.load %arg15[%c96_135, %c0_136] : memref<128x128xf32, #tpu.memory_space<vmem>>, vector<32x128xf32>
    tpu.vector_store %arg15[%c96_135, %c0_136], %187 {strides = array<i32>} : memref<128x128xf32, #tpu.memory_space<vmem>>, vector<32x128xf32>,
    %c0_137 = arith.constant 0 : index
    %c0_138 = arith.constant 0 : index
    %189 = vector.load %arg10[%c0_137, %c0_138] : memref<6x128xf32, #tpu.memory_space<vmem>>, vector<6x128xf32>
    %c0_139 = arith.constant 0 : index
    %c0_140 = arith.constant 0 : index
    %190 = vector.load %arg15[%c0_139, %c0_140] : memref<128x128xf32, #tpu.memory_space<vmem>>, vector<128x128xf32>
    %c1_141 = arith.constant 1 : index
    %c0_142 = arith.constant 0 : index
    %c0_143 = arith.constant 0 : index
    %191 = vector.load %arg7[%c1_141, %c0_142, %c0_143] : memref<2x128x128xbf16, #tpu.memory_space<vmem>>, vector<1x128x128xbf16>
    %192 = vector.shape_cast %191 : vector<1x128x128xbf16> to vector<128x128xbf16>
    %193 = arith.truncf %190 : vector<128x128xf32> to vector<128x128xbf16>
    %cst_144 = arith.constant dense<0.000000e+00> : vector<128x128xf32>
    %194 = tpu.matmul %193, %192, %cst_144 {dimension_numbers = #tpu.dot_dimension_numbers<[1], [0], [0], [1], [0, 0, 1, 1], [], []>} : vector<128x128xbf16>, vector<128x128xbf16>, vector<128x128xf32> -> vector<128x128xf32>
    %195 = vector.extract_strided_slice %189 {offsets = [2, 0], sizes = [1, 128], strides = [1, 1]} : vector<6x128xf32> to vector<1x128xf32>
    %196 = vector.shape_cast %195 : vector<1x128xf32> to vector<128xf32>
    %197 = vector.shape_cast %196 : vector<128xf32> to vector<1x128xf32>
    %198 = vector.broadcast %197 : vector<1x128xf32> to vector<128x128xf32>
    %199 = arith.addf %194, %198 : vector<128x128xf32>
    %cst_145 = arith.constant 0.000000e+00 : f32
    %200 = vector.broadcast %cst_145 : f32 to vector<128x128xf32>
    %201 = arith.maximumf %199, %200 : vector<128x128xf32>
    %c1_146 = arith.constant 1 : index
    %c0_147 = arith.constant 0 : index
    %c0_148 = arith.constant 0 : index
    %202 = vector.load %arg8[%c1_146, %c0_147, %c0_148] : memref<4x128x128xbf16, #tpu.memory_space<vmem>>, vector<1x128x128xbf16>
    %203 = vector.shape_cast %202 : vector<1x128x128xbf16> to vector<128x128xbf16>
    %204 = arith.truncf %201 : vector<128x128xf32> to vector<128x128xbf16>
    %cst_149 = arith.constant dense<0.000000e+00> : vector<128x128xf32>
    %205 = tpu.matmul %204, %203, %cst_149 {dimension_numbers = #tpu.dot_dimension_numbers<[1], [0], [0], [1], [0, 0, 1, 1], [], []>} : vector<128x128xbf16>, vector<128x128xbf16>, vector<128x128xf32> -> vector<128x128xf32>
    %206 = vector.extract_strided_slice %189 {offsets = [3, 0], sizes = [1, 128], strides = [1, 1]} : vector<6x128xf32> to vector<1x128xf32>
    %207 = vector.shape_cast %206 : vector<1x128xf32> to vector<128xf32>
    %208 = vector.shape_cast %207 : vector<128xf32> to vector<1x128xf32>
    %209 = vector.broadcast %208 : vector<1x128xf32> to vector<128x128xf32>
    %210 = arith.addf %205, %209 : vector<128x128xf32>
    %cst_150 = arith.constant 0.000000e+00 : f32
    %211 = vector.broadcast %cst_150 : f32 to vector<128x128xf32>
    %212 = arith.maximumf %210, %211 : vector<128x128xf32>
    %c2_151 = arith.constant 2 : index
    %c0_152 = arith.constant 0 : index
    %c0_153 = arith.constant 0 : index
    %213 = vector.load %arg8[%c2_151, %c0_152, %c0_153] : memref<4x128x128xbf16, #tpu.memory_space<vmem>>, vector<1x128x128xbf16>
    %214 = vector.shape_cast %213 : vector<1x128x128xbf16> to vector<128x128xbf16>
    %215 = arith.truncf %212 : vector<128x128xf32> to vector<128x128xbf16>
    %cst_154 = arith.constant dense<0.000000e+00> : vector<128x128xf32>
    %216 = tpu.matmul %215, %214, %cst_154 {dimension_numbers = #tpu.dot_dimension_numbers<[1], [0], [0], [1], [0, 0, 1, 1], [], []>} : vector<128x128xbf16>, vector<128x128xbf16>, vector<128x128xf32> -> vector<128x128xf32>
    %217 = vector.extract_strided_slice %189 {offsets = [4, 0], sizes = [1, 128], strides = [1, 1]} : vector<6x128xf32> to vector<1x128xf32>
    %218 = vector.shape_cast %217 : vector<1x128xf32> to vector<128xf32>
    %219 = vector.shape_cast %218 : vector<128xf32> to vector<1x128xf32>
    %220 = vector.broadcast %219 : vector<1x128xf32> to vector<128x128xf32>
    %221 = arith.addf %216, %220 : vector<128x128xf32>
    %c0_155 = arith.constant 0 : index
    %c0_156 = arith.constant 0 : index
    %222 = vector.load %arg5[%c0_155, %c0_156] : memref<128x128xbf16, #tpu.memory_space<vmem>>, vector<128x128xbf16>
    %223 = arith.extf %222 : vector<128x128xbf16> to vector<128x128xf32>
    %c0_157 = arith.constant 0 : index
    %c0_158 = arith.constant 0 : index
    %224 = vector.load %arg6[%c0_157, %c0_158] : memref<128x128xbf16, #tpu.memory_space<vmem>>, vector<128x128xbf16>
    %225 = arith.extf %224 : vector<128x128xbf16> to vector<128x128xf32>
    %226 = arith.mulf %223, %225 : vector<128x128xf32>
    %c0_159 = arith.constant 0 : index
    %c0_160 = arith.constant 0 : index
    %c0_161 = arith.constant 0 : index
    %227 = vector.load %arg7[%c0_159, %c0_160, %c0_161] : memref<2x128x128xbf16, #tpu.memory_space<vmem>>, vector<1x128x128xbf16>
    %228 = vector.shape_cast %227 : vector<1x128x128xbf16> to vector<128x128xbf16>
    %229 = arith.truncf %226 : vector<128x128xf32> to vector<128x128xbf16>
    %cst_162 = arith.constant dense<0.000000e+00> : vector<128x128xf32>
    %230 = tpu.matmul %229, %228, %cst_162 {dimension_numbers = #tpu.dot_dimension_numbers<[1], [0], [0], [1], [0, 0, 1, 1], [], []>} : vector<128x128xbf16>, vector<128x128xbf16>, vector<128x128xf32> -> vector<128x128xf32>
    %231 = vector.extract_strided_slice %189 {offsets = [0, 0], sizes = [1, 128], strides = [1, 1]} : vector<6x128xf32> to vector<1x128xf32>
    %232 = vector.shape_cast %231 : vector<1x128xf32> to vector<128xf32>
    %233 = vector.shape_cast %232 : vector<128xf32> to vector<1x128xf32>
    %234 = vector.broadcast %233 : vector<1x128xf32> to vector<128x128xf32>
    %235 = arith.addf %230, %234 : vector<128x128xf32>
    %cst_163 = arith.constant 0.000000e+00 : f32
    %236 = vector.broadcast %cst_163 : f32 to vector<128x128xf32>
    %237 = arith.maximumf %235, %236 : vector<128x128xf32>
    %c0_164 = arith.constant 0 : index
    %c0_165 = arith.constant 0 : index
    %c0_166 = arith.constant 0 : index
    %238 = vector.load %arg8[%c0_164, %c0_165, %c0_166] : memref<4x128x128xbf16, #tpu.memory_space<vmem>>, vector<1x128x128xbf16>
    %239 = vector.shape_cast %238 : vector<1x128x128xbf16> to vector<128x128xbf16>
    %240 = arith.truncf %237 : vector<128x128xf32> to vector<128x128xbf16>
    %cst_167 = arith.constant dense<0.000000e+00> : vector<128x128xf32>
    %241 = tpu.matmul %240, %239, %cst_167 {dimension_numbers = #tpu.dot_dimension_numbers<[1], [0], [0], [1], [0, 0, 1, 1], [], []>} : vector<128x128xbf16>, vector<128x128xbf16>, vector<128x128xf32> -> vector<128x128xf32>
    %242 = vector.extract_strided_slice %189 {offsets = [1, 0], sizes = [1, 128], strides = [1, 1]} : vector<6x128xf32> to vector<1x128xf32>
    %243 = vector.shape_cast %242 : vector<1x128xf32> to vector<128xf32>
    %244 = vector.shape_cast %243 : vector<128xf32> to vector<1x128xf32>
    %245 = vector.broadcast %244 : vector<1x128xf32> to vector<128x128xf32>
    %246 = arith.addf %241, %245 : vector<128x128xf32>
    %247 = arith.addf %221, %246 : vector<128x128xf32>
    %c3_168 = arith.constant 3 : index
    %c0_169 = arith.constant 0 : index
    %c0_170 = arith.constant 0 : index
    %248 = vector.load %arg8[%c3_168, %c0_169, %c0_170] : memref<4x128x128xbf16, #tpu.memory_space<vmem>>, vector<1x128x128xbf16>
    %249 = vector.shape_cast %248 : vector<1x128x128xbf16> to vector<128x128xbf16>
    %250 = arith.truncf %247 : vector<128x128xf32> to vector<128x128xbf16>
    %cst_171 = arith.constant dense<0.000000e+00> : vector<128x128xf32>
    %251 = tpu.matmul %250, %249, %cst_171 {dimension_numbers = #tpu.dot_dimension_numbers<[1], [0], [0], [1], [0, 0, 1, 1], [], []>} : vector<128x128xbf16>, vector<128x128xbf16>, vector<128x128xf32> -> vector<128x128xf32>
    %252 = vector.extract_strided_slice %189 {offsets = [5, 0], sizes = [1, 128], strides = [1, 1]} : vector<6x128xf32> to vector<1x128xf32>
    %253 = vector.shape_cast %252 : vector<1x128xf32> to vector<128xf32>
    %254 = vector.shape_cast %253 : vector<128xf32> to vector<1x128xf32>
    %255 = vector.broadcast %254 : vector<1x128xf32> to vector<128x128xf32>
    %256 = arith.addf %251, %255 : vector<128x128xf32>
    %cst_172 = arith.constant 0.000000e+00 : f32
    %257 = vector.broadcast %cst_172 : f32 to vector<128x128xf32>
    %258 = arith.maximumf %256, %257 : vector<128x128xf32>
    %c0_173 = arith.constant 0 : index
    %c0_174 = arith.constant 0 : index
    %259 = vector.load %arg9[%c0_173, %c0_174] : memref<1x128xbf16, #tpu.memory_space<vmem>>, vector<1x128xbf16>
    %260 = arith.truncf %258 : vector<128x128xf32> to vector<128x128xbf16>
    %cst_175 = arith.constant dense<0.000000e+00> : vector<1x128xf32>
    %261 = tpu.matmul %259, %260, %cst_175 {dimension_numbers = #tpu.dot_dimension_numbers<[1], [1], [0], [0], [0, 0, 1, 0], [], []>} : vector<1x128xbf16>, vector<128x128xbf16>, vector<1x128xf32> -> vector<1x128xf32>
    %c0_176 = arith.constant 0 : index
    %c0_177 = arith.constant 0 : index
    %262 = vector.load %arg11[%c0_176, %c0_177] : memref<1x1xf32, #tpu.memory_space<vmem>>, vector<1x1xf32>
    %263 = vector.broadcast %262 : vector<1x1xf32> to vector<1x128xf32>
    %264 = arith.addf %261, %263 : vector<1x128xf32>
    %c0_178 = arith.constant 0 : index
    %c0_179 = arith.constant 0 : index
    %c0_180 = arith.constant 0 : index
    %265 = vector.load %arg12[%c0_178, %c0_179, %c0_180] : memref<1x1x128xf32, #tpu.memory_space<vmem>>, vector<1x1x128xf32>
    %266 = vector.shape_cast %265 : vector<1x1x128xf32> to vector<1x128xf32>
    %267 = vector.shape_cast %264 : vector<1x128xf32> to vector<1x1x128xf32>
    tpu.vector_store %arg12[%c0_178, %c0_179, %c0_180], %267 {strides = array<i32>} : memref<1x1x128xf32, #tpu.memory_space<vmem>>, vector<1x1x128xf32>,
    return
  }
  func.func @transform_1(%arg0: i32, %arg1: memref<384xi32, #tpu.memory_space<smem>>, %arg2: memref<384xi32, #tpu.memory_space<smem>>) -> (i32, i32, i32) {
    %c0_i32 = arith.constant 0 : i32
    %c0_i32_0 = arith.constant 0 : i32
    %c0_i32_1 = arith.constant 0 : i32
    %c0_i32_2 = arith.constant 0 : i32
    return %c0_i32, %c0_i32_0, %c0_i32_1 : i32, i32, i32
  }
  func.func @transform_2(%arg0: i32, %arg1: memref<384xi32, #tpu.memory_space<smem>>, %arg2: memref<384xi32, #tpu.memory_space<smem>>) -> (i32, i32) {
    %c0_i32 = arith.constant 0 : i32
    %c0_i32_0 = arith.constant 0 : i32
    return %arg0, %c0_i32 : i32, i32
  }
  func.func @transform_3(%arg0: i32, %arg1: memref<384xi32, #tpu.memory_space<smem>>, %arg2: memref<384xi32, #tpu.memory_space<smem>>) -> (i32, i32) {
    %c0_i32 = arith.constant 0 : i32
    %c0_i32_0 = arith.constant 0 : i32
    return %arg0, %c0_i32 : i32, i32
  }
  func.func @transform_4(%arg0: i32, %arg1: memref<384xi32, #tpu.memory_space<smem>>, %arg2: memref<384xi32, #tpu.memory_space<smem>>) -> (i32, i32, i32) {
    %c0_i32 = arith.constant 0 : i32
    %c0_i32_0 = arith.constant 0 : i32
    %c0_i32_1 = arith.constant 0 : i32
    %c0_i32_2 = arith.constant 0 : i32
    return %c0_i32, %c0_i32_0, %c0_i32_1 : i32, i32, i32
  }
  func.func @transform_5(%arg0: i32, %arg1: memref<384xi32, #tpu.memory_space<smem>>, %arg2: memref<384xi32, #tpu.memory_space<smem>>) -> (i32, i32, i32) {
    %c0_i32 = arith.constant 0 : i32
    %c0_i32_0 = arith.constant 0 : i32
    %c0_i32_1 = arith.constant 0 : i32
    %c0_i32_2 = arith.constant 0 : i32
    return %c0_i32, %c0_i32_0, %c0_i32_1 : i32, i32, i32
  }
  func.func @transform_6(%arg0: i32, %arg1: memref<384xi32, #tpu.memory_space<smem>>, %arg2: memref<384xi32, #tpu.memory_space<smem>>) -> (i32, i32) {
    %c0_i32 = arith.constant 0 : i32
    %c0_i32_0 = arith.constant 0 : i32
    %c0_i32_1 = arith.constant 0 : i32
    return %c0_i32, %c0_i32_0 : i32, i32
  }
  func.func @transform_7(%arg0: i32, %arg1: memref<384xi32, #tpu.memory_space<smem>>, %arg2: memref<384xi32, #tpu.memory_space<smem>>) -> (i32, i32) {
    %c0_i32 = arith.constant 0 : i32
    %c0_i32_0 = arith.constant 0 : i32
    %c0_i32_1 = arith.constant 0 : i32
    return %c0_i32, %c0_i32_0 : i32, i32
  }
  func.func @transform_8(%arg0: i32, %arg1: memref<384xi32, #tpu.memory_space<smem>>, %arg2: memref<384xi32, #tpu.memory_space<smem>>) -> (i32, i32) {
    %c0_i32 = arith.constant 0 : i32
    %c0_i32_0 = arith.constant 0 : i32
    %c0_i32_1 = arith.constant 0 : i32
    return %c0_i32, %c0_i32_0 : i32, i32
  }
  func.func @transform_9(%arg0: i32, %arg1: memref<384xi32, #tpu.memory_space<smem>>, %arg2: memref<384xi32, #tpu.memory_space<smem>>) -> (i32, i32, i32) {
    %c0_i32 = arith.constant 0 : i32
    %c0_i32_0 = arith.constant 0 : i32
    %c0_i32_1 = arith.constant 0 : i32
    return %arg0, %c0_i32, %c0_i32_0 : i32, i32, i32
  }
}

</mosaic_0001>

<bundles_post_ra>
// kernel: _lambda_.1
= control target key start
LH: loop header
LB: loop body
LE: loop exit
PB: predicated region body
PF: predicated region fallthrough
CT: control target
= control target key end

     0   :  { %s9617_s0 = inlined_call_operand.vmem [shape: s32[384], index: 0, kind: input, shape index: {}]   ;;  %s9618_s2 = inlined_call_operand.vmem [shape: s32[1024,256], index: 2, kind: input, shape index: {}]   ;;  %s9619_s3 = inlined_call_operand.vmem [shape: bf16[4,256,128], index: 3, kind: input, shape index: {}]   ;;  %s9620_s4 = inlined_call_operand.vmem [shape: bf16[384,128], index: 4, kind: input, shape index: {}]   ;;  %s9621_s5 = inlined_call_operand.vmem [shape: bf16[384,128], index: 5, kind: input, shape index: {}]   ;;  %s9622_s6 = inlined_call_operand.vmem [shape: bf16[2,128,128], index: 6, kind: input, shape index: {}]   ;;  %s9623_s7 = inlined_call_operand.vmem [shape: bf16[4,128,128], index: 7, kind: input, shape index: {}]   ;;  %s9624_s8 = inlined_call_operand.vmem [shape: bf16[1,128], index: 8, kind: input, shape index: {}]   ;;  %s9625_s9 = inlined_call_operand.vmem [shape: f32[6,128], index: 9, kind: input, shape index: {}]   ;;  %s9626_s11 = inlined_call_operand.hbm [shape: f32[3,1,128], index: 11, kind: output, shape index: {}]   ;;  %s9627_s1 = inlined_call_operand.vmem [shape: s32[384], index: 1, kind: input, shape index: {}]   ;;  %s9628_s10 = inlined_call_operand.<no memory space> [shape: f32[1,1], index: 10, kind: input, shape index: {}]  }
   0x1   :  { %9639 = sst [smem:[#allocation33_spill]] %s9620_s4  ;;  %s16_s19 = sshll.u32 %s9617_s0, 4  ;;  %v24_v0 = vstv %s9628_s10  ;;  %s17_s19 = int_to_ptr.vmem [resolvable:$true] %s16_s19 }
   0x2   :  { %9640 = sst [smem:[#allocation34_spill]] %s9621_s5  ;;  %s20_s22 = sshll.u32 %s9627_s1, 4  ;;  %25 = vst [vmem:[#allocation9] sm:$0x1] %v24_v0  ;;  %s21_s22 = int_to_ptr.vmem [resolvable:$true] %s20_s22 }
   0x3   :  { %9641 = sst [smem:[#allocation35_spill]] %s9626_s11  ;;  %s7906_s25 = scalar_lea.vmem %s17_s19, 48 }
   0x4   :  { %p7907_p0 = scmp.ne.s32.totalorder %s17_s19, %s7906_s25  ;;  %s7910_s26 = scalar_lea.vmem %s17_s19, 64 }
   0x5   :  { %p7911_p1 = scmp.lt.s32.totalorder %s17_s19, %s17_s19  ;;  %p7912_p2 = scmp.lt.s32.totalorder %s7910_s26, %s7906_s25 }
   0x7   :  { %p7913_p3 = por %p7912_p2, %p7911_p1 }
   0x9   :  { %p7914_p4 = pnand %p7913_p3, %p7907_p0 }
   0xb   :  { %7917 = shalt.err (!%p7914_p4)  }
   0xc   :  { %s8068_s0 = smov [#allocation7]   ;;  %s7918_s27 = scalar_lea.vmem %s21_s22, 48 }
   0xd   :  { %19 = dma.vmem_to_smem %s17_s19, 48, %s8068_s0, [#allocation6] }
   0xe   :  { %p7919_p5 = scmp.ne.s32.totalorder %s21_s22, %s7918_s27  ;;  %s7922_s1 = scalar_lea.vmem %s21_s22, 64 }
   0xf   :  { %p7923_p6 = scmp.lt.s32.totalorder %s21_s22, %s21_s22  ;;  %p7924_p7 = scmp.lt.s32.totalorder %s7922_s1, %s7918_s27 }
  0x11   :  { %p7925_p8 = por %p7924_p7, %p7923_p6 }
  0x13   :  { %p7926_p9 = pnand %p7925_p8, %p7919_p5 }
  0x15   :  { %7929 = shalt.err (!%p7926_p9)  }
  0x16   :  { %s8069_s10 = smov [#allocation8]  }
  0x17   :  { %23 = dma.vmem_to_smem %s21_s22, 48, %s8069_s10, [#allocation6] }
  0x18   :  { %8006 = dma.done.wait [#allocation6], 96 }
  0x19   :  { %8007 = vsyncadd [#allocation6], 4294967200 }
  0x1a   :  { %27 = sfence }
  0x1b   :  { %28 = vsyncpa [#allocation11], 0 }
  0x1c   :  { %30 = vsyncpa [#allocation11 + $0x1], 0  ;;  %s8143_s28 = smov 0   ;;  %s8145_s29 = smov 0  }
  0x1d   :  { %s8147_s30 = smov 0   ;;  %s8149_s12 = smov 0  }
  0x1e LB: > { %9642 = sst [smem:[#allocation26_spill]] %s8022_s28  ;;  %s5821_s13 = sadd.s32 4294967295, %s8034_s12   ;;  %s8034_s12 = sphi %s8149_s12, %s9659_s12   ;;  %s8030_s30 = sphi %s8147_s30, %s9661_s30   ;;  %s8026_s29 = sphi %s8145_s29, %s9663_s29   ;;  %s8022_s28 = sphi %s8143_s28, %s9662_s28  }
  0x1f   : > { %9643 = sst [smem:[#allocation27_spill]] %s8030_s30  ;;  %s5822_s14 = sadd.s32 4294967294, %s8034_s12  }
  0x20   : > { %9644 = sst [smem:[#allocation28_spill]] %s8034_s12  ;;  %s8166_s15 = sadd.s32 1, %s8034_s12  }
  0x21   : > { %9645 = sst [smem:[#allocation29_spill]] %s8166_s15  ;;  %s221_s16 = sadd.s32 1, %s8030_s30 }
  0x22   : > { %s218_s17 = ssub.s32 %s8034_s12, %s8166_s15  ;;  %p231_p10 = scmp.ne.s32.totalorder %s8030_s30, %s8026_s29 }
  0x23   : > { %p219_p11 = scmp.eq.s32.totalorder %s218_s17, 0  ;;  %p232_p12 = scmp.eq.s32.totalorder %s5821_s13, 2 }
  0x24   : > { %p237_p13 = scmp.ne.s32.totalorder %s8026_s29, %s8022_s28  ;;  %p238_p0 = scmp.eq.s32.totalorder %s5822_s14, 2 }
  0x25   : > { %s8176_s18 = scalar_select %p219_p11, %s8030_s30, %s221_s16  }
  0x26   : > { %p8178_p1 = por %p232_p12, %p231_p10  ;;  %p8182_p2 = por %p238_p0, %p237_p13 }
  0x27   : > { %9646 = sst [smem:[#allocation30_spill]] %s8176_s18  ;;  %p5825_p3 = scmp.ge.s32.totalorder %s8034_s12, 1 }
  0x28   : > { %s9647_s19 = scalar_select %p8178_p1, 1, 0 }
  0x29   : > { %s9649_s20 = scalar_select %p8182_p2, 1, 0 }
  0x2a   : > { %9648 = sst [smem:[#allocation31_spill]] %s9647_s19  ;;  %p292_p4 = scmp.lt.s32.totalorder %s8034_s12, 4 }
  0x2b   : > { %9650 = sst [smem:[#allocation32_spill]] %s9649_s20 }
  0x2c   : > { %p293_p5 = pnand %p5825_p3, %p292_p4 }
  0x2d   : > { %s9629_s21 = sand.u32 (!%p293_p5), 1, %s8026_s29   ;;  %s8189_s22 = sshll.u32 (!%p293_p5), %s5821_s13, 4 }
  0x2e   : > { %296 = sbr.rel (%p293_p5) target bundleno = 2610 (0xa32), region = 52  ;;  %p331_p6 = scmp.lt.s32.totalorder (!%p293_p5), %s8189_s22, 47 }
  0x2f   : > { %s8192_s23 = sshll.u32 (!%p293_p5), %s5821_s13, 7  ;;  %s9651_s4 = sld [smem:[#allocation33_spill]] (!%p293_p5) }
  0x30   : > { %s9652_s5 = sld [smem:[#allocation34_spill]] (!%p293_p5)  ;;  %s8207_s16 = scalar_lea.vmem (!%p293_p5), [#allocation10], %s9629_s21 }
  0x31   : > { %s8209_s17 = smov (!%p293_p5), 0  }
  0x35   : > { %s332_s24 = scalar_select %p331_p6, %s8189_s22, 47 }
  0x37   : > { %s5827_s25 = sshll.u32 %s332_s24, 2 }
  0x38   : > { %s8198_s27 = scalar_lea.vmem %s9651_s4, %s5827_s25  ;;  %s8203_s14 = scalar_lea.vmem %s9652_s5, %s5827_s25 }
  0x39 LB: >> { %s350_s13 = sadd.s32 %s8038_s17, %s8192_s23  ;;  %s357_s24 = sshrl.u32 %s8038_s17, 3  ;;  %s8038_s17 = sphi %s8209_s17, %s349_s17  }
  0x3a   : >> { %s351_s26 = sld [smem:[#allocation7 + %s350_s13]]  ;;  %s358_s0 = sand.u32 7, %s8038_s17  }
  0x3b   : >> { %s5832_s25 = sshll.u32 %s357_s24, 4 }
  0x3c   : >> { %s360_s1 = sadd.s32 %s5832_s25, %s358_s0 }
  0x3d   : >> { %s361_s20 = scalar_lea.vmem [#allocation2], %s360_s1 }
  0x40   : >> { %s352_s10 = sshrl.u32 %s351_s26, 3  ;;  %s353_s21 = sand.u32 7, %s351_s26  }
  0x41   : >> { %s5831_s4 = sshll.u32 %s352_s10, 4 }
  0x42   : >> { %s355_s5 = sadd.s32 %s5831_s4, %s353_s21 }
  0x43   : >> { %s356_s15 = scalar_lea.vmem %s9618_s2, %s355_s5 }
  0x44   : >> { %v379_v1 = vld [vmem:[%s356_s15] sm:$0x1]  ;;  %v381_v2 = vld [vmem:[%s356_s15 + $0x8] sm:$0x1] }
  0x45   : >> { %380 = vst [vmem:[%s361_s20] sm:$0x1] %v379_v1  ;;  %382 = vst [vmem:[%s361_s20 + $0x8] sm:$0x1] %v381_v2 }
  0x46   : >> { %409 = vsyncadd [#allocation5], 32  ;;  %s410_s28 = sld [smem:[#allocation8 + %s350_s13]]  ;;  %s416_s4 = scalar_lea.vmem [#allocation3], %s360_s1 }
  0x4c   : >> { %s411_s12 = sshrl.u32 %s410_s28, 3  ;;  %s412_s11 = sand.u32 7, %s410_s28  }
  0x4d   : >> { %s5833_s19 = sshll.u32 %s411_s12, 4 }
  0x4e   : >> { %s414_s24 = sadd.s32 %s5833_s19, %s412_s11 }
  0x4f   : >> { %s415_s26 = scalar_lea.vmem %s9618_s2, %s414_s24 }
  0x50   : >> { %v434_v3 = vld [vmem:[%s415_s26] sm:$0x1]  ;;  %v436_v4 = vld [vmem:[%s415_s26 + $0x8] sm:$0x1] }
  0x51   : >> { %435 = vst [vmem:[%s416_s4] sm:$0x1] %v434_v3  ;;  %437 = vst [vmem:[%s416_s4 + $0x8] sm:$0x1] %v436_v4 }
  0x52   : >> { %464 = vsyncadd [#allocation5], 32  ;;  %s349_s17 = sadd.s32 1, %s8038_s17  }
  0x53   : >> { %p346_p7 = scmp.ge.s32.totalorder %s349_s17, 32  }
  0x54   : > { %s8227_s5 = smov (%p346_p7), 0  }
  0x55   : > { %348 = sbr.rel (!%p346_p7) target bundleno = 57 (0x39), region = 498 }
  0x5c LB: >> { %s471_s11 = sadd.s32 32, %s8042_s5  ;;  %s8042_s5 = sphi %s8227_s5, %s470_s5  }
  0x5d   : >> { %s472_s28 = sadd.s32 %s8192_s23, %s471_s11  ;;  %s479_s30 = sshrl.u32 %s471_s11, 3 }
  0x5e   : >> { %s473_s12 = sld [smem:[#allocation7 + %s472_s28]]  ;;  %s480_s15 = sand.u32 7, %s471_s11  }
  0x5f   : >> { %s5835_s18 = sshll.u32 %s479_s30, 4 }
  0x60   : >> { %s482_s19 = sadd.s32 %s5835_s18, %s480_s15 }
  0x61   : >> { %s483_s0 = scalar_lea.vmem [#allocation2], %s482_s19 }
  0x64   : >> { %s474_s20 = sshrl.u32 %s473_s12, 3  ;;  %s475_s21 = sand.u32 7, %s473_s12  }
  0x65   : >> { %s5834_s17 = sshll.u32 %s474_s20, 4 }
  0x66   : >> { %s477_s13 = sadd.s32 %s5834_s17, %s475_s21 }
  0x67   : >> { %s478_s24 = scalar_lea.vmem %s9618_s2, %s477_s13 }
  0x68   : >> { %v502_v5 = vld [vmem:[%s478_s24] sm:$0x1]  ;;  %v504_v6 = vld [vmem:[%s478_s24 + $0x8] sm:$0x1] }
  0x69   : >> { %503 = vst [vmem:[%s483_s0] sm:$0x1] %v502_v5  ;;  %505 = vst [vmem:[%s483_s0 + $0x8] sm:$0x1] %v504_v6 }
  0x6a   : >> { %532 = vsyncadd [#allocation5 + $0x1], 32  ;;  %s533_s25 = sld [smem:[#allocation8 + %s472_s28]]  ;;  %s539_s20 = scalar_lea.vmem [#allocation3], %s482_s19 }
  0x70   : >> { %s534_s26 = sshrl.u32 %s533_s25, 3  ;;  %s535_s4 = sand.u32 7, %s533_s25  }
  0x71   : >> { %s5836_s11 = sshll.u32 %s534_s26, 4 }
  0x72   : >> { %s537_s30 = sadd.s32 %s5836_s11, %s535_s4 }
  0x73   : >> { %s538_s12 = scalar_lea.vmem %s9618_s2, %s537_s30 }
  0x74   : >> { %v557_v7 = vld [vmem:[%s538_s12] sm:$0x1]  ;;  %v559_v8 = vld [vmem:[%s538_s12 + $0x8] sm:$0x1] }
  0x75   : >> { %558 = vst [vmem:[%s539_s20] sm:$0x1] %v557_v7  ;;  %560 = vst [vmem:[%s539_s20 + $0x8] sm:$0x1] %v559_v8 }
  0x76   : >> { %587 = vsyncadd [#allocation5 + $0x1], 32  ;;  %s470_s5 = sadd.s32 1, %s8042_s5  }
  0x77   : >> { %p467_p8 = scmp.ge.s32.totalorder %s470_s5, 32  }
  0x78   : > { %s8243_s28 = smov (%p467_p8), 0  }
  0x79   : > { %469 = sbr.rel (!%p467_p8) target bundleno = 92 (0x5c), region = 509 }
  0x80 LB: >> { %s594_s21 = sadd.s32 64, %s8046_s28  ;;  %s8046_s28 = sphi %s8243_s28, %s593_s28  }
  0x81   : >> { %s595_s19 = sadd.s32 %s8192_s23, %s594_s21  ;;  %s602_s17 = sshrl.u32 %s594_s21, 3 }
  0x82   : >> { %s596_s13 = sld [smem:[#allocation7 + %s595_s19]]  ;;  %s603_s1 = sand.u32 7, %s594_s21  }
  0x83   : >> { %s5838_s10 = sshll.u32 %s602_s17, 4 }
  0x84   : >> { %s605_s24 = sadd.s32 %s5838_s10, %s603_s1 }
  0x85   : >> { %s606_s15 = scalar_lea.vmem [#allocation2], %s605_s24 }
  0x88   : >> { %s597_s0 = sshrl.u32 %s596_s13, 3  ;;  %s598_s25 = sand.u32 7, %s596_s13  }
  0x89   : >> { %s5837_s5 = sshll.u32 %s597_s0, 4 }
  0x8a   : >> { %s600_s26 = sadd.s32 %s5837_s5, %s598_s25 }
  0x8b   : >> { %s601_s30 = scalar_lea.vmem %s9618_s2, %s600_s26 }
  0x8c   : >> { %v625_v9 = vld [vmem:[%s601_s30] sm:$0x1]  ;;  %v627_v10 = vld [vmem:[%s601_s30 + $0x8] sm:$0x1] }
  0x8d   : >> { %626 = vst [vmem:[%s606_s15] sm:$0x1] %v625_v9  ;;  %628 = vst [vmem:[%s606_s15 + $0x8] sm:$0x1] %v627_v10 }
  0x8e   : >> { %655 = vsyncadd [#allocation5 + $0x2], 32  ;;  %s656_s18 = sld [smem:[#allocation8 + %s595_s19]]  ;;  %s662_s0 = scalar_lea.vmem [#allocation3], %s605_s24 }
  0x94   : >> { %s657_s12 = sshrl.u32 %s656_s18, 3  ;;  %s658_s20 = sand.u32 7, %s656_s18  }
  0x95   : >> { %s5839_s21 = sshll.u32 %s657_s12, 4 }
  0x96   : >> { %s660_s17 = sadd.s32 %s5839_s21, %s658_s20 }
  0x97   : >> { %s661_s13 = scalar_lea.vmem %s9618_s2, %s660_s17 }
  0x98   : >> { %v680_v11 = vld [vmem:[%s661_s13] sm:$0x1]  ;;  %v682_v12 = vld [vmem:[%s661_s13 + $0x8] sm:$0x1] }
  0x99   : >> { %681 = vst [vmem:[%s662_s0] sm:$0x1] %v680_v11  ;;  %683 = vst [vmem:[%s662_s0 + $0x8] sm:$0x1] %v682_v12 }
  0x9a   : >> { %710 = vsyncadd [#allocation5 + $0x2], 32  ;;  %s593_s28 = sadd.s32 1, %s8046_s28  }
  0x9b   : >> { %p590_p9 = scmp.ge.s32.totalorder %s593_s28, 32  }
  0x9c   : > { %s8259_s19 = smov (%p590_p9), 0  }
  0x9d   : > { %592 = sbr.rel (!%p590_p9) target bundleno = 128 (0x80), region = 520 }
  0xa4 LB: >> { %s717_s25 = sadd.s32 96, %s8050_s19  ;;  %s8050_s19 = sphi %s8259_s19, %s716_s19  }
  0xa5   : >> { %s718_s24 = sadd.s32 %s8192_s23, %s717_s25  ;;  %s725_s5 = sshrl.u32 %s717_s25, 3 }
  0xa6   : >> { %s719_s26 = sld [smem:[#allocation7 + %s718_s24]]  ;;  %s726_s4 = sand.u32 7, %s717_s25  }
  0xa7   : >> { %s5841_s11 = sshll.u32 %s725_s5, 4 }
  0xa8   : >> { %s728_s30 = sadd.s32 %s5841_s11, %s726_s4 }
  0xa9   : >> { %s729_s1 = scalar_lea.vmem [#allocation2], %s728_s30 }
  0xac   : >> { %s720_s15 = sshrl.u32 %s719_s26, 3  ;;  %s721_s18 = sand.u32 7, %s719_s26  }
  0xad   : >> { %s5840_s28 = sshll.u32 %s720_s15, 4 }
  0xae   : >> { %s723_s12 = sadd.s32 %s5840_s28, %s721_s18 }
  0xaf   : >> { %s724_s17 = scalar_lea.vmem %s9618_s2, %s723_s12 }
  0xb0   : >> { %v748_v13 = vld [vmem:[%s724_s17] sm:$0x1]  ;;  %v750_v14 = vld [vmem:[%s724_s17 + $0x8] sm:$0x1] }
  0xb1   : >> { %749 = vst [vmem:[%s729_s1] sm:$0x1] %v748_v13  ;;  %751 = vst [vmem:[%s729_s1 + $0x8] sm:$0x1] %v750_v14 }
  0xb2   : >> { %778 = vsyncadd [#allocation5 + $0x3], 32  ;;  %s779_s10 = sld [smem:[#allocation8 + %s718_s24]]  ;;  %s785_s15 = scalar_lea.vmem [#allocation3], %s728_s30 }
  0xb8   : >> { %s780_s13 = sshrl.u32 %s779_s10, 3  ;;  %s781_s0 = sand.u32 7, %s779_s10  }
  0xb9   : >> { %s5842_s25 = sshll.u32 %s780_s13, 4 }
  0xba   : >> { %s783_s5 = sadd.s32 %s5842_s25, %s781_s0 }
  0xbb   : >> { %s784_s26 = scalar_lea.vmem %s9618_s2, %s783_s5 }
  0xbc   : >> { %v803_v15 = vld [vmem:[%s784_s26] sm:$0x1]  ;;  %v805_v16 = vld [vmem:[%s784_s26 + $0x8] sm:$0x1] }
  0xbd   : >> { %804 = vst [vmem:[%s785_s15] sm:$0x1] %v803_v15  ;;  %806 = vst [vmem:[%s785_s15 + $0x8] sm:$0x1] %v805_v16 }
  0xbe   : >> { %833 = vsyncadd [#allocation5 + $0x3], 32  ;;  %s716_s19 = sadd.s32 1, %s8050_s19  }
  0xbf   : >> { %p713_p10 = scmp.ge.s32.totalorder %s716_s19, 32  }
  0xc0   : > { %s8052_s24 = smov (%p713_p10), 0  }
  0xc1   : > { %715 = sbr.rel (!%p713_p10) target bundleno = 164 (0xa4), region = 531 }
  0xc8 LB: >> { %8008 = dma.done.wait [#allocation5], 32  ;;  %s8054_s24 = sphi %s8052_s24, %s839_s24  }
  0xc9   : >> { %8009 = vsyncadd [#allocation5], 4294967264  ;;  %s839_s24 = sadd.s32 1, %s8054_s24  }
  0xca   : >> { %p836_p11 = scmp.ge.s32.totalorder %s839_s24, 64  }
  0xcb   : > { %v7601_v17 = vld [vmem:[%s9619_s3 + $0xc0] sm:$0xff] (%p836_p11)   ;;  %v7603_v19 = vld [vmem:[%s9619_s3 + $0xc8] sm:$0xff] (%p836_p11)   ;;  %v7605_v21 = vld [vmem:[%s9619_s3 + $0xd0] sm:$0xff] (%p836_p11)   ;;  %s8056_s17 = smov (%p836_p11), 0  }
  0xcc   : > { %838 = sbr.rel (!%p836_p11) target bundleno = 200 (0xc8), region = 542  ;;  %v7602_v18 = vld [vmem:[%s9619_s3 + $0x80] sm:$0xff] (%p836_p11)   ;;  %6680 = vmatprep.subr.bf16.mxu1 (%p836_p11), %v7601_v17  ;;  %v7604_v20 = vld [vmem:[%s9619_s3 + $0x88] sm:$0xff] (%p836_p11)   ;;  %v7606_v22 = vld [vmem:[%s9619_s3 + $0x90] sm:$0xff] (%p836_p11)  }
  0xcd   : > { %6681 = vmatpush3.bf16.msra.mxu1 (%p836_p11), %v7602_v18  ;;  %v7607_v23 = vld [vmem:[%s9619_s3 + $0xd8] sm:$0xff] (%p836_p11)   ;;  %v7609_v25 = vld [vmem:[%s9619_s3 + $0xe0] sm:$0xff] (%p836_p11)   ;;  %v7611_v27 = vld [vmem:[%s9619_s3 + $0xe8] sm:$0xff] (%p836_p11)  }
  0xce   : > { %6682 = vmatprep.subr.bf16.mxu1 (%p836_p11), %v7603_v19  ;;  %v7608_v24 = vld [vmem:[%s9619_s3 + $0x98] sm:$0xff] (%p836_p11)   ;;  %v7610_v26 = vld [vmem:[%s9619_s3 + $0xa0] sm:$0xff] (%p836_p11)   ;;  %v844_v28 = vld [vmem:[#allocation2 + $0x8] sm:$0xff] (%p836_p11) }
  0xcf   : > { %v846_v29 = vld [vmem:[#allocation2 + $0x18] sm:$0xff] (%p836_p11)  ;;  %v852_v30 = vld [vmem:[#allocation3 + $0x8] sm:$0xff] (%p836_p11)  ;;  %v843_v33 = vld [vmem:[#allocation2] sm:$0xff] (%p836_p11) }
  0xd0   : > { %v854_v31 = vld [vmem:[#allocation3 + $0x18] sm:$0xff] (%p836_p11)  ;;  %v8308_v32 = vand.u32 (%p836_p11), %v852_v30, %v844_v28  ;;  %v845_v34 = vld [vmem:[#allocation2 + $0x10] sm:$0xff] (%p836_p11)  ;;  %v851_v36 = vld [vmem:[#allocation3] sm:$0xff] (%p836_p11) }
  0xd1   : > { %6683 = vmatpush3.bf16.msra.mxu1 (%p836_p11), %v7604_v20  ;;  %v8310_v35 = vand.u32 (%p836_p11), %v854_v31, %v846_v29  ;;  %v853_v37 = vld [vmem:[#allocation3 + $0x10] sm:$0xff] (%p836_p11)  ;;  %v7612_v38 = vld [vmem:[%s9619_s3 + $0xa8] sm:$0xff] (%p836_p11)   ;;  %v8316_v40 = vand.u32 (%p836_p11), %v851_v36, %v843_v33  ;;  %v7619_v48 = vld [vmem:[%s9619_s3 + $0x140] sm:$0xff] (%p836_p11)  }
  0xd2   : > { %6684 = vmatprep.subr.bf16.mxu1 (%p836_p11), %v7605_v21  ;;  %v920_v39 = vshra.s32 (%p836_p11), %v8308_v32, 8  ;;  %v8318_v41 = vand.u32 (%p836_p11), %v853_v37, %v845_v34  ;;  %v7613_v42 = vld [vmem:[%s9619_s3 + $0xf0] sm:$0xff] (%p836_p11)   ;;  %v7620_v50 = vld [vmem:[%s9619_s3 + $0x100] sm:$0xff] (%p836_p11)   ;;  %6736 = vmatprep.subr.bf16.mxu0 (%p836_p11), %v7619_v48  ;;  %v7615_v54 = vld [vmem:[%s9619_s3 + $0xf8] sm:$0xff] (%p836_p11)   ;;  %v1271_v63 = vshra.s32 (%p836_p11), %v8308_v32, 16 }
  0xd3   : > { %v922_v43 = vshra.s32 %v8310_v35, 8  ;;  %v7614_v44 = vld [vmem:[%s9619_s3 + $0xb0] sm:$0xff]   ;;  %v919_v46 = vshra.s32 %v8316_v40, 8  ;;  %6737 = vmatpush3.bf16.msra.mxu0 %v7620_v50  ;;  %v7616_v56 = vld [vmem:[%s9619_s3 + $0xb8] sm:$0xff]   ;;  %v7623_v60 = vld [vmem:[%s9619_s3 + $0x148] sm:$0xff]   ;;  %v1273_v1 = vshra.s32 %v8310_v35, 16 }
  0xd4   : > { %v928_v45 = vand.u32 1, %v920_v39  ;;  %v921_v47 = vshra.s32 %v8318_v41, 8  ;;  %v7624_v61 = vld [vmem:[%s9619_s3 + $0x108] sm:$0xff]   ;;  %v7617_v62 = vld [vmem:[%s9619_s3 + $0x40] sm:$0xff]   ;;  %6738 = vmatprep.subr.bf16.mxu0 %v7623_v60  ;;  %v7627_v3 = vld [vmem:[%s9619_s3 + $0x150] sm:$0xff]   ;;  %v1279_v4 = vand.u32 1, %v1271_v63 }
  0xd5   : > { %6685 = vmatpush3.bf16.msra.mxu1 %v7606_v22  ;;  %v930_v49 = vand.u32 1, %v922_v43  ;;  %v927_v52 = vand.u32 1, %v919_v46  ;;  %v7618_v0 = vld [vmem:[%s9619_s3] sm:$0xff]   ;;  %v7628_v5 = vld [vmem:[%s9619_s3 + $0x110] sm:$0xff]   ;;  %v1281_v6 = vand.u32 1, %v1273_v1  ;;  %v7621_v7 = vld [vmem:[%s9619_s3 + $0x48] sm:$0xff]  }
  0xd6   : > { %6686 = vmatprep.subr.bf16.mxu1 %v7607_v23  ;;  %v936_v51 = vcvt.s32.f32 %v928_v45  ;;  %v929_v53 = vand.u32 1, %v921_v47  ;;  %v1287_v8 = vcvt.s32.f32 %v1279_v4  ;;  %v7622_v9 = vld [vmem:[%s9619_s3 + $0x8] sm:$0xff]   ;;  %v7631_v11 = vld [vmem:[%s9619_s3 + $0x158] sm:$0xff]   ;;  %v7625_v14 = vld [vmem:[%s9619_s3 + $0x50] sm:$0xff]   ;;  %v1270_v18 = vshra.s32 %v8316_v40, 16 }
  0xd7   : > { %v938_v55 = vcvt.s32.f32 %v930_v49  ;;  %v935_v58 = vcvt.s32.f32 %v927_v52  ;;  %6739 = vmatpush3.bf16.msra.mxu0 %v7624_v61  ;;  %v1289_v10 = vcvt.s32.f32 %v1281_v6  ;;  %v7632_v12 = vld [vmem:[%s9619_s3 + $0x118] sm:$0xff]   ;;  %v7626_v15 = vld [vmem:[%s9619_s3 + $0x10] sm:$0xff]   ;;  %v7635_v16 = vld [vmem:[%s9619_s3 + $0x160] sm:$0xff]   ;;  %v1480_v22 = vshra.s32 %v8316_v40, 24 }
  0xd8   : > { %v937_v59 = vcvt.s32.f32 %v929_v53  ;;  %6740 = vmatprep.subr.bf16.mxu0 %v7627_v3  ;;  %v7636_v17 = vld [vmem:[%s9619_s3 + $0x120] sm:$0xff]   ;;  %v7629_v19 = vld [vmem:[%s9619_s3 + $0x58] sm:$0xff]   ;;  %v848_v20 = vld [vmem:[#allocation2 + $0x28] sm:$0xff]  ;;  %v1482_v23 = vshra.s32 %v8318_v41, 24  ;;  %v868_v39 = vand.u32 1, %v8308_v32  ;;  %v1278_v43 = vand.u32 1, %v1270_v18 }
  0xd9   : > { %6687 = vmatpush3.bf16.msra.mxu1 %v7608_v24  ;;  %v944_v57 = vpack.c.bf16 %v938_v55, %v936_v51  ;;  %v1295_v13 = vpack.c.bf16 %v1289_v10, %v1287_v8  ;;  %v850_v21 = vld [vmem:[#allocation2 + $0x38] sm:$0xff]  ;;  %v7633_v28 = vld [vmem:[%s9619_s3 + $0x60] sm:$0xff]   ;;  %v1488_v33 = vand.u32 1, %v1480_v22  ;;  %v849_v36 = vld [vmem:[#allocation2 + $0x30] sm:$0xff]  ;;  %v869_v10 = vand.u32 1, %v8318_v41 }
  0xda   : > { %6688 = vmatprep.subr.bf16.mxu1 %v7609_v25  ;;  %v943_v2 = vpack.c.bf16 %v937_v59, %v935_v58  ;;  %v7630_v24 = vld [vmem:[%s9619_s3 + $0x18] sm:$0xff]   ;;  %v856_v25 = vld [vmem:[#allocation3 + $0x28] sm:$0xff]  ;;  %v847_v31 = vld [vmem:[#allocation2 + $0x20] sm:$0xff]  ;;  %v1490_v34 = vand.u32 1, %v1482_v23  ;;  %v876_v58 = vcvt.s32.f32 %v868_v39 }
  0xdb   : > { %1108 = vmatprep.mubr.bf16.mxu1 %v944_v57  ;;  %6741 = vmatpush3.bf16.msra.mxu0 %v7628_v5  ;;  %v8398_v29 = vand.u32 %v856_v25, %v848_v20  ;;  %v855_v37 = vld [vmem:[#allocation3 + $0x20] sm:$0xff]  ;;  %v7639_v48 = vld [vmem:[%s9619_s3 + $0x168] sm:$0xff]   ;;  %v1496_v50 = vcvt.s32.f32 %v1488_v33  ;;  %v7644_v6 = vld [vmem:[%s9619_s3 + $0x130] sm:$0xff]  }
  0xdc   : > { %6742 = vmatprep.subr.bf16.mxu0 %v7631_v11  ;;  %1459 = vmatprep.mubr.bf16.mxu0 %v1295_v13  ;;  %v8406_v46 = vand.u32 %v855_v37, %v847_v31  ;;  %v1498_v51 = vcvt.s32.f32 %v1490_v34  ;;  %v7634_v52 = vld [vmem:[%s9619_s3 + $0x20] sm:$0xff]   ;;  %v7640_v57 = vld [vmem:[%s9619_s3 + $0x128] sm:$0xff]   ;;  %v1286_v13 = vcvt.s32.f32 %v1278_v43  ;;  %v1483_v34 = vshra.s32 %v8310_v35, 24 }
  0xdd   : > { %6689 = vmatpush3.bf16.msra.mxu1 %v7610_v26  ;;  %v858_v26 = vld [vmem:[#allocation3 + $0x38] sm:$0xff]  ;;  %v7637_v61 = vld [vmem:[%s9619_s3 + $0x68] sm:$0xff]  }
  0xde   : > { %6690 = vmatprep.subr.bf16.mxu1 %v7611_v27  ;;  %v1272_v27 = vshra.s32 %v8318_v41, 16  ;;  %v8400_v30 = vand.u32 %v858_v26, %v850_v21  ;;  %v923_v55 = vshra.s32 %v8406_v46, 8  ;;  %v8421_v60 = vpack.c.bf16 %v1498_v51, %v1496_v50  ;;  %v7638_v8 = vld [vmem:[%s9619_s3 + $0x28] sm:$0xff]   ;;  %v7647_v41 = vld [vmem:[%s9619_s3 + $0x178] sm:$0xff]   ;;  %v7650_v51 = vld [vmem:[%s9619_s3 + $0x180] sm:$0xff]  }
  0xdf   : > { %6743 = vmatpush3.bf16.msra.mxu0 %v7632_v12  ;;  %v7641_v12 = vld [vmem:[%s9619_s3 + $0x70] sm:$0xff]   ;;  %v7645_v21 = vld [vmem:[%s9619_s3 + $0x78] sm:$0xff]   ;;  %v1274_v26 = vshra.s32 %v8406_v46, 16 }
  0xe0   : > { %6744 = vmatprep.subr.bf16.mxu0 %v7635_v16  ;;  %v926_v45 = vshra.s32 %v8400_v30, 8  ;;  %v1280_v49 = vand.u32 1, %v1272_v27  ;;  %v1275_v16 = vshra.s32 %v8398_v29, 16  ;;  %v1277_v18 = vshra.s32 %v8400_v30, 16 }
  0xe1   : > { %6691 = vmatpush3.bf16.msra.mxu1 %v7612_v38  ;;  %v857_v38 = vld [vmem:[#allocation3 + $0x30] sm:$0xff]  ;;  %v1481_v27 = vshra.s32 %v8308_v32, 24  ;;  %v1282_v39 = vand.u32 1, %v1274_v26 }
  0xe2   : > { %6692 = vmatprep.subr.bf16.mxu1 %v7613_v42  ;;  %v870_v42 = vand.u32 1, %v8310_v35  ;;  %v8408_v47 = vand.u32 %v857_v38, %v849_v36  ;;  %v1283_v20 = vand.u32 1, %v1275_v16  ;;  %v1285_v23 = vand.u32 1, %v1277_v18  ;;  %v7646_v36 = vld [vmem:[%s9619_s3 + $0x38] sm:$0xff]  }
  0xe3   : > { %6745 = vmatpush3.bf16.msra.mxu0 %v7636_v17  ;;  %v7648_v17 = vld [vmem:[%s9619_s3 + $0x138] sm:$0xff]   ;;  %v871_v35 = vand.u32 1, %v8406_v46 }
  0xe4   : > { %6746 = vmatprep.subr.bf16.mxu0 %v7639_v48  ;;  %v878_v59 = vcvt.s32.f32 %v870_v42  ;;  %v1291_v25 = vcvt.s32.f32 %v1283_v20  ;;  %v1293_v31 = vcvt.s32.f32 %v1285_v23  ;;  %v1276_v33 = vshra.s32 %v8408_v47, 16  ;;  %v7649_v42 = vld [vmem:[%s9619_s3 + $0x1c0] sm:$0xff]  }
  0xe5   : > { %6693 = vmatpush3.bf16.msra.mxu1 %v7614_v44  ;;  %v924_v44 = vshra.s32 %v8398_v29, 8 }
  0xe6   : > { %6694 = vmatprep.subr.bf16.mxu1 %v7615_v54  ;;  %v934_v54 = vand.u32 1, %v926_v45  ;;  %v1297_v32 = vpack.c.bf16 %v1293_v31, %v1291_v25  ;;  %v1284_v43 = vand.u32 1, %v1276_v33  ;;  %v1489_v45 = vand.u32 1, %v1481_v27 }
  0xe7   : > { %v932_v53 = vand.u32 1, %v924_v44  ;;  %6747 = vmatpush3.bf16.msra.mxu0 %v7640_v57  ;;  %v1290_v44 = vcvt.s32.f32 %v1282_v39 }
  0xe8   : > { %v942_v63 = vcvt.s32.f32 %v934_v54  ;;  %v1292_v50 = vcvt.s32.f32 %v1284_v43  ;;  %v7651_v54 = vld [vmem:[%s9619_s3 + $0x1c8] sm:$0xff]  }
  0xe9   : > { %6695 = vmatpush3.bf16.msra.mxu1 %v7616_v56  ;;  %v925_v56 = vshra.s32 %v8408_v47, 8 }
  0xea   : > { %6708 = vmatprep.subr.bf16.mxu1 %v7617_v62  ;;  %v940_v62 = vcvt.s32.f32 %v932_v53  ;;  %v1491_v53 = vand.u32 1, %v1483_v34 }
  0xeb   : > { %v933_v1 = vand.u32 1, %v925_v56  ;;  %v879_v56 = vcvt.s32.f32 %v871_v35 }
  0xec   : > { %1109 = vmatmul.mubr.bf16.vlgmr.msra.gmra.mrb[0].mxu1 %v943_v2  ;;  %v7643_v2 = vld [vmem:[%s9619_s3 + $0x170] sm:$0xff]   ;;  %v946_v3 = vpack.c.bf16 %v942_v63, %v940_v62 }
  0xed   : > { %6709 = vmatpush3.bf16.msra.mxu1 %v7618_v0  ;;  %v931_v0 = vand.u32 1, %v923_v55  ;;  %v941_v5 = vcvt.s32.f32 %v933_v1  ;;  %6748 = vmatprep.subr.bf16.mxu0 %v7643_v2  ;;  %v1296_v55 = vpack.c.bf16 %v1292_v50, %v1290_v44  ;;  %v7653_v62 = vld [vmem:[%s9619_s3 + $0x1d0] sm:$0xff]   ;;  %v7655_v2 = vld [vmem:[%s9619_s3 + $0x1d8] sm:$0xff]  }
  0xee   : > { %6710 = vmatprep.subr.bf16.mxu1 %v7621_v7  ;;  %v867_v7 = vand.u32 1, %v8316_v40  ;;  %1116 = vmatprep.mubr.bf16.mxu1 %v946_v3  ;;  %v7642_v40 = vld [vmem:[%s9619_s3 + $0x30] sm:$0xff]   ;;  %v7656_v3 = vld [vmem:[%s9619_s3 + $0x198] sm:$0xff]  }
  0xef   : > { %v939_v4 = vcvt.s32.f32 %v931_v0  ;;  %6749 = vmatpush3.bf16.msra.mxu0 %v7644_v6  ;;  %v7654_v0 = vld [vmem:[%s9619_s3 + $0x190] sm:$0xff]   ;;  %v7659_v6 = vld [vmem:[%s9619_s3 + $0x1e8] sm:$0xff]  }
  0xf0   : > { %6750 = vmatprep.subr.bf16.mxu0 %v7647_v41 }
  0xf1   : > { %6711 = vmatpush3.bf16.msra.mxu1 %v7622_v9  ;;  %v884_v9 = vpack.c.bf16 %v878_v59, %v876_v58  ;;  %v945_v11 = vpack.c.bf16 %v941_v5, %v939_v4  ;;  %v7652_v58 = vld [vmem:[%s9619_s3 + $0x188] sm:$0xff]   ;;  %v1497_v59 = vcvt.s32.f32 %v1489_v45  ;;  %v7657_v4 = vld [vmem:[%s9619_s3 + $0x1e0] sm:$0xff]  }
  0xf2   : > { %6712 = vmatprep.subr.bf16.mxu1 %v7625_v14  ;;  %v1288_v14 = vcvt.s32.f32 %v1280_v49  ;;  %v873_v49 = vand.u32 1, %v8408_v47  ;;  %v7658_v5 = vld [vmem:[%s9619_s3 + $0x1a0] sm:$0xff]  }
  0xf3   : > { %6751 = vmatpush3.bf16.msra.mxu0 %v7648_v17 }
  0xf4   : > { %1117 = vmatmul.mubr.bf16.gmra.mrb[4].mxu1 %v945_v11  ;;  %v1294_v22 = vpack.c.bf16 %v1288_v14, %v1286_v13  ;;  %v881_v57 = vcvt.s32.f32 %v873_v49  ;;  %v7662_v11 = vld [vmem:[%s9619_s3 + $0x1b0] sm:$0xff]   ;;  %v7663_v14 = vld [vmem:[%s9619_s3 + $0x1f8] sm:$0xff]  }
  0xf5   : > { %6713 = vmatpush3.bf16.msra.mxu1 %v7626_v15  ;;  %v872_v15 = vand.u32 1, %v8398_v29  ;;  %1253 = vmatprep.mubr.bf16.mxu1 %v884_v9  ;;  %v1487_v9 = vshra.s32 %v8400_v30, 24 }
  0xf6   : > { %6714 = vmatprep.subr.bf16.mxu1 %v7629_v19  ;;  %v874_v19 = vand.u32 1, %v8400_v30  ;;  %1460 = vmatmul.mubr.bf16.vlgmr.msra.gmra.mrb[0].mxu0 %v1294_v22  ;;  %v885_v63 = vpack.c.bf16 %v881_v57, %v879_v56  ;;  %v1486_v30 = vshra.s32 %v8408_v47, 24 }
  0xf7   : > { %v880_v37 = vcvt.s32.f32 %v872_v15  ;;  %1467 = vmatprep.mubr.bf16.mxu0 %v1297_v32  ;;  %v1495_v13 = vand.u32 1, %v1487_v9  ;;  %v7664_v15 = vld [vmem:[%s9619_s3 + $0x1b8] sm:$0xff]  }
  0xf8   : > { %v882_v38 = vcvt.s32.f32 %v874_v19  ;;  %v1494_v17 = vand.u32 1, %v1486_v30 }
  0xf9   : > { %6715 = vmatpush3.bf16.msra.mxu1 %v7630_v24  ;;  %v875_v24 = vcvt.s32.f32 %v867_v7  ;;  %v7660_v7 = vld [vmem:[%s9619_s3 + $0x1a8] sm:$0xff]   ;;  %v1503_v41 = vcvt.s32.f32 %v1495_v13 }
  0xfa   : > { %6716 = vmatprep.subr.bf16.mxu1 %v7633_v28  ;;  %v877_v28 = vcvt.s32.f32 %v869_v10  ;;  %v7661_v10 = vld [vmem:[%s9619_s3 + $0x1f0] sm:$0xff]   ;;  %v1502_v20 = vcvt.s32.f32 %v1494_v17 }
  0xfc   : > { %v883_v48 = vpack.c.bf16 %v877_v28, %v875_v24 }
  0xfd   : > { %6717 = vmatpush3.bf16.msra.mxu1 %v7634_v52  ;;  %v886_v52 = vpack.c.bf16 %v882_v38, %v880_v37 }
  0xfe   : > { %6718 = vmatprep.subr.bf16.mxu1 %v7637_v61  ;;  %v1499_v61 = vcvt.s32.f32 %v1491_v53  ;;  %1468 = vmatmul.mubr.bf16.gmra.mrb[4].mxu0 %v1296_v55 }
 0x100   : > { %v1505_v1 = vpack.c.bf16 %v1499_v61, %v1497_v59 }
 0x101   : > { %6719 = vmatpush3.bf16.msra.mxu1 %v7638_v8  ;;  %v1485_v8 = vshra.s32 %v8398_v29, 24  ;;  %v1484_v29 = vshra.s32 %v8406_v46, 24 }
 0x102   : > { %6720 = vmatprep.subr.bf16.mxu1 %v7641_v12 }
 0x103   : > { %v1493_v12 = vand.u32 1, %v1485_v8  ;;  %v1492_v16 = vand.u32 1, %v1484_v29 }
 0x105   : > { %6721 = vmatpush3.bf16.msra.mxu1 %v7642_v40  ;;  %v1501_v40 = vcvt.s32.f32 %v1493_v12  ;;  %v1500_v19 = vcvt.s32.f32 %v1492_v16 }
 0x106   : > { %6722 = vmatprep.subr.bf16.mxu1 %v7645_v21 }
 0x107   : > { %v1507_v18 = vpack.c.bf16 %v1503_v41, %v1501_v40  ;;  %v1506_v46 = vpack.c.bf16 %v1502_v20, %v1500_v19 }
 0x109   : > { %6723 = vmatpush3.bf16.msra.mxu1 %v7646_v36 }
 0x10a   : > { %6764 = vmatprep.subr.bf16.mxu1 %v7649_v42 }
 0x10c   : > { %1254 = vmatmul.mubr.bf16.vlgmr.msra.gmra.mrb[8].mxu1 %v883_v48 }
 0x10d   : > { %6765 = vmatpush3.bf16.msra.mxu1 %v7650_v51  ;;  %1261 = vmatprep.mubr.bf16.mxu1 %v886_v52 }
 0x10e   : > { %6766 = vmatprep.subr.bf16.mxu1 %v7651_v54 }
 0x111   : > { %6767 = vmatpush3.bf16.msra.mxu1 %v7652_v58 }
 0x112   : > { %6768 = vmatprep.subr.bf16.mxu1 %v7653_v62 }
 0x114   : > { %1262 = vmatmul.mubr.bf16.gmra.mrb[12].mxu1 %v885_v63 }
 0x115   : > { %6769 = vmatpush3.bf16.msra.mxu1 %v7654_v0  ;;  %1669 = vmatprep.mubr.bf16.mxu1 %v1505_v1 }
 0x116   : > { %6770 = vmatprep.subr.bf16.mxu1 %v7655_v2 }
 0x119   : > { %6771 = vmatpush3.bf16.msra.mxu1 %v7656_v3 }
 0x11a   : > { %6772 = vmatprep.subr.bf16.mxu1 %v7657_v4 }
 0x11d   : > { %6773 = vmatpush3.bf16.msra.mxu1 %v7658_v5 }
 0x11e   : > { %6774 = vmatprep.subr.bf16.mxu1 %v7659_v6 }
 0x121   : > { %6775 = vmatpush3.bf16.msra.mxu1 %v7660_v7 }
 0x122   : > { %6776 = vmatprep.subr.bf16.mxu1 %v7661_v10 }
 0x125   : > { %6777 = vmatpush3.bf16.msra.mxu1 %v7662_v11 }
 0x126   : > { %6778 = vmatprep.subr.bf16.mxu1 %v7663_v14 }
 0x129   : > { %6779 = vmatpush3.bf16.msra.mxu1 %v7664_v15 }
 0x12c   : > { %1670 = vmatmul.mubr.bf16.vlgmr.msra.gmra.mrb[16].mxu1 %v8421_v60 }
 0x12d   : > { %1677 = vmatprep.mubr.bf16.mxu1 %v1507_v18 }
 0x134   : > { %1678 = vmatmul.mubr.bf16.gmra.mrb[20].mxu1 %v1506_v46 }
 0x1bf   : > { %v6696_v47 = vpop.f32.mrb[0].mxu1 }
 0x1c0   : > { %v6697_v21 = vpop.f32.mrb[1].mxu1 }
 0x1c1   : > { %v6698_v22 = vadd.f32 %v6697_v21, %v6696_v47  ;;  %v6699_v23 = vpop.f32.mrb[2].mxu1 }
 0x1c2   : > { %v6700_v24 = vpop.f32.mrb[3].mxu1 }
 0x1c3   : > { %v6701_v25 = vadd.f32 %v6700_v24, %v6699_v23 }
 0x1c7   : > { %v6702_v26 = vpop.f32.mrb[4].mxu1 }
 0x1c8   : > { %v6703_v27 = vpop.f32.mrb[5].mxu1 }
 0x1c9   : > { %v6704_v28 = vadd.f32 %v6703_v27, %v6702_v26  ;;  %v6705_v31 = vpop.f32.mrb[6].mxu1  ;;  %v6752_v36 = vpop.f32.mrb[0].mxu0 }
 0x1ca   : > { %v6706_v33 = vpop.f32.mrb[7].mxu1  ;;  %v6753_v37 = vpop.f32.mrb[1].mxu0 }
 0x1cb   : > { %v6707_v34 = vadd.f32 %v6706_v33, %v6705_v31  ;;  %v6754_v60 = vadd.f32 %v6753_v37, %v6752_v36  ;;  %v6755_v38 = vpop.f32.mrb[2].mxu0 }
 0x1cc   : > { %v6756_v39 = vpop.f32.mrb[3].mxu0 }
 0x1cd   : > { %v6757_v42 = vadd.f32 %v6756_v39, %v6755_v38 }
 0x1d1   : > { %v6758_v48 = vpop.f32.mrb[4].mxu0 }
 0x1d2   : > { %v6759_v49 = vpop.f32.mrb[5].mxu0 }
 0x1d3   : > { %v6760_v52 = vadd.f32 %v6759_v49, %v6758_v48  ;;  %v6761_v53 = vpop.f32.mrb[6].mxu0 }
 0x1d4   : > { %v6762_v54 = vpop.f32.mrb[7].mxu0 }
 0x1d5   : > { %v6763_v57 = vadd.f32 %v6762_v54, %v6761_v53 }
 0x1df   : > { %v6724_v32 = vpop.f32.mrb[8].mxu1 }
 0x1e0   : > { %v6725_v43 = vpop.f32.mrb[9].mxu1 }
 0x1e1   : > { %v6726_v44 = vadd.f32 %v6725_v43, %v6724_v32  ;;  %v6727_v45 = vpop.f32.mrb[10].mxu1 }
 0x1e2   : > { %v6728_v35 = vpop.f32.mrb[11].mxu1 }
 0x1e3   : > { %v1256_v50 = vadd.f32 %v6726_v44, %v6698_v22  ;;  %v6729_v51 = vadd.f32 %v6728_v35, %v6727_v45 }
 0x1e5   : > { %v1259_v55 = vadd.f32 %v6729_v51, %v6701_v25  ;;  %v1476_v56 = vadd.f32 %v6754_v60, %v1256_v50 }
 0x1e7   : > { %v1477_v58 = vadd.f32 %v6757_v42, %v1259_v55  ;;  %v6730_v59 = vpop.f32.mrb[12].mxu1 }
 0x1e8   : > { %v6731_v61 = vpop.f32.mrb[13].mxu1 }
 0x1e9   : > { %v6732_v62 = vadd.f32 %v6731_v61, %v6730_v59  ;;  %v6733_v63 = vpop.f32.mrb[14].mxu1 }
 0x1ea   : > { %v6734_v0 = vpop.f32.mrb[15].mxu1 }
 0x1eb   : > { %v1264_v1 = vadd.f32 %v6732_v62, %v6704_v28  ;;  %v6735_v2 = vadd.f32 %v6734_v0, %v6733_v63 }
 0x1ed   : > { %v1267_v3 = vadd.f32 %v6735_v2, %v6707_v34  ;;  %v1478_v4 = vadd.f32 %v6760_v52, %v1264_v1 }
 0x1ef   : > { %v1479_v5 = vadd.f32 %v6763_v57, %v1267_v3 }
 0x1ff   : > { %v6780_v6 = vpop.f32.mrb[16].mxu1 }
 0x200   : > { %v6781_v7 = vpop.f32.mrb[17].mxu1 }
 0x201   : > { %v6782_v8 = vadd.f32 %v6781_v7, %v6780_v6  ;;  %v6783_v9 = vpop.f32.mrb[18].mxu1 }
 0x202   : > { %v6784_v10 = vpop.f32.mrb[19].mxu1 }
 0x203   : > { %v1686_v11 = vadd.f32 %v6782_v8, %v1476_v56  ;;  %v6785_v12 = vadd.f32 %v6784_v10, %v6783_v9 }
 0x205   : > { %1690 = vst [vmem:[#allocation4] sm:$0xff] %v1686_v11  ;;  %v1687_v13 = vadd.f32 %v6785_v12, %v1477_v58 }
 0x207   : > { %1691 = vst [vmem:[#allocation4 + $0x8] sm:$0xff] %v1687_v13  ;;  %v6786_v14 = vpop.f32.mrb[20].mxu1 }
 0x208   : > { %v6787_v29 = vpop.f32.mrb[21].mxu1 }
 0x209   : > { %v6788_v30 = vadd.f32 %v6787_v29, %v6786_v14  ;;  %v6789_v15 = vpop.f32.mrb[22].mxu1 }
 0x20a   : > { %v6790_v40 = vpop.f32.mrb[23].mxu1 }
 0x20b   : > { %v1688_v41 = vadd.f32 %v6788_v30, %v1478_v4  ;;  %v6791_v16 = vadd.f32 %v6790_v40, %v6789_v15 }
 0x20d   : > { %1692 = vst [vmem:[#allocation4 + $0x10] sm:$0xff] %v1688_v41  ;;  %v1689_v17 = vadd.f32 %v6791_v16, %v1479_v5 }
 0x20f   : > { %1693 = vst [vmem:[#allocation4 + $0x18] sm:$0xff] %v1689_v17 }
 0x210 LB: >> { %8010 = dma.done.wait [#allocation5 + $0x1], 32  ;;  %s8058_s17 = sphi %s8056_s17, %s1699_s17  }
 0x211   : >> { %8011 = vsyncadd [#allocation5 + $0x1], 4294967264  ;;  %s1699_s17 = sadd.s32 1, %s8058_s17  }
 0x212   : >> { %p1696_p12 = scmp.ge.s32.totalorder %s1699_s17, 64  }
 0x213   : > { %v7665_v18 = vld [vmem:[%s9619_s3 + $0xc0] sm:$0xff] (%p1696_p12)   ;;  %v7669_v47 = vld [vmem:[%s9619_s3 + $0xc8] sm:$0xff] (%p1696_p12)   ;;  %v7673_v24 = vld [vmem:[%s9619_s3 + $0xd0] sm:$0xff] (%p1696_p12)   ;;  %s8060_s26 = smov (%p1696_p12), 0  }
 0x214   : > { %1698 = sbr.rel (!%p1696_p12) target bundleno = 528 (0x210), region = 553  ;;  %v7666_v19 = vld [vmem:[%s9619_s3 + $0x40] sm:$0xff] (%p1696_p12)   ;;  %6792 = vmatprep.subr.bf16.mxu0 (%p1696_p12), %v7665_v18  ;;  %v7670_v21 = vld [vmem:[%s9619_s3 + $0x48] sm:$0xff] (%p1696_p12)   ;;  %v7674_v25 = vld [vmem:[%s9619_s3 + $0x50] sm:$0xff] (%p1696_p12)  }
 0x215   : > { %v7667_v20 = vld [vmem:[%s9619_s3 + $0x80] sm:$0xff] (%p1696_p12)   ;;  %6820 = vmatprep.subr.bf16.mxu1 (%p1696_p12), %v7666_v19  ;;  %v7671_v22 = vld [vmem:[%s9619_s3 + $0x88] sm:$0xff] (%p1696_p12)   ;;  %v7675_v26 = vld [vmem:[%s9619_s3 + $0x90] sm:$0xff] (%p1696_p12)  }
 0x216   : > { %v7668_v46 = vld [vmem:[%s9619_s3] sm:$0xff] (%p1696_p12)   ;;  %6793 = vmatpush3.bf16.msra.mxu0 (%p1696_p12), %v7667_v20  ;;  %v7672_v23 = vld [vmem:[%s9619_s3 + $0x8] sm:$0xff] (%p1696_p12)   ;;  %v7676_v27 = vld [vmem:[%s9619_s3 + $0x10] sm:$0xff] (%p1696_p12)  }
 0x217   : > { %6821 = vmatpush3.bf16.msra.mxu1 (%p1696_p12), %v7668_v46  ;;  %6794 = vmatprep.subr.bf16.mxu0 (%p1696_p12), %v7669_v47  ;;  %v7677_v28 = vld [vmem:[%s9619_s3 + $0xd8] sm:$0xff] (%p1696_p12)   ;;  %v7681_v36 = vld [vmem:[%s9619_s3 + $0xe0] sm:$0xff] (%p1696_p12)   ;;  %v7685_v39 = vld [vmem:[%s9619_s3 + $0xe8] sm:$0xff] (%p1696_p12)  }
 0x218   : > { %6822 = vmatprep.subr.bf16.mxu1 (%p1696_p12), %v7670_v21  ;;  %v7678_v31 = vld [vmem:[%s9619_s3 + $0x58] sm:$0xff] (%p1696_p12)   ;;  %v7682_v37 = vld [vmem:[%s9619_s3 + $0x60] sm:$0xff] (%p1696_p12)   ;;  %v7686_v42 = vld [vmem:[%s9619_s3 + $0x68] sm:$0xff] (%p1696_p12)  }
 0x219   : > { %v7679_v33 = vld [vmem:[%s9619_s3 + $0x98] sm:$0xff] (%p1696_p12)   ;;  %v7683_v60 = vld [vmem:[%s9619_s3 + $0xa0] sm:$0xff] (%p1696_p12)   ;;  %v7687_v32 = vld [vmem:[%s9619_s3 + $0xa8] sm:$0xff] (%p1696_p12)  }
 0x21a   : > { %6795 = vmatpush3.bf16.msra.mxu0 (%p1696_p12), %v7671_v22  ;;  %v7680_v34 = vld [vmem:[%s9619_s3 + $0x18] sm:$0xff] (%p1696_p12)   ;;  %v7684_v38 = vld [vmem:[%s9619_s3 + $0x20] sm:$0xff] (%p1696_p12)   ;;  %v7688_v43 = vld [vmem:[%s9619_s3 + $0x28] sm:$0xff] (%p1696_p12)  }
 0x21b   : > { %6823 = vmatpush3.bf16.msra.mxu1 %v7672_v23  ;;  %6796 = vmatprep.subr.bf16.mxu0 %v7673_v24  ;;  %v7689_v44 = vld [vmem:[%s9619_s3 + $0xf0] sm:$0xff]   ;;  %v7693_v49 = vld [vmem:[%s9619_s3 + $0xf8] sm:$0xff]   ;;  %v1705_v53 = vld [vmem:[#allocation2 + $0x48] sm:$0xff] }
 0x21c   : > { %6824 = vmatprep.subr.bf16.mxu1 %v7674_v25  ;;  %v7690_v45 = vld [vmem:[%s9619_s3 + $0x70] sm:$0xff]   ;;  %v7694_v50 = vld [vmem:[%s9619_s3 + $0x78] sm:$0xff]   ;;  %v1713_v55 = vld [vmem:[#allocation3 + $0x48] sm:$0xff] }
 0x21d   : > { %v7691_v48 = vld [vmem:[%s9619_s3 + $0xb0] sm:$0xff]   ;;  %v7695_v51 = vld [vmem:[%s9619_s3 + $0xb8] sm:$0xff]   ;;  %v8614_v57 = vand.u32 %v1713_v55, %v1705_v53  ;;  %v1704_v58 = vld [vmem:[#allocation2 + $0x40] sm:$0xff] }
 0x21e   : > { %6797 = vmatpush3.bf16.msra.mxu0 %v7675_v26  ;;  %v7692_v35 = vld [vmem:[%s9619_s3 + $0x30] sm:$0xff]   ;;  %v7696_v52 = vld [vmem:[%s9619_s3 + $0x38] sm:$0xff]   ;;  %v1712_v62 = vld [vmem:[#allocation3 + $0x40] sm:$0xff] }
 0x21f   : > { %6825 = vmatpush3.bf16.msra.mxu1 %v7676_v27  ;;  %6798 = vmatprep.subr.bf16.mxu0 %v7677_v28  ;;  %v1707_v54 = vld [vmem:[#allocation2 + $0x58] sm:$0xff]  ;;  %v1706_v59 = vld [vmem:[#allocation2 + $0x50] sm:$0xff]  ;;  %v1781_v0 = vshra.s32 %v8614_v57, 8  ;;  %v1729_v1 = vand.u32 1, %v8614_v57  ;;  %v8620_v2 = vand.u32 %v1712_v62, %v1704_v58  ;;  %v7697_v4 = vld [vmem:[%s9619_s3 + $0x140] sm:$0xff]   ;;  %v2131_v26 = vshra.s32 %v8614_v57, 16 }
 0x220   : > { %6826 = vmatprep.subr.bf16.mxu1 %v7678_v31  ;;  %v1715_v56 = vld [vmem:[#allocation3 + $0x58] sm:$0xff]  ;;  %v1714_v63 = vld [vmem:[#allocation3 + $0x50] sm:$0xff]  ;;  %v7698_v5 = vld [vmem:[%s9619_s3 + $0x1c0] sm:$0xff]  }
 0x221   : > { %v8616_v61 = vand.u32 %v1715_v56, %v1707_v54  ;;  %v8622_v3 = vand.u32 %v1714_v63, %v1706_v59  ;;  %v1789_v8 = vand.u32 1, %v1781_v0  ;;  %v1737_v9 = vcvt.s32.f32 %v1729_v1  ;;  %v7699_v19 = vld [vmem:[%s9619_s3 + $0x100] sm:$0xff]   ;;  %v7702_v23 = vld [vmem:[%s9619_s3 + $0x1c8] sm:$0xff]   ;;  %v1719_v63 = vld [vmem:[#allocation3 + $0x78] sm:$0xff] }
 0x222   : > { %6799 = vmatpush3.bf16.msra.mxu0 %v7679_v33  ;;  %v1780_v10 = vshra.s32 %v8620_v2, 8  ;;  %v1728_v14 = vand.u32 1, %v8620_v2  ;;  %v7700_v47 = vld [vmem:[%s9619_s3 + $0x180] sm:$0xff]   ;;  %v7701_v25 = vld [vmem:[%s9619_s3 + $0x148] sm:$0xff]   ;;  %v7706_v33 = vld [vmem:[%s9619_s3 + $0x1d0] sm:$0xff]  }
 0x223   : > { %6827 = vmatpush3.bf16.msra.mxu1 %v7680_v34  ;;  %6800 = vmatprep.subr.bf16.mxu0 %v7681_v36  ;;  %v1783_v6 = vshra.s32 %v8616_v61, 8  ;;  %v1731_v7 = vand.u32 1, %v8616_v61  ;;  %v1782_v11 = vshra.s32 %v8622_v3, 8  ;;  %v1730_v29 = vand.u32 1, %v8622_v3  ;;  %v7703_v27 = vld [vmem:[%s9619_s3 + $0x108] sm:$0xff]   ;;  %v7705_v34 = vld [vmem:[%s9619_s3 + $0x150] sm:$0xff]  }
 0x224   : > { %6828 = vmatprep.subr.bf16.mxu1 %v7682_v37  ;;  %v1797_v30 = vcvt.s32.f32 %v1789_v8  ;;  %v1788_v15 = vand.u32 1, %v1780_v10  ;;  %v1736_v17 = vcvt.s32.f32 %v1728_v14  ;;  %v2133_v28 = vshra.s32 %v8616_v61, 16  ;;  %v7704_v31 = vld [vmem:[%s9619_s3 + $0x188] sm:$0xff]   ;;  %v7707_v37 = vld [vmem:[%s9619_s3 + $0x110] sm:$0xff]   ;;  %v7716_v53 = vld [vmem:[%s9619_s3 + $0x1a0] sm:$0xff]  }
 0x225   : > { %v1791_v12 = vand.u32 1, %v1783_v6  ;;  %v1739_v13 = vcvt.s32.f32 %v1731_v7  ;;  %v1790_v40 = vand.u32 1, %v1782_v11  ;;  %v1738_v18 = vcvt.s32.f32 %v1730_v29  ;;  %v7715_v55 = vld [vmem:[%s9619_s3 + $0x120] sm:$0xff]   ;;  %v1709_v56 = vld [vmem:[#allocation2 + $0x68] sm:$0xff]  ;;  %v1718_v14 = vld [vmem:[#allocation3 + $0x70] sm:$0xff] }
 0x226   : > { %6801 = vmatpush3.bf16.msra.mxu0 %v7683_v60  ;;  %v1796_v20 = vcvt.s32.f32 %v1788_v15  ;;  %v8662_v36 = vand.u32 1, %v2131_v26  ;;  %v8667_v60 = vand.u32 1, %v2133_v28  ;;  %v1717_v58 = vld [vmem:[#allocation3 + $0x68] sm:$0xff]  ;;  %v1708_v8 = vld [vmem:[#allocation2 + $0x60] sm:$0xff] }
 0x227   : > { %6829 = vmatpush3.bf16.msra.mxu1 %v7684_v38  ;;  %6802 = vmatprep.subr.bf16.mxu0 %v7685_v39  ;;  %v1799_v41 = vcvt.s32.f32 %v1791_v12  ;;  %v1745_v16 = vpack.c.bf16 %v1739_v13, %v1737_v9  ;;  %v1798_v46 = vcvt.s32.f32 %v1790_v40  ;;  %v1744_v22 = vpack.c.bf16 %v1738_v18, %v1736_v17  ;;  %v7708_v38 = vld [vmem:[%s9619_s3 + $0x190] sm:$0xff]   ;;  %v7718_v7 = vld [vmem:[%s9619_s3 + $0x1e8] sm:$0xff]   ;;  %v1716_v13 = vld [vmem:[#allocation3 + $0x60] sm:$0xff] }
 0x228   : > { %6830 = vmatprep.subr.bf16.mxu1 %v7686_v42  ;;  %v2340_v39 = vshra.s32 %v8614_v57, 24  ;;  %v7710_v42 = vld [vmem:[%s9619_s3 + $0x1d8] sm:$0xff]   ;;  %v8710_v0 = vand.u32 %v1717_v58, %v1709_v56  ;;  %v1710_v9 = vld [vmem:[#allocation2 + $0x70] sm:$0xff]  ;;  %v8729_v15 = vand.u32 %v1716_v13, %v1708_v8  ;;  %v7720_v18 = vld [vmem:[%s9619_s3 + $0x1a8] sm:$0xff]  }
 0x229   : > { %v1805_v21 = vpack.c.bf16 %v1799_v41, %v1797_v30  ;;  %2113 = vmatprep.mubr.bf16.mxu1 %v1745_v16  ;;  %v1804_v24 = vpack.c.bf16 %v1798_v46, %v1796_v20  ;;  %v1711_v57 = vld [vmem:[#allocation2 + $0x78] sm:$0xff]  ;;  %v8731_v40 = vand.u32 %v1718_v14, %v1710_v9  ;;  %v7719_v41 = vld [vmem:[%s9619_s3 + $0x128] sm:$0xff]   ;;  %v2149_v20 = vcvt.s32.f32 %v8667_v60 }
 0x22a   : > { %6803 = vmatpush3.bf16.msra.mxu0 %v7687_v32  ;;  %v2342_v32 = vshra.s32 %v8616_v61, 24  ;;  %v8699_v54 = vand.u32 1, %v2340_v39  ;;  %v1733_v6 = vand.u32 1, %v8710_v0  ;;  %v2135_v10 = vshra.s32 %v8710_v0, 16 }
 0x22b   : > { %6831 = vmatpush3.bf16.msra.mxu1 %v7688_v43  ;;  %6804 = vmatprep.subr.bf16.mxu0 %v7689_v44  ;;  %v7709_v43 = vld [vmem:[%s9619_s3 + $0x158] sm:$0xff]   ;;  %v2130_v44 = vshra.s32 %v8620_v2, 16  ;;  %v1734_v26 = vand.u32 1, %v8731_v40 }
 0x22c   : > { %6832 = vmatprep.subr.bf16.mxu1 %v7690_v45  ;;  %1968 = vmatprep.mubr.bf16.mxu0 %v1805_v21  ;;  %v7711_v45 = vld [vmem:[%s9619_s3 + $0x118] sm:$0xff]   ;;  %v8704_v59 = vand.u32 1, %v2342_v32  ;;  %v1741_v30 = vcvt.s32.f32 %v1733_v6  ;;  %v1786_v21 = vshra.s32 %v8731_v40, 8  ;;  %v2356_v28 = vcvt.s32.f32 %v8699_v54 }
 0x22d   : > { %v8706_v61 = vand.u32 1, %v2130_v44  ;;  %v1742_v60 = vcvt.s32.f32 %v1734_v26  ;;  %v2143_v44 = vand.u32 1, %v2135_v10  ;;  %v2344_v54 = vshra.s32 %v8710_v0, 24 }
 0x22e   : > { %6805 = vmatpush3.bf16.msra.mxu0 %v7691_v48  ;;  %v7712_v48 = vld [vmem:[%s9619_s3 + $0x198] sm:$0xff]  }
 0x22f   : > { %6833 = vmatpush3.bf16.msra.mxu1 %v7692_v35  ;;  %6806 = vmatprep.subr.bf16.mxu0 %v7693_v49  ;;  %v2132_v35 = vshra.s32 %v8622_v3, 16  ;;  %v7713_v49 = vld [vmem:[%s9619_s3 + $0x160] sm:$0xff]  }
 0x230   : > { %6834 = vmatprep.subr.bf16.mxu1 %v7694_v50  ;;  %v2339_v50 = vshra.s32 %v8620_v2, 24  ;;  %v8714_v2 = vand.u32 %v1719_v63, %v1711_v57  ;;  %v2352_v63 = vand.u32 1, %v2344_v54 }
 0x231   : > { %v8708_v62 = vand.u32 1, %v2132_v35 }
 0x232   : > { %6807 = vmatpush3.bf16.msra.mxu0 %v7695_v51  ;;  %v7714_v51 = vld [vmem:[%s9619_s3 + $0x1e0] sm:$0xff]   ;;  %v8712_v1 = vand.u32 1, %v2339_v50  ;;  %v1787_v11 = vshra.s32 %v8714_v2, 8  ;;  %v1735_v12 = vand.u32 1, %v8714_v2  ;;  %v2137_v39 = vshra.s32 %v8714_v2, 16 }
 0x233   : > { %6835 = vmatpush3.bf16.msra.mxu1 %v7696_v52  ;;  %6848 = vmatprep.subr.bf16.mxu0 %v7697_v4  ;;  %v2341_v52 = vshra.s32 %v8622_v3, 24  ;;  %v7717_v3 = vld [vmem:[%s9619_s3 + $0x168] sm:$0xff]   ;;  %v2148_v56 = vcvt.s32.f32 %v8708_v62  ;;  %v2151_v62 = vcvt.s32.f32 %v2143_v44  ;;  %v2360_v6 = vcvt.s32.f32 %v2352_v63 }
 0x234   : > { %6876 = vmatprep.subr.bf16.mxu1 %v7698_v5  ;;  %v1785_v5 = vshra.s32 %v8710_v0, 8  ;;  %v1795_v16 = vand.u32 1, %v1787_v11  ;;  %v1743_v17 = vcvt.s32.f32 %v1735_v12  ;;  %v2355_v57 = vcvt.s32.f32 %v8712_v1 }
 0x235   : > { %1969 = vmatmul.mubr.bf16.vlgmr.msra.gmra.mrb[8].mxu0 %v1804_v24  ;;  %v8719_v4 = vand.u32 1, %v2341_v52  ;;  %v2134_v0 = vshra.s32 %v8729_v15, 16 }
 0x236   : > { %2114 = vmatmul.mubr.bf16.vlgmr.msra.gmra.mrb[24].mxu1 %v1744_v22  ;;  %6849 = vmatpush3.bf16.msra.mxu0 %v7699_v19  ;;  %v1793_v29 = vand.u32 1, %v1785_v5  ;;  %v2147_v19 = vcvt.s32.f32 %v8662_v36  ;;  %v1732_v22 = vand.u32 1, %v8729_v15  ;;  %v1803_v24 = vcvt.s32.f32 %v1795_v16 }
 0x237   : > { %6877 = vmatpush3.bf16.msra.mxu1 %v7700_v47  ;;  %6850 = vmatprep.subr.bf16.mxu0 %v7701_v25  ;;  %v1784_v47 = vshra.s32 %v8729_v15, 8  ;;  %v1747_v25 = vpack.c.bf16 %v1743_v17, %v1741_v30  ;;  %v2358_v36 = vcvt.s32.f32 %v8704_v59  ;;  %v2357_v58 = vcvt.s32.f32 %v8719_v4 }
 0x238   : > { %6878 = vmatprep.subr.bf16.mxu1 %v7702_v23  ;;  %v1801_v46 = vcvt.s32.f32 %v1793_v29  ;;  %v7721_v23 = vld [vmem:[%s9619_s3 + $0x170] sm:$0xff]   ;;  %v2155_v35 = vpack.c.bf16 %v2149_v20, %v2147_v19  ;;  %v2346_v59 = vshra.s32 %v8714_v2, 24  ;;  %v2343_v5 = vshra.s32 %v8729_v15, 24 }
 0x239   : > { %2121 = vmatprep.mubr.bf16.mxu1 %v1747_v25  ;;  %v2364_v52 = vpack.c.bf16 %v2358_v36, %v2356_v28  ;;  %v2345_v2 = vshra.s32 %v8731_v40, 24  ;;  %v2142_v12 = vand.u32 1, %v2134_v0 }
 0x23a   : > { %6851 = vmatpush3.bf16.msra.mxu0 %v7703_v27  ;;  %v7722_v27 = vld [vmem:[%s9619_s3 + $0x1f0] sm:$0xff]   ;;  %v2354_v4 = vand.u32 1, %v2346_v59  ;;  %v2351_v9 = vand.u32 1, %v2343_v5 }
 0x23b   : > { %6879 = vmatpush3.bf16.msra.mxu1 %v7704_v31  ;;  %6852 = vmatprep.subr.bf16.mxu0 %v7705_v34  ;;  %v1792_v31 = vand.u32 1, %v1784_v47  ;;  %v1740_v34 = vcvt.s32.f32 %v1732_v22  ;;  %v2353_v10 = vand.u32 1, %v2345_v2 }
 0x23c   : > { %6880 = vmatprep.subr.bf16.mxu1 %v7706_v33  ;;  %v1794_v33 = vand.u32 1, %v1786_v21  ;;  %v2362_v8 = vcvt.s32.f32 %v2354_v4  ;;  %v2359_v30 = vcvt.s32.f32 %v2351_v9 }
 0x23d   : > { %v2361_v15 = vcvt.s32.f32 %v2353_v10 }
 0x23e   : > { %6853 = vmatpush3.bf16.msra.mxu0 %v7707_v37  ;;  %v1807_v37 = vpack.c.bf16 %v1803_v24, %v1801_v46  ;;  %v1802_v32 = vcvt.s32.f32 %v1794_v33  ;;  %v2366_v29 = vpack.c.bf16 %v2362_v8, %v2360_v6 }
 0x23f   : > { %6881 = vmatpush3.bf16.msra.mxu1 %v7708_v38  ;;  %6854 = vmatprep.subr.bf16.mxu0 %v7709_v43  ;;  %v7723_v38 = vld [vmem:[%s9619_s3 + $0x130] sm:$0xff]   ;;  %v2365_v16 = vpack.c.bf16 %v2361_v15, %v2359_v30 }
 0x240   : > { %6882 = vmatprep.subr.bf16.mxu1 %v7710_v42  ;;  %v1800_v42 = vcvt.s32.f32 %v1792_v31  ;;  %v7724_v43 = vld [vmem:[%s9619_s3 + $0x1b0] sm:$0xff]   ;;  %1976 = vmatprep.mubr.bf16.mxu0 %v1807_v37 }
 0x242   : > { %6855 = vmatpush3.bf16.msra.mxu0 %v7711_v45  ;;  %v1746_v45 = vpack.c.bf16 %v1742_v60, %v1740_v34  ;;  %v1806_v50 = vpack.c.bf16 %v1802_v32, %v1800_v42 }
 0x243   : > { %6883 = vmatpush3.bf16.msra.mxu1 %v7712_v48  ;;  %6856 = vmatprep.subr.bf16.mxu0 %v7713_v49  ;;  %v7725_v48 = vld [vmem:[%s9619_s3 + $0x178] sm:$0xff]   ;;  %v2145_v49 = vand.u32 1, %v2137_v39 }
 0x244   : > { %6884 = vmatprep.subr.bf16.mxu1 %v7714_v51  ;;  %v7726_v51 = vld [vmem:[%s9619_s3 + $0x1f8] sm:$0xff]   ;;  %2122 = vmatmul.mubr.bf16.gmra.mrb[28].mxu1 %v1746_v45 }
 0x245   : > { %1977 = vmatmul.mubr.bf16.gmra.mrb[12].mxu0 %v1806_v50  ;;  %v2153_v1 = vcvt.s32.f32 %v2145_v49  ;;  %2527 = vmatprep.mubr.bf16.mxu1 %v2364_v52 }
 0x246   : > { %6857 = vmatpush3.bf16.msra.mxu0 %v7715_v55  ;;  %v7727_v55 = vld [vmem:[%s9619_s3 + $0x138] sm:$0xff]   ;;  %2318 = vmatprep.mubr.bf16.mxu0 %v2155_v35 }
 0x247   : > { %6885 = vmatpush3.bf16.msra.mxu1 %v7716_v53  ;;  %6858 = vmatprep.subr.bf16.mxu0 %v7717_v3  ;;  %v2146_v53 = vcvt.s32.f32 %v8706_v61  ;;  %v7728_v61 = vld [vmem:[%s9619_s3 + $0x1b8] sm:$0xff]   ;;  %v2136_v3 = vshra.s32 %v8731_v40, 16  ;;  %v2157_v14 = vpack.c.bf16 %v2153_v1, %v2151_v62 }
 0x248   : > { %6886 = vmatprep.subr.bf16.mxu1 %v7718_v7  ;;  %v2363_v7 = vpack.c.bf16 %v2357_v58, %v2355_v57 }
 0x249   : > { %v2154_v11 = vpack.c.bf16 %v2148_v56, %v2146_v53  ;;  %v2144_v13 = vand.u32 1, %v2136_v3 }
 0x24a   : > { %6859 = vmatpush3.bf16.msra.mxu0 %v7719_v41  ;;  %v2150_v41 = vcvt.s32.f32 %v2142_v12 }
 0x24b   : > { %6887 = vmatpush3.bf16.msra.mxu1 %v7720_v18  ;;  %6860 = vmatprep.subr.bf16.mxu0 %v7721_v23  ;;  %v2152_v40 = vcvt.s32.f32 %v2144_v13 }
 0x24c   : > { %6888 = vmatprep.subr.bf16.mxu1 %v7722_v27 }
 0x24d   : > { %v2156_v17 = vpack.c.bf16 %v2152_v40, %v2150_v41 }
 0x24e   : > { %6861 = vmatpush3.bf16.msra.mxu0 %v7723_v38 }
 0x24f   : > { %6889 = vmatpush3.bf16.msra.mxu1 %v7724_v43  ;;  %6862 = vmatprep.subr.bf16.mxu0 %v7725_v48 }
 0x250   : > { %6890 = vmatprep.subr.bf16.mxu1 %v7726_v51 }
 0x252   : > { %6863 = vmatpush3.bf16.msra.mxu0 %v7727_v55 }
 0x253   : > { %6891 = vmatpush3.bf16.msra.mxu1 %v7728_v61 }
 0x255   : > { %2319 = vmatmul.mubr.bf16.vlgmr.msra.gmra.mrb[16].mxu0 %v2154_v11 }
 0x256   : > { %2528 = vmatmul.mubr.bf16.vlgmr.msra.gmra.mrb[32].mxu1 %v2363_v7  ;;  %2326 = vmatprep.mubr.bf16.mxu0 %v2157_v14 }
 0x257   : > { %2535 = vmatprep.mubr.bf16.mxu1 %v2366_v29 }
 0x25d   : > { %2327 = vmatmul.mubr.bf16.gmra.mrb[20].mxu0 %v2156_v17 }
 0x25e   : > { %2536 = vmatmul.mubr.bf16.gmra.mrb[36].mxu1 %v2365_v16 }
 0x308   : > { %v6808_v19 = vpop.f32.mrb[8].mxu0 }
 0x309   : > { %v6836_v18 = vpop.f32.mrb[24].mxu1  ;;  %v6809_v46 = vpop.f32.mrb[9].mxu0 }
 0x30a   : > { %v6837_v20 = vpop.f32.mrb[25].mxu1  ;;  %v6810_v22 = vadd.f32 %v6809_v46, %v6808_v19  ;;  %v6811_v23 = vpop.f32.mrb[10].mxu0 }
 0x30b   : > { %v6838_v47 = vadd.f32 %v6837_v20, %v6836_v18  ;;  %v6839_v21 = vpop.f32.mrb[26].mxu1  ;;  %v6812_v25 = vpop.f32.mrb[11].mxu0 }
 0x30c   : > { %v6840_v24 = vpop.f32.mrb[27].mxu1  ;;  %v6813_v28 = vadd.f32 %v6812_v25, %v6811_v23 }
 0x30d   : > { %v6841_v26 = vadd.f32 %v6840_v24, %v6839_v21  ;;  %v2116_v27 = vadd.f32 %v6838_v47, %v6810_v22 }
 0x30f   : > { %v2119_v31 = vadd.f32 %v6841_v26, %v6813_v28 }
 0x317   : > { %v6842_v33 = vpop.f32.mrb[28].mxu1 }
 0x318   : > { %v6814_v34 = vpop.f32.mrb[12].mxu0  ;;  %v6843_v36 = vpop.f32.mrb[29].mxu1 }
 0x319   : > { %v6815_v37 = vpop.f32.mrb[13].mxu0  ;;  %v6844_v60 = vadd.f32 %v6843_v36, %v6842_v33  ;;  %v6845_v38 = vpop.f32.mrb[30].mxu1 }
 0x31a   : > { %v6816_v39 = vadd.f32 %v6815_v37, %v6814_v34  ;;  %v6817_v42 = vpop.f32.mrb[14].mxu0  ;;  %v6846_v32 = vpop.f32.mrb[31].mxu1 }
 0x31b   : > { %v6818_v43 = vpop.f32.mrb[15].mxu0  ;;  %v6847_v44 = vadd.f32 %v6846_v32, %v6845_v38 }
 0x31c   : > { %v2124_v45 = vadd.f32 %v6844_v60, %v6816_v39  ;;  %v6819_v48 = vadd.f32 %v6818_v43, %v6817_v42 }
 0x31e   : > { %v2127_v35 = vadd.f32 %v6847_v44, %v6819_v48 }
 0x328   : > { %v6864_v50 = vpop.f32.mrb[16].mxu0 }
 0x329   : > { %v6892_v49 = vpop.f32.mrb[32].mxu1  ;;  %v6865_v52 = vpop.f32.mrb[17].mxu0 }
 0x32a   : > { %v6893_v51 = vpop.f32.mrb[33].mxu1  ;;  %v6866_v55 = vadd.f32 %v6865_v52, %v6864_v50  ;;  %v6867_v56 = vpop.f32.mrb[18].mxu0 }
 0x32b   : > { %v6894_v53 = vadd.f32 %v6893_v51, %v6892_v49  ;;  %v6895_v54 = vpop.f32.mrb[34].mxu1  ;;  %v6868_v58 = vpop.f32.mrb[19].mxu0 }
 0x32c   : > { %v6896_v57 = vpop.f32.mrb[35].mxu1  ;;  %v2335_v61 = vadd.f32 %v6866_v55, %v2116_v27  ;;  %v6869_v63 = vadd.f32 %v6868_v58, %v6867_v56 }
 0x32d   : > { %v6897_v59 = vadd.f32 %v6896_v57, %v6895_v54 }
 0x32e   : > { %v2544_v0 = vadd.f32 %v6894_v53, %v2335_v61  ;;  %v2336_v3 = vadd.f32 %v6869_v63, %v2119_v31 }
 0x330   : > { %2548 = vst [vmem:[#allocation4 + $0x20] sm:$0xff] %v2544_v0  ;;  %v2545_v62 = vadd.f32 %v6897_v59, %v2336_v3  ;;  %v6870_v1 = vpop.f32.mrb[20].mxu0 }
 0x331   : > { %v6898_v5 = vpop.f32.mrb[36].mxu1  ;;  %v6871_v2 = vpop.f32.mrb[21].mxu0 }
 0x332   : > { %v6899_v4 = vpop.f32.mrb[37].mxu1  ;;  %2549 = vst [vmem:[#allocation4 + $0x28] sm:$0xff] %v2545_v62  ;;  %v6872_v8 = vadd.f32 %v6871_v2, %v6870_v1  ;;  %v6873_v9 = vpop.f32.mrb[22].mxu0 }
 0x333   : > { %v6900_v6 = vadd.f32 %v6899_v4, %v6898_v5  ;;  %v6901_v7 = vpop.f32.mrb[38].mxu1  ;;  %v6874_v11 = vpop.f32.mrb[23].mxu0 }
 0x334   : > { %v6902_v10 = vpop.f32.mrb[39].mxu1  ;;  %v2337_v13 = vadd.f32 %v6872_v8, %v2124_v45  ;;  %v6875_v14 = vadd.f32 %v6874_v11, %v6873_v9 }
 0x335   : > { %v6903_v12 = vadd.f32 %v6902_v10, %v6901_v7 }
 0x336   : > { %v2546_v29 = vadd.f32 %v6900_v6, %v2337_v13  ;;  %v2338_v30 = vadd.f32 %v6875_v14, %v2127_v35 }
 0x338   : > { %2550 = vst [vmem:[#allocation4 + $0x30] sm:$0xff] %v2546_v29  ;;  %v2547_v15 = vadd.f32 %v6903_v12, %v2338_v30 }
 0x33a   : > { %2551 = vst [vmem:[#allocation4 + $0x38] sm:$0xff] %v2547_v15 }
 0x33b LB: >> { %8012 = dma.done.wait [#allocation5 + $0x2], 32  ;;  %s8062_s26 = sphi %s8060_s26, %s2557_s26  }
 0x33c   : >> { %8013 = vsyncadd [#allocation5 + $0x2], 4294967264  ;;  %s2557_s26 = sadd.s32 1, %s8062_s26  }
 0x33d   : >> { %p2554_p13 = scmp.ge.s32.totalorder %s2557_s26, 64  }
 0x33e   : > { %v7729_v41 = vld [vmem:[%s9619_s3 + $0xc0] sm:$0xff] (%p2554_p13)   ;;  %v7733_v18 = vld [vmem:[%s9619_s3 + $0xc8] sm:$0xff] (%p2554_p13)   ;;  %v7737_v47 = vld [vmem:[%s9619_s3 + $0xd0] sm:$0xff] (%p2554_p13)   ;;  %s8064_s20 = smov (%p2554_p13), 0  }
 0x33f   : > { %2556 = sbr.rel (!%p2554_p13) target bundleno = 827 (0x33b), region = 564  ;;  %v7730_v40 = vld [vmem:[%s9619_s3 + $0x40] sm:$0xff] (%p2554_p13)   ;;  %6904 = vmatprep.subr.bf16.mxu0 (%p2554_p13), %v7729_v41  ;;  %v7734_v19 = vld [vmem:[%s9619_s3 + $0x48] sm:$0xff] (%p2554_p13)   ;;  %v7738_v21 = vld [vmem:[%s9619_s3 + $0x50] sm:$0xff] (%p2554_p13)  }
 0x340   : > { %v7731_v16 = vld [vmem:[%s9619_s3 + $0x80] sm:$0xff] (%p2554_p13)   ;;  %6932 = vmatprep.subr.bf16.mxu1 (%p2554_p13), %v7730_v40  ;;  %v7735_v20 = vld [vmem:[%s9619_s3 + $0x88] sm:$0xff] (%p2554_p13)   ;;  %v7739_v22 = vld [vmem:[%s9619_s3 + $0x90] sm:$0xff] (%p2554_p13)  }
 0x341   : > { %v7732_v17 = vld [vmem:[%s9619_s3] sm:$0xff] (%p2554_p13)   ;;  %6905 = vmatpush3.bf16.msra.mxu0 (%p2554_p13), %v7731_v16  ;;  %v7736_v46 = vld [vmem:[%s9619_s3 + $0x8] sm:$0xff] (%p2554_p13)   ;;  %v7740_v23 = vld [vmem:[%s9619_s3 + $0x10] sm:$0xff] (%p2554_p13)  }
 0x342   : > { %6933 = vmatpush3.bf16.msra.mxu1 (%p2554_p13), %v7732_v17  ;;  %6906 = vmatprep.subr.bf16.mxu0 (%p2554_p13), %v7733_v18  ;;  %v7741_v24 = vld [vmem:[%s9619_s3 + $0xd8] sm:$0xff] (%p2554_p13)   ;;  %v7745_v28 = vld [vmem:[%s9619_s3 + $0xe0] sm:$0xff] (%p2554_p13)   ;;  %v7749_v36 = vld [vmem:[%s9619_s3 + $0xe8] sm:$0xff] (%p2554_p13)  }
 0x343   : > { %6934 = vmatprep.subr.bf16.mxu1 (%p2554_p13), %v7734_v19  ;;  %v7742_v25 = vld [vmem:[%s9619_s3 + $0x58] sm:$0xff] (%p2554_p13)   ;;  %v7746_v31 = vld [vmem:[%s9619_s3 + $0x60] sm:$0xff] (%p2554_p13)   ;;  %v7750_v37 = vld [vmem:[%s9619_s3 + $0x68] sm:$0xff] (%p2554_p13)  }
 0x344   : > { %v7743_v26 = vld [vmem:[%s9619_s3 + $0x98] sm:$0xff] (%p2554_p13)   ;;  %v7747_v33 = vld [vmem:[%s9619_s3 + $0xa0] sm:$0xff] (%p2554_p13)   ;;  %v7751_v60 = vld [vmem:[%s9619_s3 + $0xa8] sm:$0xff] (%p2554_p13)  }
 0x345   : > { %6907 = vmatpush3.bf16.msra.mxu0 (%p2554_p13), %v7735_v20  ;;  %v7744_v27 = vld [vmem:[%s9619_s3 + $0x18] sm:$0xff] (%p2554_p13)   ;;  %v7748_v34 = vld [vmem:[%s9619_s3 + $0x20] sm:$0xff] (%p2554_p13)   ;;  %v7752_v38 = vld [vmem:[%s9619_s3 + $0x28] sm:$0xff] (%p2554_p13)  }
 0x346   : > { %6935 = vmatpush3.bf16.msra.mxu1 %v7736_v46  ;;  %6908 = vmatprep.subr.bf16.mxu0 %v7737_v47  ;;  %v7753_v39 = vld [vmem:[%s9619_s3 + $0xf0] sm:$0xff]   ;;  %v7757_v44 = vld [vmem:[%s9619_s3 + $0xf8] sm:$0xff]   ;;  %v2563_v49 = vld [vmem:[#allocation2 + $0x88] sm:$0xff] }
 0x347   : > { %6936 = vmatprep.subr.bf16.mxu1 %v7738_v21  ;;  %v7754_v42 = vld [vmem:[%s9619_s3 + $0x70] sm:$0xff]   ;;  %v7758_v45 = vld [vmem:[%s9619_s3 + $0x78] sm:$0xff]   ;;  %v2571_v51 = vld [vmem:[#allocation3 + $0x88] sm:$0xff] }
 0x348   : > { %v7755_v32 = vld [vmem:[%s9619_s3 + $0xb0] sm:$0xff]   ;;  %v7759_v48 = vld [vmem:[%s9619_s3 + $0xb8] sm:$0xff]   ;;  %v8878_v53 = vand.u32 %v2571_v51, %v2563_v49  ;;  %v2562_v54 = vld [vmem:[#allocation2 + $0x80] sm:$0xff] }
 0x349   : > { %6909 = vmatpush3.bf16.msra.mxu0 %v7739_v22  ;;  %v7756_v43 = vld [vmem:[%s9619_s3 + $0x30] sm:$0xff]   ;;  %v7760_v35 = vld [vmem:[%s9619_s3 + $0x38] sm:$0xff]   ;;  %v2570_v57 = vld [vmem:[#allocation3 + $0x80] sm:$0xff] }
 0x34a   : > { %6937 = vmatpush3.bf16.msra.mxu1 %v7740_v23  ;;  %6910 = vmatprep.subr.bf16.mxu0 %v7741_v24  ;;  %v2565_v50 = vld [vmem:[#allocation2 + $0x98] sm:$0xff]  ;;  %v2564_v55 = vld [vmem:[#allocation2 + $0x90] sm:$0xff]  ;;  %v2639_v59 = vshra.s32 %v8878_v53, 8  ;;  %v2587_v61 = vand.u32 1, %v8878_v53  ;;  %v8884_v63 = vand.u32 %v2570_v57, %v2562_v54  ;;  %v7761_v3 = vld [vmem:[%s9619_s3 + $0x140] sm:$0xff]   ;;  %v2989_v22 = vshra.s32 %v8878_v53, 16 }
 0x34b   : > { %6938 = vmatprep.subr.bf16.mxu1 %v7742_v25  ;;  %v2573_v52 = vld [vmem:[#allocation3 + $0x98] sm:$0xff]  ;;  %v2572_v58 = vld [vmem:[#allocation3 + $0x90] sm:$0xff]  ;;  %v7762_v5 = vld [vmem:[%s9619_s3 + $0x1c0] sm:$0xff]  }
 0x34c   : > { %v8880_v56 = vand.u32 %v2573_v52, %v2565_v50  ;;  %v8886_v0 = vand.u32 %v2572_v58, %v2564_v55  ;;  %v2647_v4 = vand.u32 1, %v2639_v59  ;;  %v2595_v2 = vcvt.s32.f32 %v2587_v61  ;;  %v7763_v40 = vld [vmem:[%s9619_s3 + $0x100] sm:$0xff]   ;;  %v7766_v46 = vld [vmem:[%s9619_s3 + $0x1c8] sm:$0xff]   ;;  %v2577_v58 = vld [vmem:[#allocation3 + $0xb8] sm:$0xff] }
 0x34d   : > { %6911 = vmatpush3.bf16.msra.mxu0 %v7743_v26  ;;  %v2638_v6 = vshra.s32 %v8884_v63, 8  ;;  %v2586_v10 = vand.u32 1, %v8884_v63  ;;  %v7764_v18 = vld [vmem:[%s9619_s3 + $0x180] sm:$0xff]   ;;  %v7765_v21 = vld [vmem:[%s9619_s3 + $0x148] sm:$0xff]   ;;  %v7770_v26 = vld [vmem:[%s9619_s3 + $0x1d0] sm:$0xff]  }
 0x34e   : > { %6939 = vmatpush3.bf16.msra.mxu1 %v7744_v27  ;;  %6912 = vmatprep.subr.bf16.mxu0 %v7745_v28  ;;  %v2641_v62 = vshra.s32 %v8880_v56, 8  ;;  %v2589_v1 = vand.u32 1, %v8880_v56  ;;  %v2640_v7 = vshra.s32 %v8886_v0, 8  ;;  %v2588_v11 = vand.u32 1, %v8886_v0  ;;  %v7767_v23 = vld [vmem:[%s9619_s3 + $0x108] sm:$0xff]   ;;  %v7769_v27 = vld [vmem:[%s9619_s3 + $0x150] sm:$0xff]  }
 0x34f   : > { %6940 = vmatprep.subr.bf16.mxu1 %v7746_v31  ;;  %v2655_v12 = vcvt.s32.f32 %v2647_v4  ;;  %v2646_v13 = vand.u32 1, %v2638_v6  ;;  %v2594_v15 = vcvt.s32.f32 %v2586_v10  ;;  %v2991_v24 = vshra.s32 %v8880_v56, 16  ;;  %v7768_v25 = vld [vmem:[%s9619_s3 + $0x188] sm:$0xff]   ;;  %v7771_v31 = vld [vmem:[%s9619_s3 + $0x110] sm:$0xff]   ;;  %v7780_v49 = vld [vmem:[%s9619_s3 + $0x1a0] sm:$0xff]  }
 0x350   : > { %v2649_v8 = vand.u32 1, %v2641_v62  ;;  %v2597_v9 = vcvt.s32.f32 %v2589_v1  ;;  %v2648_v14 = vand.u32 1, %v2640_v7  ;;  %v2596_v41 = vcvt.s32.f32 %v2588_v11  ;;  %v7779_v51 = vld [vmem:[%s9619_s3 + $0x120] sm:$0xff]   ;;  %v2567_v52 = vld [vmem:[#allocation2 + $0xa8] sm:$0xff]  ;;  %v2576_v10 = vld [vmem:[#allocation3 + $0xb0] sm:$0xff] }
 0x351   : > { %6913 = vmatpush3.bf16.msra.mxu0 %v7747_v33  ;;  %v2654_v16 = vcvt.s32.f32 %v2646_v13  ;;  %v8926_v28 = vand.u32 1, %v2989_v22  ;;  %v8931_v33 = vand.u32 1, %v2991_v24  ;;  %v2575_v54 = vld [vmem:[#allocation3 + $0xa8] sm:$0xff]  ;;  %v2566_v4 = vld [vmem:[#allocation2 + $0xa0] sm:$0xff] }
 0x352   : > { %6941 = vmatpush3.bf16.msra.mxu1 %v7748_v34  ;;  %6914 = vmatprep.subr.bf16.mxu0 %v7749_v36  ;;  %v2657_v29 = vcvt.s32.f32 %v2649_v8  ;;  %v2603_v30 = vpack.c.bf16 %v2597_v9, %v2595_v2  ;;  %v2656_v17 = vcvt.s32.f32 %v2648_v14  ;;  %v2602_v20 = vpack.c.bf16 %v2596_v41, %v2594_v15  ;;  %v7772_v34 = vld [vmem:[%s9619_s3 + $0x190] sm:$0xff]   ;;  %v7782_v1 = vld [vmem:[%s9619_s3 + $0x1e8] sm:$0xff]   ;;  %v2574_v9 = vld [vmem:[#allocation3 + $0xa0] sm:$0xff] }
 0x353   : > { %6942 = vmatprep.subr.bf16.mxu1 %v7750_v37  ;;  %v3198_v36 = vshra.s32 %v8878_v53, 24  ;;  %v7774_v37 = vld [vmem:[%s9619_s3 + $0x1d8] sm:$0xff]   ;;  %v8974_v59 = vand.u32 %v2575_v54, %v2567_v52  ;;  %v2568_v2 = vld [vmem:[#allocation2 + $0xb0] sm:$0xff]  ;;  %v8993_v13 = vand.u32 %v2574_v9, %v2566_v4  ;;  %v7784_v41 = vld [vmem:[%s9619_s3 + $0x1a8] sm:$0xff]  }
 0x354   : > { %v2663_v19 = vpack.c.bf16 %v2657_v29, %v2655_v12  ;;  %2971 = vmatprep.mubr.bf16.mxu1 %v2603_v30  ;;  %v2662_v47 = vpack.c.bf16 %v2656_v17, %v2654_v16  ;;  %v2569_v53 = vld [vmem:[#allocation2 + $0xb8] sm:$0xff]  ;;  %v8995_v14 = vand.u32 %v2576_v10, %v2568_v2  ;;  %v7783_v29 = vld [vmem:[%s9619_s3 + $0x128] sm:$0xff]   ;;  %v3007_v16 = vcvt.s32.f32 %v8931_v33 }
 0x355   : > { %6915 = vmatpush3.bf16.msra.mxu0 %v7751_v60  ;;  %v3200_v60 = vshra.s32 %v8880_v56, 24  ;;  %v8963_v50 = vand.u32 1, %v3198_v36  ;;  %v2591_v62 = vand.u32 1, %v8974_v59  ;;  %v2993_v6 = vshra.s32 %v8974_v59, 16 }
 0x356   : > { %6943 = vmatpush3.bf16.msra.mxu1 %v7752_v38  ;;  %6916 = vmatprep.subr.bf16.mxu0 %v7753_v39  ;;  %v7773_v38 = vld [vmem:[%s9619_s3 + $0x158] sm:$0xff]   ;;  %v2988_v39 = vshra.s32 %v8884_v63, 16  ;;  %v2592_v22 = vand.u32 1, %v8995_v14 }
 0x357   : > { %6944 = vmatprep.subr.bf16.mxu1 %v7754_v42  ;;  %2826 = vmatprep.mubr.bf16.mxu0 %v2663_v19  ;;  %v7775_v42 = vld [vmem:[%s9619_s3 + $0x118] sm:$0xff]   ;;  %v8968_v55 = vand.u32 1, %v3200_v60  ;;  %v2599_v12 = vcvt.s32.f32 %v2591_v62  ;;  %v2644_v19 = vshra.s32 %v8995_v14, 8  ;;  %v3214_v24 = vcvt.s32.f32 %v8963_v50 }
 0x358   : > { %v8970_v56 = vand.u32 1, %v2988_v39  ;;  %v2600_v33 = vcvt.s32.f32 %v2592_v22  ;;  %v3001_v39 = vand.u32 1, %v2993_v6  ;;  %v3202_v50 = vshra.s32 %v8974_v59, 24 }
 0x359   : > { %6917 = vmatpush3.bf16.msra.mxu0 %v7755_v32  ;;  %v7776_v32 = vld [vmem:[%s9619_s3 + $0x198] sm:$0xff]  }
 0x35a   : > { %6945 = vmatpush3.bf16.msra.mxu1 %v7756_v43  ;;  %6918 = vmatprep.subr.bf16.mxu0 %v7757_v44  ;;  %v2990_v43 = vshra.s32 %v8886_v0, 16  ;;  %v7777_v44 = vld [vmem:[%s9619_s3 + $0x160] sm:$0xff]  }
 0x35b   : > { %6946 = vmatprep.subr.bf16.mxu1 %v7758_v45  ;;  %v3197_v45 = vshra.s32 %v8884_v63, 24  ;;  %v8978_v63 = vand.u32 %v2577_v58, %v2569_v53  ;;  %v3210_v58 = vand.u32 1, %v3202_v50 }
 0x35c   : > { %v8972_v57 = vand.u32 1, %v2990_v43 }
 0x35d   : > { %6919 = vmatpush3.bf16.msra.mxu0 %v7759_v48  ;;  %v7778_v48 = vld [vmem:[%s9619_s3 + $0x1e0] sm:$0xff]   ;;  %v8976_v61 = vand.u32 1, %v3197_v45  ;;  %v2645_v7 = vshra.s32 %v8978_v63, 8  ;;  %v2593_v8 = vand.u32 1, %v8978_v63  ;;  %v2995_v36 = vshra.s32 %v8978_v63, 16 }
 0x35e   : > { %6947 = vmatpush3.bf16.msra.mxu1 %v7760_v35  ;;  %6960 = vmatprep.subr.bf16.mxu0 %v7761_v3  ;;  %v3199_v35 = vshra.s32 %v8886_v0, 24  ;;  %v7781_v0 = vld [vmem:[%s9619_s3 + $0x168] sm:$0xff]   ;;  %v3006_v52 = vcvt.s32.f32 %v8972_v57  ;;  %v3009_v57 = vcvt.s32.f32 %v3001_v39  ;;  %v3218_v62 = vcvt.s32.f32 %v3210_v58 }
 0x35f   : > { %6988 = vmatprep.subr.bf16.mxu1 %v7762_v5  ;;  %v2643_v5 = vshra.s32 %v8974_v59, 8  ;;  %v2653_v30 = vand.u32 1, %v2645_v7  ;;  %v2601_v15 = vcvt.s32.f32 %v2593_v8  ;;  %v3213_v53 = vcvt.s32.f32 %v8976_v61 }
 0x360   : > { %2827 = vmatmul.mubr.bf16.vlgmr.msra.gmra.mrb[24].mxu0 %v2662_v47  ;;  %v8983_v3 = vand.u32 1, %v3199_v35  ;;  %v2992_v59 = vshra.s32 %v8993_v13, 16 }
 0x361   : > { %2972 = vmatmul.mubr.bf16.vlgmr.msra.gmra.mrb[40].mxu1 %v2602_v20  ;;  %6961 = vmatpush3.bf16.msra.mxu0 %v7763_v40  ;;  %v2651_v11 = vand.u32 1, %v2643_v5  ;;  %v3005_v40 = vcvt.s32.f32 %v8926_v28  ;;  %v2590_v20 = vand.u32 1, %v8993_v13  ;;  %v2661_v47 = vcvt.s32.f32 %v2653_v30 }
 0x362   : > { %6989 = vmatpush3.bf16.msra.mxu1 %v7764_v18  ;;  %6962 = vmatprep.subr.bf16.mxu0 %v7765_v21  ;;  %v2642_v18 = vshra.s32 %v8993_v13, 8  ;;  %v2605_v21 = vpack.c.bf16 %v2601_v15, %v2599_v12  ;;  %v3216_v28 = vcvt.s32.f32 %v8968_v55  ;;  %v3215_v54 = vcvt.s32.f32 %v8983_v3 }
 0x363   : > { %6990 = vmatprep.subr.bf16.mxu1 %v7766_v46  ;;  %v2659_v17 = vcvt.s32.f32 %v2651_v11  ;;  %v7785_v46 = vld [vmem:[%s9619_s3 + $0x170] sm:$0xff]   ;;  %v3013_v43 = vpack.c.bf16 %v3007_v16, %v3005_v40  ;;  %v3204_v55 = vshra.s32 %v8978_v63, 24  ;;  %v3201_v5 = vshra.s32 %v8993_v13, 24 }
 0x364   : > { %2979 = vmatprep.mubr.bf16.mxu1 %v2605_v21  ;;  %v3222_v35 = vpack.c.bf16 %v3216_v28, %v3214_v24  ;;  %v3203_v63 = vshra.s32 %v8995_v14, 24  ;;  %v3000_v8 = vand.u32 1, %v2992_v59 }
 0x365   : > { %6963 = vmatpush3.bf16.msra.mxu0 %v7767_v23  ;;  %v7786_v23 = vld [vmem:[%s9619_s3 + $0x1f0] sm:$0xff]   ;;  %v3212_v3 = vand.u32 1, %v3204_v55  ;;  %v3209_v2 = vand.u32 1, %v3201_v5 }
 0x366   : > { %6991 = vmatpush3.bf16.msra.mxu1 %v7768_v25  ;;  %6964 = vmatprep.subr.bf16.mxu0 %v7769_v27  ;;  %v2650_v25 = vand.u32 1, %v2642_v18  ;;  %v2598_v27 = vcvt.s32.f32 %v2590_v20  ;;  %v3211_v6 = vand.u32 1, %v3203_v63 }
 0x367   : > { %6992 = vmatprep.subr.bf16.mxu1 %v7770_v26  ;;  %v2652_v26 = vand.u32 1, %v2644_v19  ;;  %v3220_v4 = vcvt.s32.f32 %v3212_v3  ;;  %v3217_v12 = vcvt.s32.f32 %v3209_v2 }
 0x368   : > { %v3219_v13 = vcvt.s32.f32 %v3211_v6 }
 0x369   : > { %6965 = vmatpush3.bf16.msra.mxu0 %v7771_v31  ;;  %v2665_v31 = vpack.c.bf16 %v2661_v47, %v2659_v17  ;;  %v2660_v60 = vcvt.s32.f32 %v2652_v26  ;;  %v3224_v11 = vpack.c.bf16 %v3220_v4, %v3218_v62 }
 0x36a   : > { %6993 = vmatpush3.bf16.msra.mxu1 %v7772_v34  ;;  %6966 = vmatprep.subr.bf16.mxu0 %v7773_v38  ;;  %v7787_v34 = vld [vmem:[%s9619_s3 + $0x130] sm:$0xff]   ;;  %v3223_v30 = vpack.c.bf16 %v3219_v13, %v3217_v12 }
 0x36b   : > { %6994 = vmatprep.subr.bf16.mxu1 %v7774_v37  ;;  %v2658_v37 = vcvt.s32.f32 %v2650_v25  ;;  %v7788_v38 = vld [vmem:[%s9619_s3 + $0x1b0] sm:$0xff]   ;;  %2834 = vmatprep.mubr.bf16.mxu0 %v2665_v31 }
 0x36d   : > { %6967 = vmatpush3.bf16.msra.mxu0 %v7775_v42  ;;  %v2604_v42 = vpack.c.bf16 %v2600_v33, %v2598_v27  ;;  %v2664_v45 = vpack.c.bf16 %v2660_v60, %v2658_v37 }
 0x36e   : > { %6995 = vmatpush3.bf16.msra.mxu1 %v7776_v32  ;;  %6968 = vmatprep.subr.bf16.mxu0 %v7777_v44  ;;  %v7789_v32 = vld [vmem:[%s9619_s3 + $0x178] sm:$0xff]   ;;  %v3003_v44 = vand.u32 1, %v2995_v36 }
 0x36f   : > { %6996 = vmatprep.subr.bf16.mxu1 %v7778_v48  ;;  %v7790_v48 = vld [vmem:[%s9619_s3 + $0x1f8] sm:$0xff]   ;;  %2980 = vmatmul.mubr.bf16.gmra.mrb[44].mxu1 %v2604_v42 }
 0x370   : > { %2835 = vmatmul.mubr.bf16.gmra.mrb[28].mxu0 %v2664_v45  ;;  %v3011_v61 = vcvt.s32.f32 %v3003_v44  ;;  %3385 = vmatprep.mubr.bf16.mxu1 %v3222_v35 }
 0x371   : > { %6969 = vmatpush3.bf16.msra.mxu0 %v7779_v51  ;;  %v7791_v51 = vld [vmem:[%s9619_s3 + $0x138] sm:$0xff]   ;;  %3176 = vmatprep.mubr.bf16.mxu0 %v3013_v43 }
 0x372   : > { %6997 = vmatpush3.bf16.msra.mxu1 %v7780_v49  ;;  %6970 = vmatprep.subr.bf16.mxu0 %v7781_v0  ;;  %v3004_v49 = vcvt.s32.f32 %v8970_v56  ;;  %v7792_v56 = vld [vmem:[%s9619_s3 + $0x1b8] sm:$0xff]   ;;  %v2994_v0 = vshra.s32 %v8995_v14, 16  ;;  %v3015_v10 = vpack.c.bf16 %v3011_v61, %v3009_v57 }
 0x373   : > { %6998 = vmatprep.subr.bf16.mxu1 %v7782_v1  ;;  %v3221_v1 = vpack.c.bf16 %v3215_v54, %v3213_v53 }
 0x374   : > { %v3012_v7 = vpack.c.bf16 %v3006_v52, %v3004_v49  ;;  %v3002_v9 = vand.u32 1, %v2994_v0 }
 0x375   : > { %6971 = vmatpush3.bf16.msra.mxu0 %v7783_v29  ;;  %v3008_v29 = vcvt.s32.f32 %v3000_v8 }
 0x376   : > { %6999 = vmatpush3.bf16.msra.mxu1 %v7784_v41  ;;  %6972 = vmatprep.subr.bf16.mxu0 %v7785_v46  ;;  %v3010_v14 = vcvt.s32.f32 %v3002_v9 }
 0x377   : > { %7000 = vmatprep.subr.bf16.mxu1 %v7786_v23 }
 0x378   : > { %v3014_v15 = vpack.c.bf16 %v3010_v14, %v3008_v29 }
 0x379   : > { %6973 = vmatpush3.bf16.msra.mxu0 %v7787_v34 }
 0x37a   : > { %7001 = vmatpush3.bf16.msra.mxu1 %v7788_v38  ;;  %6974 = vmatprep.subr.bf16.mxu0 %v7789_v32 }
 0x37b   : > { %7002 = vmatprep.subr.bf16.mxu1 %v7790_v48 }
 0x37d   : > { %6975 = vmatpush3.bf16.msra.mxu0 %v7791_v51 }
 0x37e   : > { %7003 = vmatpush3.bf16.msra.mxu1 %v7792_v56 }
 0x380   : > { %3177 = vmatmul.mubr.bf16.vlgmr.msra.gmra.mrb[32].mxu0 %v3012_v7 }
 0x381   : > { %3386 = vmatmul.mubr.bf16.vlgmr.msra.gmra.mrb[48].mxu1 %v3221_v1  ;;  %3184 = vmatprep.mubr.bf16.mxu0 %v3015_v10 }
 0x382   : > { %3393 = vmatprep.mubr.bf16.mxu1 %v3224_v11 }
 0x388   : > { %3185 = vmatmul.mubr.bf16.gmra.mrb[36].mxu0 %v3014_v15 }
 0x389   : > { %3394 = vmatmul.mubr.bf16.gmra.mrb[52].mxu1 %v3223_v30 }
 0x433   : > { %v6920_v40 = vpop.f32.mrb[24].mxu0 }
 0x434   : > { %v6948_v41 = vpop.f32.mrb[40].mxu1  ;;  %v6921_v17 = vpop.f32.mrb[25].mxu0 }
 0x435   : > { %v6949_v16 = vpop.f32.mrb[41].mxu1  ;;  %v6922_v20 = vadd.f32 %v6921_v17, %v6920_v40  ;;  %v6923_v46 = vpop.f32.mrb[26].mxu0 }
 0x436   : > { %v6950_v18 = vadd.f32 %v6949_v16, %v6948_v41  ;;  %v6951_v19 = vpop.f32.mrb[42].mxu1  ;;  %v6924_v21 = vpop.f32.mrb[27].mxu0 }
 0x437   : > { %v6952_v47 = vpop.f32.mrb[43].mxu1  ;;  %v6925_v24 = vadd.f32 %v6924_v21, %v6923_v46 }
 0x438   : > { %v6953_v22 = vadd.f32 %v6952_v47, %v6951_v19  ;;  %v2974_v23 = vadd.f32 %v6950_v18, %v6922_v20 }
 0x43a   : > { %v2977_v25 = vadd.f32 %v6953_v22, %v6925_v24 }
 0x442   : > { %v6954_v26 = vpop.f32.mrb[44].mxu1 }
 0x443   : > { %v6926_v27 = vpop.f32.mrb[28].mxu0  ;;  %v6955_v28 = vpop.f32.mrb[45].mxu1 }
 0x444   : > { %v6927_v31 = vpop.f32.mrb[29].mxu0  ;;  %v6956_v33 = vadd.f32 %v6955_v28, %v6954_v26  ;;  %v6957_v34 = vpop.f32.mrb[46].mxu1 }
 0x445   : > { %v6928_v36 = vadd.f32 %v6927_v31, %v6926_v27  ;;  %v6929_v37 = vpop.f32.mrb[30].mxu0  ;;  %v6958_v60 = vpop.f32.mrb[47].mxu1 }
 0x446   : > { %v6930_v38 = vpop.f32.mrb[31].mxu0  ;;  %v6959_v39 = vadd.f32 %v6958_v60, %v6957_v34 }
 0x447   : > { %v2982_v42 = vadd.f32 %v6956_v33, %v6928_v36  ;;  %v6931_v32 = vadd.f32 %v6930_v38, %v6929_v37 }
 0x449   : > { %v2985_v43 = vadd.f32 %v6959_v39, %v6931_v32 }
 0x453   : > { %v6976_v45 = vpop.f32.mrb[32].mxu0 }
 0x454   : > { %v7004_v44 = vpop.f32.mrb[48].mxu1  ;;  %v6977_v35 = vpop.f32.mrb[33].mxu0 }
 0x455   : > { %v7005_v48 = vpop.f32.mrb[49].mxu1  ;;  %v6978_v51 = vadd.f32 %v6977_v35, %v6976_v45  ;;  %v6979_v52 = vpop.f32.mrb[34].mxu0 }
 0x456   : > { %v7006_v49 = vadd.f32 %v7005_v48, %v7004_v44  ;;  %v7007_v50 = vpop.f32.mrb[50].mxu1  ;;  %v6980_v54 = vpop.f32.mrb[35].mxu0 }
 0x457   : > { %v7008_v53 = vpop.f32.mrb[51].mxu1  ;;  %v3193_v56 = vadd.f32 %v6978_v51, %v2974_v23  ;;  %v6981_v58 = vadd.f32 %v6980_v54, %v6979_v52 }
 0x458   : > { %v7009_v55 = vadd.f32 %v7008_v53, %v7007_v50 }
 0x459   : > { %v3402_v59 = vadd.f32 %v7006_v49, %v3193_v56  ;;  %v3194_v0 = vadd.f32 %v6981_v58, %v2977_v25 }
 0x45b   : > { %3406 = vst [vmem:[#allocation4 + $0x40] sm:$0xff] %v3402_v59  ;;  %v3403_v57 = vadd.f32 %v7009_v55, %v3194_v0  ;;  %v6982_v61 = vpop.f32.mrb[36].mxu0 }
 0x45c   : > { %v7010_v5 = vpop.f32.mrb[52].mxu1  ;;  %v6983_v63 = vpop.f32.mrb[37].mxu0 }
 0x45d   : > { %v7011_v3 = vpop.f32.mrb[53].mxu1  ;;  %3407 = vst [vmem:[#allocation4 + $0x48] sm:$0xff] %v3403_v57  ;;  %v6984_v4 = vadd.f32 %v6983_v63, %v6982_v61  ;;  %v6985_v2 = vpop.f32.mrb[38].mxu0 }
 0x45e   : > { %v7012_v62 = vadd.f32 %v7011_v3, %v7010_v5  ;;  %v7013_v1 = vpop.f32.mrb[54].mxu1  ;;  %v6986_v7 = vpop.f32.mrb[39].mxu0 }
 0x45f   : > { %v7014_v6 = vpop.f32.mrb[55].mxu1  ;;  %v3195_v9 = vadd.f32 %v6984_v4, %v2982_v42  ;;  %v6987_v10 = vadd.f32 %v6986_v7, %v6985_v2 }
 0x460   : > { %v7015_v8 = vadd.f32 %v7014_v6, %v7013_v1 }
 0x461   : > { %v3404_v11 = vadd.f32 %v7012_v62, %v3195_v9  ;;  %v3196_v12 = vadd.f32 %v6987_v10, %v2985_v43 }
 0x463   : > { %3408 = vst [vmem:[#allocation4 + $0x50] sm:$0xff] %v3404_v11  ;;  %v3405_v13 = vadd.f32 %v7015_v8, %v3196_v12 }
 0x465   : > { %3409 = vst [vmem:[#allocation4 + $0x58] sm:$0xff] %v3405_v13 }
 0x466 LB: >> { %8014 = dma.done.wait [#allocation5 + $0x3], 32  ;;  %s8066_s20 = sphi %s8064_s20, %s3415_s20  }
 0x467   : >> { %8015 = vsyncadd [#allocation5 + $0x3], 4294967264  ;;  %s3415_s20 = sadd.s32 1, %s8066_s20  }
 0x468   : >> { %p3412_p0 = scmp.ge.s32.totalorder %s3415_s20, 64  }
 0x469   : > { %v7794_v29 = vld [vmem:[%s9619_s3 + $0xc0] sm:$0xff] (%p3412_p0)   ;;  %v7798_v41 = vld [vmem:[%s9619_s3 + $0xc8] sm:$0xff] (%p3412_p0)   ;;  %v7802_v18 = vld [vmem:[%s9619_s3 + $0xd0] sm:$0xff] (%p3412_p0)   ;;  %vm8071_vm0 = vmmov (%p3412_p0), 0   ;;  %s5560_s0 = sshll.u32 (%p3412_p0), %s8207_s16, 4  ;;  %s9654_s4 = sld [smem:[#allocation35_spill]] (%p3412_p0)  ;;  %s9574_s0 = int_to_ptr.vmem [resolvable:$true] %s5560_s0 }
 0x46a   : > { %3414 = sbr.rel (!%p3412_p0) target bundleno = 1126 (0x466), region = 575  ;;  %v7795_v14 = vld [vmem:[%s9619_s3 + $0x40] sm:$0xff] (%p3412_p0)   ;;  %7016 = vmatprep.subr.bf16.mxu0 (%p3412_p0), %v7794_v29  ;;  %v7799_v40 = vld [vmem:[%s9619_s3 + $0x48] sm:$0xff] (%p3412_p0)   ;;  %v7803_v19 = vld [vmem:[%s9619_s3 + $0x50] sm:$0xff] (%p3412_p0)   ;;  %s9655_s26 = sand.u32 (%p3412_p0), 1, %s8026_s29  }
 0x46b   : > { %v7796_v30 = vld [vmem:[%s9619_s3 + $0x80] sm:$0xff] (%p3412_p0)   ;;  %7044 = vmatprep.subr.bf16.mxu1 (%p3412_p0), %v7795_v14  ;;  %v7800_v16 = vld [vmem:[%s9619_s3 + $0x88] sm:$0xff] (%p3412_p0)   ;;  %v7804_v20 = vld [vmem:[%s9619_s3 + $0x90] sm:$0xff] (%p3412_p0)   ;;  %s5548_s15 = scalar_lea.sflag (%p3412_p0), [#allocation11], %s9655_s26  ;;  %s7930_s24 = scalar_lea.vmem (%p3412_p0), %s9574_s0, 16 }
 0x46c   : > { %v7797_v15 = vld [vmem:[%s9619_s3] sm:$0xff] (%p3412_p0)   ;;  %7017 = vmatpush3.bf16.msra.mxu0 (%p3412_p0), %v7796_v30  ;;  %v7801_v17 = vld [vmem:[%s9619_s3 + $0x8] sm:$0xff] (%p3412_p0)   ;;  %v7805_v46 = vld [vmem:[%s9619_s3 + $0x10] sm:$0xff] (%p3412_p0)   ;;  %p7931_p3 = scmp.ne.s32.totalorder (%p3412_p0), %s9574_s0, %s7930_s24  ;;  %s8073_s30 = smov (%p3412_p0), [#allocation10]  }
 0x46d   : > { %7045 = vmatpush3.bf16.msra.mxu1 (%p3412_p0), %v7797_v15  ;;  %7018 = vmatprep.subr.bf16.mxu0 (%p3412_p0), %v7798_v41  ;;  %v7806_v47 = vld [vmem:[%s9619_s3 + $0xd8] sm:$0xff] (%p3412_p0)   ;;  %v7810_v24 = vld [vmem:[%s9619_s3 + $0xe0] sm:$0xff] (%p3412_p0)   ;;  %v7814_v28 = vld [vmem:[%s9619_s3 + $0xe8] sm:$0xff] (%p3412_p0)   ;;  %s7934_s18 = sshll.u32 (%p3412_p0), %s8073_s30, 4  ;;  %s7935_s18 = int_to_ptr.vmem [resolvable:$false] %s7934_s18 }
 0x46e   : > { %7046 = vmatprep.subr.bf16.mxu1 (%p3412_p0), %v7799_v40  ;;  %v7807_v21 = vld [vmem:[%s9619_s3 + $0x58] sm:$0xff] (%p3412_p0)   ;;  %v7811_v25 = vld [vmem:[%s9619_s3 + $0x60] sm:$0xff] (%p3412_p0)   ;;  %v7815_v31 = vld [vmem:[%s9619_s3 + $0x68] sm:$0xff] (%p3412_p0)   ;;  %p7932_p4 = pnand (%p3412_p0), %p7931_p3, %p8178_p1  ;;  %p7937_p6 = scmp.lt.s32.totalorder (%p3412_p0), %s9574_s0, %s7935_s18 }
 0x46f   : > { %v7808_v22 = vld [vmem:[%s9619_s3 + $0x98] sm:$0xff] (%p3412_p0)   ;;  %v7812_v26 = vld [vmem:[%s9619_s3 + $0xa0] sm:$0xff] (%p3412_p0)   ;;  %v7816_v33 = vld [vmem:[%s9619_s3 + $0xa8] sm:$0xff] (%p3412_p0)   ;;  %s9572_s11 = scalar_lea.hbm (%p3412_p0), %s9654_s4, %s8189_s22  ;;  %s7936_s22 = scalar_lea.vmem (%p3412_p0), %s7935_s18, 32 }
 0x470   : > { %7019 = vmatpush3.bf16.msra.mxu0 (%p3412_p0), %v7800_v16  ;;  %v7809_v23 = vld [vmem:[%s9619_s3 + $0x18] sm:$0xff] (%p3412_p0)   ;;  %v7813_v27 = vld [vmem:[%s9619_s3 + $0x20] sm:$0xff] (%p3412_p0)   ;;  %v7817_v34 = vld [vmem:[%s9619_s3 + $0x28] sm:$0xff] (%p3412_p0)   ;;  %p7933_p5 = pneg (%p3412_p0), %p7932_p4  ;;  %p7938_p7 = scmp.lt.s32.totalorder (%p3412_p0), %s7936_s22, %s7930_s24 }
 0x471   : > { %7047 = vmatpush3.bf16.msra.mxu1 %v7801_v17  ;;  %7020 = vmatprep.subr.bf16.mxu0 %v7802_v18  ;;  %v7818_v36 = vld [vmem:[%s9619_s3 + $0xf0] sm:$0xff]   ;;  %v7822_v39 = vld [vmem:[%s9619_s3 + $0xf8] sm:$0xff]   ;;  %v3421_v44 = vld [vmem:[#allocation2 + $0xc8] sm:$0xff] }
 0x472   : > { %7048 = vmatprep.subr.bf16.mxu1 %v7803_v19  ;;  %v7819_v37 = vld [vmem:[%s9619_s3 + $0x70] sm:$0xff]   ;;  %v7823_v42 = vld [vmem:[%s9619_s3 + $0x78] sm:$0xff]   ;;  %v3429_v48 = vld [vmem:[#allocation3 + $0xc8] sm:$0xff]  ;;  %p7939_p8 = por %p7938_p7, %p7937_p6 }
 0x473   : > { %v7820_v60 = vld [vmem:[%s9619_s3 + $0xb0] sm:$0xff]   ;;  %v7824_v32 = vld [vmem:[%s9619_s3 + $0xb8] sm:$0xff]   ;;  %v9142_v49 = vand.u32 %v3429_v48, %v3421_v44  ;;  %v3420_v50 = vld [vmem:[#allocation2 + $0xc0] sm:$0xff] }
 0x474   : > { %7021 = vmatpush3.bf16.msra.mxu0 %v7804_v20  ;;  %v7821_v38 = vld [vmem:[%s9619_s3 + $0x30] sm:$0xff]   ;;  %v7825_v43 = vld [vmem:[%s9619_s3 + $0x38] sm:$0xff]   ;;  %v3428_v53 = vld [vmem:[#allocation3 + $0xc0] sm:$0xff]  ;;  %p7940_p9 = pnand %p7939_p8, %p7933_p5 }
 0x475   : > { %7049 = vmatpush3.bf16.msra.mxu1 %v7805_v46  ;;  %7022 = vmatprep.subr.bf16.mxu0 %v7806_v47  ;;  %v3423_v45 = vld [vmem:[#allocation2 + $0xd8] sm:$0xff]  ;;  %v3422_v51 = vld [vmem:[#allocation2 + $0xd0] sm:$0xff]  ;;  %v3497_v55 = vshra.s32 %v9142_v49, 8  ;;  %v3445_v56 = vand.u32 1, %v9142_v49  ;;  %v9148_v58 = vand.u32 %v3428_v53, %v3420_v50  ;;  %v7826_v0 = vld [vmem:[%s9619_s3 + $0x140] sm:$0xff]   ;;  %v3847_v20 = vshra.s32 %v9142_v49, 16 }
 0x476   : > { %7050 = vmatprep.subr.bf16.mxu1 %v7807_v21  ;;  %v3431_v35 = vld [vmem:[#allocation3 + $0xd8] sm:$0xff]  ;;  %v3430_v54 = vld [vmem:[#allocation3 + $0xd0] sm:$0xff]  ;;  %v7827_v5 = vld [vmem:[%s9619_s3 + $0x1c0] sm:$0xff]  }
 0x477   : > { %v9144_v52 = vand.u32 %v3431_v35, %v3423_v45  ;;  %v9150_v59 = vand.u32 %v3430_v54, %v3422_v51  ;;  %v3505_v3 = vand.u32 1, %v3497_v55  ;;  %v3453_v63 = vcvt.s32.f32 %v3445_v56  ;;  %v7828_v14 = vld [vmem:[%s9619_s3 + $0x100] sm:$0xff]   ;;  %v7831_v17 = vld [vmem:[%s9619_s3 + $0x1c8] sm:$0xff]   ;;  %v3435_v54 = vld [vmem:[#allocation3 + $0xf8] sm:$0xff] }
 0x478   : > { %7023 = vmatpush3.bf16.msra.mxu0 %v7808_v22  ;;  %v3496_v62 = vshra.s32 %v9148_v58, 8  ;;  %v3444_v6 = vand.u32 1, %v9148_v58  ;;  %v7829_v41 = vld [vmem:[%s9619_s3 + $0x180] sm:$0xff]   ;;  %v7830_v19 = vld [vmem:[%s9619_s3 + $0x148] sm:$0xff]   ;;  %v7835_v22 = vld [vmem:[%s9619_s3 + $0x1d0] sm:$0xff]  }
 0x479   : > { %7051 = vmatpush3.bf16.msra.mxu1 %v7809_v23  ;;  %7024 = vmatprep.subr.bf16.mxu0 %v7810_v24  ;;  %v3499_v57 = vshra.s32 %v9144_v52, 8  ;;  %v3447_v61 = vand.u32 1, %v9144_v52  ;;  %v3498_v1 = vshra.s32 %v9150_v59, 8  ;;  %v3446_v7 = vand.u32 1, %v9150_v59  ;;  %v7832_v46 = vld [vmem:[%s9619_s3 + $0x108] sm:$0xff]   ;;  %v7834_v23 = vld [vmem:[%s9619_s3 + $0x150] sm:$0xff]  }
 0x47a   : > { %7052 = vmatprep.subr.bf16.mxu1 %v7811_v25  ;;  %v3513_v8 = vcvt.s32.f32 %v3505_v3  ;;  %v3504_v9 = vand.u32 1, %v3496_v62  ;;  %v3452_v13 = vcvt.s32.f32 %v3444_v6  ;;  %v3849_v47 = vshra.s32 %v9144_v52, 16  ;;  %v7833_v21 = vld [vmem:[%s9619_s3 + $0x188] sm:$0xff]   ;;  %v7836_v25 = vld [vmem:[%s9619_s3 + $0x110] sm:$0xff]   ;;  %v7845_v44 = vld [vmem:[%s9619_s3 + $0x1a0] sm:$0xff]  }
 0x47b   : > { %v3507_v4 = vand.u32 1, %v3499_v57  ;;  %v3455_v2 = vcvt.s32.f32 %v3447_v61  ;;  %v3506_v10 = vand.u32 1, %v3498_v1  ;;  %v3454_v29 = vcvt.s32.f32 %v3446_v7  ;;  %v7844_v48 = vld [vmem:[%s9619_s3 + $0x120] sm:$0xff]   ;;  %v3425_v35 = vld [vmem:[#allocation2 + $0xe8] sm:$0xff]  ;;  %v3434_v6 = vld [vmem:[#allocation3 + $0xf0] sm:$0xff] }
 0x47c   : > { %7025 = vmatpush3.bf16.msra.mxu0 %v7812_v26  ;;  %v3512_v30 = vcvt.s32.f32 %v3504_v9  ;;  %v9190_v24 = vand.u32 1, %v3847_v20  ;;  %v9195_v26 = vand.u32 1, %v3849_v47  ;;  %v3433_v50 = vld [vmem:[#allocation3 + $0xe8] sm:$0xff]  ;;  %v3424_v3 = vld [vmem:[#allocation2 + $0xe0] sm:$0xff] }
 0x47d   : > { %7053 = vmatpush3.bf16.msra.mxu1 %v7813_v27  ;;  %7026 = vmatprep.subr.bf16.mxu0 %v7814_v28  ;;  %v3515_v11 = vcvt.s32.f32 %v3507_v4  ;;  %v3461_v12 = vpack.c.bf16 %v3455_v2, %v3453_v63  ;;  %v3514_v15 = vcvt.s32.f32 %v3506_v10  ;;  %v3460_v16 = vpack.c.bf16 %v3454_v29, %v3452_v13  ;;  %v7837_v27 = vld [vmem:[%s9619_s3 + $0x190] sm:$0xff]   ;;  %v7847_v61 = vld [vmem:[%s9619_s3 + $0x1e8] sm:$0xff]   ;;  %v3432_v2 = vld [vmem:[#allocation3 + $0xe0] sm:$0xff] }
 0x47e   : > { %7054 = vmatprep.subr.bf16.mxu1 %v7815_v31  ;;  %v4056_v28 = vshra.s32 %v9142_v49, 24  ;;  %v7839_v31 = vld [vmem:[%s9619_s3 + $0x1d8] sm:$0xff]   ;;  %v9238_v55 = vand.u32 %v3433_v50, %v3425_v35  ;;  %v3426_v63 = vld [vmem:[#allocation2 + $0xf0] sm:$0xff]  ;;  %v9257_v9 = vand.u32 %v3432_v2, %v3424_v3  ;;  %v7849_v29 = vld [vmem:[%s9619_s3 + $0x1a8] sm:$0xff]  }
 0x47f   : > { %v3521_v40 = vpack.c.bf16 %v3515_v11, %v3513_v8  ;;  %3829 = vmatprep.mubr.bf16.mxu1 %v3461_v12  ;;  %v3520_v18 = vpack.c.bf16 %v3514_v15, %v3512_v30  ;;  %v3427_v49 = vld [vmem:[#allocation2 + $0xf8] sm:$0xff]  ;;  %v9259_v10 = vand.u32 %v3434_v6, %v3426_v63  ;;  %v7848_v11 = vld [vmem:[%s9619_s3 + $0x128] sm:$0xff]   ;;  %v3865_v30 = vcvt.s32.f32 %v9195_v26 }
 0x480   : > { %7027 = vmatpush3.bf16.msra.mxu0 %v7816_v33  ;;  %v4058_v33 = vshra.s32 %v9144_v52, 24  ;;  %v9227_v45 = vand.u32 1, %v4056_v28  ;;  %v3449_v57 = vand.u32 1, %v9238_v55  ;;  %v3851_v62 = vshra.s32 %v9238_v55, 16 }
 0x481   : > { %7055 = vmatpush3.bf16.msra.mxu1 %v7817_v34  ;;  %7028 = vmatprep.subr.bf16.mxu0 %v7818_v36  ;;  %v7838_v34 = vld [vmem:[%s9619_s3 + $0x158] sm:$0xff]   ;;  %v3846_v36 = vshra.s32 %v9148_v58, 16  ;;  %v3450_v20 = vand.u32 1, %v9259_v10 }
 0x482   : > { %7056 = vmatprep.subr.bf16.mxu1 %v7819_v37  ;;  %3684 = vmatprep.mubr.bf16.mxu0 %v3521_v40  ;;  %v7840_v37 = vld [vmem:[%s9619_s3 + $0x118] sm:$0xff]   ;;  %v9232_v51 = vand.u32 1, %v4058_v33  ;;  %v3457_v8 = vcvt.s32.f32 %v3449_v57  ;;  %v3502_v40 = vshra.s32 %v9259_v10, 8  ;;  %v4072_v47 = vcvt.s32.f32 %v9227_v45 }
 0x483   : > { %v9234_v52 = vand.u32 1, %v3846_v36  ;;  %v3458_v26 = vcvt.s32.f32 %v3450_v20  ;;  %v3859_v36 = vand.u32 1, %v3851_v62  ;;  %v4060_v45 = vshra.s32 %v9238_v55, 24 }
 0x484   : > { %7029 = vmatpush3.bf16.msra.mxu0 %v7820_v60  ;;  %v7841_v60 = vld [vmem:[%s9619_s3 + $0x198] sm:$0xff]   ;;  %v4061_v57 = vshra.s32 %v9259_v10, 24 }
 0x485   : > { %7057 = vmatpush3.bf16.msra.mxu1 %v7821_v38  ;;  %7030 = vmatprep.subr.bf16.mxu0 %v7822_v39  ;;  %v3848_v38 = vshra.s32 %v9150_v59, 16  ;;  %v7842_v39 = vld [vmem:[%s9619_s3 + $0x160] sm:$0xff]  }
 0x486   : > { %7058 = vmatprep.subr.bf16.mxu1 %v7823_v42  ;;  %v4055_v42 = vshra.s32 %v9148_v58, 24  ;;  %v9242_v58 = vand.u32 %v3435_v54, %v3427_v49  ;;  %v4068_v54 = vand.u32 1, %v4060_v45  ;;  %v4069_v2 = vand.u32 1, %v4061_v57  ;;  %v7873_v45 = vld [vmem:[%s9623_s7 + $0x78] sm:$0xff]  }
 0x487   : > { %v9236_v53 = vand.u32 1, %v3848_v38 }
 0x488   : > { %7031 = vmatpush3.bf16.msra.mxu0 %v7824_v32  ;;  %v7843_v32 = vld [vmem:[%s9619_s3 + $0x1e0] sm:$0xff]   ;;  %v9240_v56 = vand.u32 1, %v4055_v42  ;;  %v3503_v1 = vshra.s32 %v9242_v58, 8  ;;  %v3451_v4 = vand.u32 1, %v9242_v58  ;;  %v3853_v28 = vshra.s32 %v9242_v58, 16 }
 0x489   : > { %7059 = vmatpush3.bf16.msra.mxu1 %v7825_v43  ;;  %7072 = vmatprep.subr.bf16.mxu0 %v7826_v0  ;;  %v4057_v43 = vshra.s32 %v9150_v59, 24  ;;  %v7846_v59 = vld [vmem:[%s9619_s3 + $0x168] sm:$0xff]   ;;  %v3864_v35 = vcvt.s32.f32 %v9236_v53  ;;  %v7858_v53 = vld [vmem:[%s9622_s6 + $0x40] sm:$0xff]  }
 0x48a   : > { %7100 = vmatprep.subr.bf16.mxu1 %v7827_v5  ;;  %v3501_v5 = vshra.s32 %v9238_v55, 8  ;;  %v3511_v12 = vand.u32 1, %v3503_v1  ;;  %v3459_v13 = vcvt.s32.f32 %v3451_v4  ;;  %v4071_v49 = vcvt.s32.f32 %v9240_v56 }
 0x48b   : > { %3685 = vmatmul.mubr.bf16.vlgmr.msra.gmra.mrb[40].mxu0 %v3520_v18  ;;  %v9247_v0 = vand.u32 1, %v4057_v43  ;;  %v3850_v55 = vshra.s32 %v9257_v9, 16  ;;  %v3867_v56 = vcvt.s32.f32 %v3859_v36  ;;  %v4280_v36 = vld [vmem:[#allocation4 + $0x58] sm:$0xff] }
 0x48c   : > { %3830 = vmatmul.mubr.bf16.vlgmr.msra.gmra.mrb[56].mxu1 %v3460_v16  ;;  %7073 = vmatpush3.bf16.msra.mxu0 %v7828_v14  ;;  %v3509_v7 = vand.u32 1, %v3501_v5  ;;  %v3863_v14 = vcvt.s32.f32 %v9190_v24  ;;  %v3448_v16 = vand.u32 1, %v9257_v9  ;;  %v3519_v18 = vcvt.s32.f32 %v3511_v12 }
 0x48d   : > { %7101 = vmatpush3.bf16.msra.mxu1 %v7829_v41  ;;  %7074 = vmatprep.subr.bf16.mxu0 %v7830_v19  ;;  %v3500_v41 = vshra.s32 %v9257_v9, 8  ;;  %v3463_v19 = vpack.c.bf16 %v3459_v13, %v3457_v8  ;;  %v4074_v24 = vcvt.s32.f32 %v9232_v51  ;;  %v4073_v50 = vcvt.s32.f32 %v9247_v0 }
 0x48e   : > { %7102 = vmatprep.subr.bf16.mxu1 %v7831_v17  ;;  %v3517_v15 = vcvt.s32.f32 %v3509_v7  ;;  %v7850_v17 = vld [vmem:[%s9619_s3 + $0x170] sm:$0xff]   ;;  %v3871_v38 = vpack.c.bf16 %v3865_v30, %v3863_v14  ;;  %v4062_v51 = vshra.s32 %v9242_v58, 24  ;;  %v4059_v5 = vshra.s32 %v9257_v9, 24  ;;  %v7859_v14 = vld [vmem:[%s9622_s6 + $0x48] sm:$0xff]  }
 0x48f   : > { %3837 = vmatprep.mubr.bf16.mxu1 %v3463_v19  ;;  %v4080_v43 = vpack.c.bf16 %v4074_v24, %v4072_v47  ;;  %v3858_v3 = vand.u32 1, %v3850_v55  ;;  %v4079_v62 = vpack.c.bf16 %v4073_v50, %v4071_v49  ;;  %v7860_v30 = vld [vmem:[%s9622_s6 + $0x50] sm:$0xff]   ;;  %v4270_v19 = vld [vmem:[#allocation4 + $0x8] sm:$0xff]  ;;  %v4272_v47 = vld [vmem:[#allocation4 + $0x18] sm:$0xff] }
 0x490   : > { %7075 = vmatpush3.bf16.msra.mxu0 %v7832_v46  ;;  %v7851_v46 = vld [vmem:[%s9619_s3 + $0x1f0] sm:$0xff]   ;;  %v4070_v0 = vand.u32 1, %v4062_v51  ;;  %v4067_v4 = vand.u32 1, %v4059_v5 }
 0x491   : > { %7103 = vmatpush3.bf16.msra.mxu1 %v7833_v21  ;;  %7076 = vmatprep.subr.bf16.mxu0 %v7834_v23  ;;  %v3508_v21 = vand.u32 1, %v3500_v41  ;;  %v3456_v23 = vcvt.s32.f32 %v3448_v16  ;;  %v7862_v41 = vld [vmem:[%s9622_s6 + $0x60] sm:$0xff]   ;;  %v7864_v16 = vld [vmem:[%s9622_s6 + $0x70] sm:$0xff]  }
 0x492   : > { %7104 = vmatprep.subr.bf16.mxu1 %v7835_v22  ;;  %v3510_v22 = vand.u32 1, %v3502_v40  ;;  %v4078_v1 = vcvt.s32.f32 %v4070_v0  ;;  %v4075_v9 = vcvt.s32.f32 %v4067_v4  ;;  %v7863_v40 = vld [vmem:[%s9622_s6 + $0x68] sm:$0xff]  }
 0x494   : > { %7077 = vmatpush3.bf16.msra.mxu0 %v7836_v25  ;;  %v3523_v25 = vpack.c.bf16 %v3519_v18, %v3517_v15  ;;  %v3518_v33 = vcvt.s32.f32 %v3510_v22  ;;  %v7861_v15 = vld [vmem:[%s9622_s6 + $0x58] sm:$0xff]   ;;  %v4269_v18 = vld [vmem:[#allocation4] sm:$0xff] }
 0x495   : > { %7105 = vmatpush3.bf16.msra.mxu1 %v7837_v27  ;;  %7078 = vmatprep.subr.bf16.mxu0 %v7838_v34  ;;  %v7852_v27 = vld [vmem:[%s9619_s3 + $0x130] sm:$0xff]   ;;  %v4302_v20 = vpack.c.bf16 %v4270_v19, %v4269_v18  ;;  %v4273_v22 = vld [vmem:[#allocation4 + $0x20] sm:$0xff] }
 0x496   : > { %7106 = vmatprep.subr.bf16.mxu1 %v7839_v31  ;;  %v3516_v31 = vcvt.s32.f32 %v3508_v21  ;;  %v7853_v34 = vld [vmem:[%s9619_s3 + $0x1b0] sm:$0xff]   ;;  %3692 = vmatprep.mubr.bf16.mxu0 %v3523_v25 }
 0x497   : > { %v4275_v25 = vld [vmem:[#allocation4 + $0x30] sm:$0xff] }
 0x498   : > { %7079 = vmatpush3.bf16.msra.mxu0 %v7840_v37  ;;  %v3462_v37 = vpack.c.bf16 %v3458_v26, %v3456_v23  ;;  %v3522_v42 = vpack.c.bf16 %v3518_v33, %v3516_v31  ;;  %v4274_v23 = vld [vmem:[#allocation4 + $0x28] sm:$0xff]  ;;  %v4276_v26 = vld [vmem:[#allocation4 + $0x38] sm:$0xff] }
 0x499   : > { %7107 = vmatpush3.bf16.msra.mxu1 %v7841_v60  ;;  %7080 = vmatprep.subr.bf16.mxu0 %v7842_v39  ;;  %v7854_v60 = vld [vmem:[%s9619_s3 + $0x178] sm:$0xff]   ;;  %v3861_v39 = vand.u32 1, %v3853_v28  ;;  %v4304_v24 = vpack.c.bf16 %v4274_v23, %v4273_v22  ;;  %v4277_v28 = vld [vmem:[#allocation4 + $0x40] sm:$0xff]  ;;  %v4278_v31 = vld [vmem:[#allocation4 + $0x48] sm:$0xff] }
 0x49a   : > { %7108 = vmatprep.subr.bf16.mxu1 %v7843_v32  ;;  %v7855_v32 = vld [vmem:[%s9619_s3 + $0x1f8] sm:$0xff]   ;;  %3838 = vmatmul.mubr.bf16.gmra.mrb[60].mxu1 %v3462_v37  ;;  %v4306_v33 = vpack.c.bf16 %v4278_v31, %v4277_v28 }
 0x49b   : > { %3693 = vmatmul.mubr.bf16.gmra.mrb[44].mxu0 %v3522_v42  ;;  %v3869_v58 = vcvt.s32.f32 %v3861_v39  ;;  %4243 = vmatprep.mubr.bf16.mxu1 %v4080_v43  ;;  %v7868_v39 = vld [vmem:[%s9623_s7 + $0x50] sm:$0xff]   ;;  %v7869_v42 = vld [vmem:[%s9623_s7 + $0x58] sm:$0xff]   ;;  %v7871_v43 = vld [vmem:[%s9623_s7 + $0x68] sm:$0xff]  }
 0x49c   : > { %7081 = vmatpush3.bf16.msra.mxu0 %v7844_v48  ;;  %v7856_v48 = vld [vmem:[%s9619_s3 + $0x138] sm:$0xff]   ;;  %4034 = vmatprep.mubr.bf16.mxu0 %v3871_v38  ;;  %v7867_v38 = vld [vmem:[%s9623_s7 + $0x48] sm:$0xff]  }
 0x49d   : > { %7109 = vmatpush3.bf16.msra.mxu1 %v7845_v44  ;;  %7082 = vmatprep.subr.bf16.mxu0 %v7846_v59  ;;  %v3862_v44 = vcvt.s32.f32 %v9234_v52  ;;  %v7857_v52 = vld [vmem:[%s9619_s3 + $0x1b8] sm:$0xff]   ;;  %v3852_v59 = vshra.s32 %v9259_v10, 16  ;;  %v3873_v7 = vpack.c.bf16 %v3869_v58, %v3867_v56  ;;  %v3866_v10 = vcvt.s32.f32 %v3858_v3  ;;  %v9361_v56 = vld [vmem:[%s9622_s6] sm:$0xff]  }
 0x49e   : > { %7110 = vmatprep.subr.bf16.mxu1 %v7847_v61  ;;  %v4076_v61 = vcvt.s32.f32 %v4068_v54 }
 0x49f   : > { %v3860_v63 = vand.u32 1, %v3852_v59  ;;  %v3870_v6 = vpack.c.bf16 %v3864_v35, %v3862_v44  ;;  %v7872_v44 = vld [vmem:[%s9623_s7 + $0x70] sm:$0xff]  }
 0x4a0   : > { %7083 = vmatpush3.bf16.msra.mxu0 %v7848_v11  ;;  %v4082_v8 = vpack.c.bf16 %v4078_v1, %v4076_v61  ;;  %v4077_v11 = vcvt.s32.f32 %v4069_v2 }
 0x4a1   : > { %7111 = vmatpush3.bf16.msra.mxu1 %v7849_v29  ;;  %7084 = vmatprep.subr.bf16.mxu0 %v7850_v17  ;;  %v3868_v12 = vcvt.s32.f32 %v3860_v63  ;;  %v7865_v17 = vld [vmem:[%s9622_s6 + $0x78] sm:$0xff]  }
 0x4a2   : > { %7112 = vmatprep.subr.bf16.mxu1 %v7851_v46  ;;  %v4081_v13 = vpack.c.bf16 %v4077_v11, %v4075_v9  ;;  %v4271_v46 = vld [vmem:[#allocation4 + $0x10] sm:$0xff] }
 0x4a3   : > { %v3872_v29 = vpack.c.bf16 %v3868_v12, %v3866_v10  ;;  %v4303_v21 = vpack.c.bf16 %v4272_v47, %v4271_v46 }
 0x4a4   : > { %7085 = vmatpush3.bf16.msra.mxu0 %v7852_v27  ;;  %v4305_v27 = vpack.c.bf16 %v4276_v26, %v4275_v25 }
 0x4a5   : > { %7113 = vmatpush3.bf16.msra.mxu1 %v7853_v34  ;;  %7086 = vmatprep.subr.bf16.mxu0 %v7854_v60  ;;  %v4279_v34 = vld [vmem:[#allocation4 + $0x50] sm:$0xff]  ;;  %v7866_v60 = vld [vmem:[%s9623_s7 + $0x40] sm:$0xff]  }
 0x4a6   : > { %7114 = vmatprep.subr.bf16.mxu1 %v7855_v32  ;;  %v4307_v37 = vpack.c.bf16 %v4280_v36, %v4279_v34  ;;  %v7870_v32 = vld [vmem:[%s9623_s7 + $0x60] sm:$0xff]  }
 0x4a8   : > { %7087 = vmatpush3.bf16.msra.mxu0 %v7856_v48 }
 0x4a9   : > { %7115 = vmatpush3.bf16.msra.mxu1 %v7857_v52  ;;  %7233 = vmatprep.subr.bf16.mxu0 %v7858_v53 }
 0x4aa   : > { %7265 = vmatprep.subr.bf16.mxu1 %v7866_v60 }
 0x4ab   : > { %4035 = vmatmul.mubr.bf16.vlgmr.msra.gmra.mrb[48].mxu0 %v3870_v6 }
 0x4ac   : > { %4244 = vmatmul.mubr.bf16.vlgmr.msra.gmra.mrb[64].mxu1 %v4079_v62  ;;  %4042 = vmatprep.mubr.bf16.mxu0 %v3873_v7 }
 0x4ad   : > { %4251 = vmatprep.mubr.bf16.mxu1 %v4082_v8  ;;  %7234 = vmatpush3.bf16.msra.mxu0 %v7858_v53 }
 0x4ae   : > { %7235 = vmatprep.subr.bf16.mxu0 %v7859_v14  ;;  %7266 = vmatpush3.bf16.msra.mxu1 %v7866_v60 }
 0x4af   : > { %7267 = vmatprep.subr.bf16.mxu1 %v7867_v38 }
 0x4b1   : > { %7236 = vmatpush3.bf16.msra.mxu0 %v7859_v14 }
 0x4b2   : > { %7237 = vmatprep.subr.bf16.mxu0 %v7860_v30  ;;  %7268 = vmatpush3.bf16.msra.mxu1 %v7867_v38 }
 0x4b3   : > { %4043 = vmatmul.mubr.bf16.gmra.mrb[52].mxu0 %v3872_v29  ;;  %7269 = vmatprep.subr.bf16.mxu1 %v7868_v39 }
 0x4b4   : > { %4252 = vmatmul.mubr.bf16.gmra.mrb[68].mxu1 %v4081_v13  ;;  %7249 = vmatprep.mubr.bf16.mxu0 %v4302_v20 }
 0x4b5   : > { %7238 = vmatpush3.bf16.msra.mxu0 %v7860_v30 }
 0x4b6   : > { %7239 = vmatprep.subr.bf16.mxu0 %v7861_v15  ;;  %7270 = vmatpush3.bf16.msra.mxu1 %v7868_v39 }
 0x4b7   : > { %7271 = vmatprep.subr.bf16.mxu1 %v7869_v42 }
 0x4b9   : > { %7240 = vmatpush3.bf16.msra.mxu0 %v7861_v15 }
 0x4ba   : > { %7241 = vmatprep.subr.bf16.mxu0 %v7862_v41  ;;  %7272 = vmatpush3.bf16.msra.mxu1 %v7869_v42 }
 0x4bb   : > { %7273 = vmatprep.subr.bf16.mxu1 %v7870_v32 }
 0x4bd   : > { %7242 = vmatpush3.bf16.msra.mxu0 %v7862_v41 }
 0x4be   : > { %7243 = vmatprep.subr.bf16.mxu0 %v7863_v40  ;;  %7274 = vmatpush3.bf16.msra.mxu1 %v7870_v32 }
 0x4bf   : > { %7275 = vmatprep.subr.bf16.mxu1 %v7871_v43 }
 0x4c1   : > { %7244 = vmatpush3.bf16.msra.mxu0 %v7863_v40 }
 0x4c2   : > { %7245 = vmatprep.subr.bf16.mxu0 %v7864_v16  ;;  %7276 = vmatpush3.bf16.msra.mxu1 %v7871_v43 }
 0x4c3   : > { %7277 = vmatprep.subr.bf16.mxu1 %v7872_v44 }
 0x4c5   : > { %7246 = vmatpush3.bf16.msra.mxu0 %v7864_v16 }
 0x4c6   : > { %7247 = vmatprep.subr.bf16.mxu0 %v7865_v17  ;;  %7278 = vmatpush3.bf16.msra.mxu1 %v7872_v44 }
 0x4c7   : > { %7279 = vmatprep.subr.bf16.mxu1 %v7873_v45 }
 0x4c9   : > { %7248 = vmatpush3.bf16.msra.mxu0 %v7865_v17 }
 0x4ca   : > { %7280 = vmatpush3.bf16.msra.mxu1 %v7873_v45  ;;  %v4310_v45 = vlaneseq }
 0x4cb   : > { %7329 = vmatprep.subr.bf16.mxu1 %v9361_v56 }
 0x4cc   : > { %7250 = vmatmul.mubr.bf16.vlgmr.msra.gmra.mrb[56].mxu0 %v4303_v21 }
 0x4cd   : > { %7253 = vmatprep.mubr.bf16.mxu0 %v4304_v24 }
 0x4d4   : > { %7254 = vmatmul.mubr.bf16.gmra.mrb[60].mxu0 %v4305_v27 }
 0x4d5   : > { %7257 = vmatprep.mubr.bf16.mxu0 %v4306_v33 }
 0x4dc   : > { %7258 = vmatmul.mubr.bf16.gmra.mrb[64].mxu0 %v4307_v37 }
 0x55e   : > { %v7032_v35 = vpop.f32.mrb[40].mxu0 }
 0x55f   : > { %v7060_v48 = vpop.f32.mrb[56].mxu1  ;;  %v7033_v50 = vpop.f32.mrb[41].mxu0 }
 0x560   : > { %v7061_v49 = vpop.f32.mrb[57].mxu1  ;;  %v7034_v54 = vadd.f32 %v7033_v50, %v7032_v35  ;;  %v7035_v55 = vpop.f32.mrb[42].mxu0 }
 0x561   : > { %v7062_v51 = vadd.f32 %v7061_v49, %v7060_v48  ;;  %v7063_v52 = vpop.f32.mrb[58].mxu1  ;;  %v7036_v5 = vpop.f32.mrb[43].mxu0  ;;  %v9364_v48 = vshrl.u32 %v4310_v45, 7  ;;  %v9370_v49 = vld [vmem:[%s9625_s9] sm:$0x3f] }
 0x562   : > { %v7064_v59 = vpop.f32.mrb[59].mxu1  ;;  %v7037_v0 = vadd.f32 %v7036_v5, %v7035_v55  ;;  %v6635_v45 = vld [vmem:[%s8203_s14] sm:$0xff]  }
 0x563   : > { %v7065_v53 = vadd.f32 %v7064_v59, %v7063_v52  ;;  %v3832_v58 = vadd.f32 %v7062_v51, %v7034_v54  ;;  %v4312_v35 = vsub.s32 2, %v9364_v48 }
 0x565   : > { %v3835_v57 = vadd.f32 %v7065_v53, %v7037_v0  ;;  %v9373_v50 = vrot.slane %v9370_v49, %v4312_v35 }
 0x56d   : > { %v7066_v61 = vpop.f32.mrb[60].mxu1 }
 0x56e   : > { %v7038_v3 = vpop.f32.mrb[44].mxu0  ;;  %v7067_v63 = vpop.f32.mrb[61].mxu1 }
 0x56f   : > { %v7039_v62 = vpop.f32.mrb[45].mxu0  ;;  %v7068_v1 = vadd.f32 %v7067_v63, %v7066_v61  ;;  %v7069_v4 = vpop.f32.mrb[62].mxu1 }
 0x570   : > { %v7040_v2 = vadd.f32 %v7039_v62, %v7038_v3  ;;  %v7041_v6 = vpop.f32.mrb[46].mxu0  ;;  %v7070_v7 = vpop.f32.mrb[63].mxu1 }
 0x571   : > { %v7042_v8 = vpop.f32.mrb[47].mxu0  ;;  %v7071_v9 = vadd.f32 %v7070_v7, %v7069_v4 }
 0x572   : > { %v3840_v11 = vadd.f32 %v7068_v1, %v7040_v2  ;;  %v7043_v10 = vadd.f32 %v7042_v8, %v7041_v6  ;;  %v7875_v6 = vld [vmem:[%s9622_s6 + $0x8] sm:$0xff]  }
 0x574   : > { %v3843_v12 = vadd.f32 %v7071_v9, %v7043_v10 }
 0x57e   : > { %v7088_v29 = vpop.f32.mrb[48].mxu0 }
 0x57f   : > { %v7116_v13 = vpop.f32.mrb[64].mxu1  ;;  %v7089_v30 = vpop.f32.mrb[49].mxu0 }
 0x580   : > { %v7117_v14 = vpop.f32.mrb[65].mxu1  ;;  %v7090_v40 = vadd.f32 %v7089_v30, %v7088_v29  ;;  %v7091_v16 = vpop.f32.mrb[50].mxu0 }
 0x581   : > { %v7118_v15 = vadd.f32 %v7117_v14, %v7116_v13  ;;  %v7119_v41 = vpop.f32.mrb[66].mxu1  ;;  %v7092_v18 = vpop.f32.mrb[51].mxu0  ;;  %v7876_v14 = vld [vmem:[%s9622_s6 + $0x10] sm:$0xff]  }
 0x582   : > { %v7120_v17 = vpop.f32.mrb[67].mxu1  ;;  %v4051_v20 = vadd.f32 %v7090_v40, %v3832_v58  ;;  %v7093_v46 = vadd.f32 %v7092_v18, %v7091_v16  ;;  %v7877_v18 = vld [vmem:[%s9622_s6 + $0x18] sm:$0xff]  }
 0x583   : > { %v7121_v19 = vadd.f32 %v7120_v17, %v7119_v41 }
 0x584   : > { %v4260_v47 = vadd.f32 %v7118_v15, %v4051_v20  ;;  %v4052_v21 = vadd.f32 %v7093_v46, %v3835_v57 }
 0x586   : > { %v4261_v23 = vadd.f32 %v7121_v19, %v4052_v21  ;;  %v7094_v24 = vpop.f32.mrb[52].mxu0 }
 0x587   : > { %v7122_v22 = vpop.f32.mrb[68].mxu1  ;;  %v7095_v26 = vpop.f32.mrb[53].mxu0 }
 0x588   : > { %v7123_v25 = vpop.f32.mrb[69].mxu1  ;;  %v7096_v31 = vadd.f32 %v7095_v26, %v7094_v24  ;;  %v7097_v33 = vpop.f32.mrb[54].mxu0  ;;  %v4308_v36 = vpack.c.bf16 %v4261_v23, %v4260_v47 }
 0x589   : > { %v7124_v27 = vadd.f32 %v7123_v25, %v7122_v22  ;;  %v7125_v28 = vpop.f32.mrb[70].mxu1  ;;  %v7098_v37 = vpop.f32.mrb[55].mxu0 }
 0x58a   : > { %v7126_v34 = vpop.f32.mrb[71].mxu1  ;;  %v4053_v38 = vadd.f32 %v7096_v31, %v3840_v11  ;;  %v7099_v39 = vadd.f32 %v7098_v37, %v7097_v33  ;;  %7261 = vmatprep.mubr.bf16.mxu0 %v4308_v36  ;;  %v7880_v31 = vld [vmem:[%s9622_s6 + $0x30] sm:$0xff]   ;;  %v7881_v33 = vld [vmem:[%s9622_s6 + $0x38] sm:$0xff]   ;;  %v7883_v36 = vld [vmem:[%s9623_s7 + $0x88] sm:$0xff]  }
 0x58b   : > { %v7127_v60 = vadd.f32 %v7126_v34, %v7125_v28  ;;  %v7879_v28 = vld [vmem:[%s9622_s6 + $0x28] sm:$0xff]   ;;  %v7882_v34 = vld [vmem:[%s9623_s7 + $0x80] sm:$0xff]   ;;  %v7884_v37 = vld [vmem:[%s9623_s7 + $0x90] sm:$0xff]  }
 0x58c   : > { %v4262_v42 = vadd.f32 %v7124_v27, %v4053_v38  ;;  %v4054_v32 = vadd.f32 %v7099_v39, %v3843_v12  ;;  %v7878_v27 = vld [vmem:[%s9622_s6 + $0x20] sm:$0xff]   ;;  %7297 = vmatprep.subr.bf16.mxu0 %v7882_v34  ;;  %v7887_v39 = vld [vmem:[%s9623_s7 + $0xa8] sm:$0xff]  }
 0x58d   : > { %7298 = vmatpush3.bf16.msra.mxu0 %v7882_v34  ;;  %v7886_v38 = vld [vmem:[%s9623_s7 + $0xa0] sm:$0xff]  }
 0x58e   : > { %v4263_v43 = vadd.f32 %v7127_v60, %v4054_v32  ;;  %7299 = vmatprep.subr.bf16.mxu0 %v7883_v36  ;;  %v7885_v60 = vld [vmem:[%s9623_s7 + $0x98] sm:$0xff]  }
 0x58f   : > { %v7889_v32 = vld [vmem:[%s9623_s7 + $0xb8] sm:$0xff]  }
 0x590   : > { %v4309_v44 = vpack.c.bf16 %v4263_v43, %v4262_v42  ;;  %v7888_v42 = vld [vmem:[%s9623_s7 + $0xb0] sm:$0xff]   ;;  %v9436_v43 = vld [vmem:[%s9623_s7] sm:$0xff]  }
 0x591   : > { %7300 = vmatpush3.bf16.msra.mxu0 %v7883_v36 }
 0x592   : > { %7262 = vmatmul.mubr.bf16.gmra.mrb[68].mxu0 %v4309_v44  ;;  %7301 = vmatprep.subr.bf16.mxu0 %v7884_v37  ;;  %v6603_v44 = vld [vmem:[%s8198_s27] sm:$0xff]  }
 0x593   : > { %v6604_v35 = vunpack.c.l.bf16 %v6603_v44 }
 0x595   : > { %7302 = vmatpush3.bf16.msra.mxu0 %v7884_v37 }
 0x596   : > { %7303 = vmatprep.subr.bf16.mxu0 %v7885_v60 }
 0x599   : > { %7304 = vmatpush3.bf16.msra.mxu0 %v7885_v60 }
 0x59a   : > { %7305 = vmatprep.subr.bf16.mxu0 %v7886_v38 }
 0x59d   : > { %7306 = vmatpush3.bf16.msra.mxu0 %v7886_v38  ;;  %v6670_v38 = vld [vmem:[%s8198_s27 + $0x28] sm:$0xff]  }
 0x59e   : > { %7307 = vmatprep.subr.bf16.mxu0 %v7887_v39 }
 0x59f   : > { %v7251_v51 = vpop.f32.mrb[56].mxu0 }
 0x5a0   : > { %v4405_v52 = vadd.f32 %v7251_v51, %v9373_v50  ;;  %v4396_v54 = vpop.f32.mrb[57].mxu0  ;;  %v6605_v51 = vunpack.c.h.bf16 %v6603_v44  ;;  %v6624_v44 = vunpack.c.l.bf16 %v6670_v38 }
 0x5a1   : > { %v4397_v55 = vadd.f32 %v4396_v54, %v9373_v50  ;;  %v7252_v59 = vpop.f32.mrb[58].mxu0  ;;  %7308 = vmatpush3.bf16.msra.mxu0 %v7887_v39  ;;  %v6637_v54 = vunpack.c.h.bf16 %v6635_v45  ;;  %v6677_v39 = vld [vmem:[%s8203_s14 + $0x28] sm:$0xff]  }
 0x5a2   : > { %v4461_v5 = vmax.f32 %v4405_v52, 0.0  ;;  %v4408_v53 = vadd.f32 %v7252_v59, %v9373_v50  ;;  %v4399_v58 = vpop.f32.mrb[59].mxu0  ;;  %7309 = vmatprep.subr.bf16.mxu0 %v7888_v42  ;;  %v6636_v52 = vunpack.c.l.bf16 %v6635_v45  ;;  %v6625_v45 = vunpack.c.h.bf16 %v6670_v38 }
 0x5a3   : > { %v4459_v0 = vmax.f32 %v4397_v55, 0.0  ;;  %v4400_v57 = vadd.f32 %v4399_v58, %v9373_v50 }
 0x5a4   : > { %v4462_v61 = vmax.f32 %v4408_v53, 0.0  ;;  %v6666_v53 = vld [vmem:[%s8198_s27 + $0x8] sm:$0xff]  }
 0x5a5   : > { %v4460_v3 = vmax.f32 %v4400_v57, 0.0  ;;  %7310 = vmatpush3.bf16.msra.mxu0 %v7888_v42  ;;  %v6673_v57 = vld [vmem:[%s8203_s14 + $0x8] sm:$0xff]   ;;  %v6671_v42 = vld [vmem:[%s8198_s27 + $0x30] sm:$0xff]  }
 0x5a6   : > { %v4493_v63 = vpack.c.bf16 %v4462_v61, %v4461_v5  ;;  %7311 = vmatprep.subr.bf16.mxu0 %v7889_v32 }
 0x5a7   : > { %v4492_v62 = vpack.c.bf16 %v4460_v3, %v4459_v0  ;;  %v7255_v1 = vpop.f32.mrb[60].mxu0 }
 0x5a8   : > { %v4421_v4 = vadd.f32 %v7255_v1, %v9373_v50  ;;  %v4412_v2 = vpop.f32.mrb[61].mxu0 }
 0x5a9   : > { %v4413_v7 = vadd.f32 %v4412_v2, %v9373_v50  ;;  %v7256_v8 = vpop.f32.mrb[62].mxu0  ;;  %7281 = vmatprep.mubr.bf16.mxu1 %v4492_v62  ;;  %7312 = vmatpush3.bf16.msra.mxu0 %v7889_v32  ;;  %v4904_v62 = vmul.f32 %v6637_v54, %v6605_v51  ;;  %v6609_v2 = vunpack.c.h.bf16 %v6666_v53  ;;  %v6678_v32 = vld [vmem:[%s8203_s14 + $0x30] sm:$0xff]   ;;  %v6657_v51 = vunpack.c.h.bf16 %v6677_v39 }
 0x5aa   : > { %v4465_v9 = vmax.f32 %v4421_v4, 0.0  ;;  %v4424_v11 = vadd.f32 %v7256_v8, %v9373_v50  ;;  %v4415_v10 = vpop.f32.mrb[63].mxu0  ;;  %7282 = vmatmul.mubr.bf16.vlgmr.msra.gmra.mrb[72].mxu1 %v4493_v63  ;;  %7361 = vmatprep.subr.bf16.mxu0 %v9436_v43  ;;  %v4903_v63 = vmul.f32 %v6636_v52, %v6604_v35  ;;  %v6608_v4 = vunpack.c.l.bf16 %v6666_v53 }
 0x5ab   : > { %v4463_v12 = vmax.f32 %v4413_v7, 0.0  ;;  %v4416_v13 = vadd.f32 %v4415_v10, %v9373_v50  ;;  %7330 = vmatpush3.bf16.msra.mxu1 %v9361_v56  ;;  %v6674_v10 = vld [vmem:[%s8203_s14 + $0x10] sm:$0xff]   ;;  %v6656_v35 = vunpack.c.l.bf16 %v6677_v39  ;;  %v6661_v53 = vunpack.c.h.bf16 %v6678_v32 }
 0x5ac   : > { %v4466_v29 = vmax.f32 %v4424_v11, 0.0  ;;  %7331 = vmatprep.subr.bf16.mxu1 %v7875_v6  ;;  %v6641_v11 = vunpack.c.h.bf16 %v6673_v57 }
 0x5ad   : > { %v4464_v30 = vmax.f32 %v4416_v13, 0.0 }
 0x5ae   : > { %v4495_v15 = vpack.c.bf16 %v4466_v29, %v4465_v9  ;;  %v6640_v9 = vunpack.c.l.bf16 %v6673_v57 }
 0x5af   : > { %v4494_v41 = vpack.c.bf16 %v4464_v30, %v4463_v12  ;;  %v7259_v40 = vpop.f32.mrb[64].mxu0  ;;  %7332 = vmatpush3.bf16.msra.mxu1 %v7875_v6  ;;  %v6667_v6 = vld [vmem:[%s8198_s27 + $0x10] sm:$0xff]  }
 0x5b0   : > { %v4437_v16 = vadd.f32 %v7259_v40, %v9373_v50  ;;  %v4428_v17 = vpop.f32.mrb[65].mxu0  ;;  %7333 = vmatprep.subr.bf16.mxu1 %v7876_v14  ;;  %v6612_v30 = vunpack.c.l.bf16 %v6667_v6  ;;  %v6645_v40 = vunpack.c.h.bf16 %v6674_v10 }
 0x5b1   : > { %v4429_v56 = vadd.f32 %v4428_v17, %v9373_v50  ;;  %v7260_v19 = vpop.f32.mrb[66].mxu0  ;;  %7285 = vmatprep.mubr.bf16.mxu1 %v4494_v41  ;;  %v6613_v41 = vunpack.c.h.bf16 %v6667_v6  ;;  %v4906_v17 = vmul.f32 %v6641_v11, %v6609_v2 }
 0x5b2   : > { %v4469_v20 = vmax.f32 %v4437_v16, 0.0  ;;  %v4440_v46 = vadd.f32 %v7260_v19, %v9373_v50  ;;  %v4431_v47 = vpop.f32.mrb[67].mxu0  ;;  %7286 = vmatmul.mubr.bf16.gmra.mrb[76].mxu1 %v4495_v15  ;;  %v4905_v16 = vmul.f32 %v6640_v9, %v6608_v4 }
 0x5b3   : > { %v4467_v21 = vmax.f32 %v4429_v56, 0.0  ;;  %v4432_v22 = vadd.f32 %v4431_v47, %v9373_v50  ;;  %7334 = vmatpush3.bf16.msra.mxu1 %v7876_v14  ;;  %v4935_v14 = vpack.c.bf16 %v4904_v62, %v4903_v63  ;;  %v6675_v56 = vld [vmem:[%s8203_s14 + $0x18] sm:$0xff]   ;;  %v6676_v47 = vld [vmem:[%s8203_s14 + $0x20] sm:$0xff]  }
 0x5b4   : > { %v4470_v23 = vmax.f32 %v4440_v46, 0.0  ;;  %7335 = vmatprep.subr.bf16.mxu1 %v7877_v18  ;;  %v6669_v46 = vld [vmem:[%s8198_s27 + $0x20] sm:$0xff]   ;;  %v6679_v63 = vld [vmem:[%s8203_s14 + $0x38] sm:$0xff]  }
 0x5b5   : > { %v4468_v24 = vmax.f32 %v4432_v22, 0.0  ;;  %v6664_v2 = vunpack.c.l.bf16 %v6679_v63  ;;  %v6665_v6 = vunpack.c.h.bf16 %v6679_v63  ;;  %v7899_v63 = vld [vmem:[%s9623_s7 + $0xc8] sm:$0xff]  }
 0x5b6   : > { %v4497_v25 = vpack.c.bf16 %v4470_v23, %v4469_v20  ;;  %v4908_v20 = vmul.f32 %v6645_v40, %v6613_v41 }
 0x5b7   : > { %v4496_v26 = vpack.c.bf16 %v4468_v24, %v4467_v21  ;;  %7336 = vmatpush3.bf16.msra.mxu1 %v7877_v18  ;;  %v6668_v18 = vld [vmem:[%s8198_s27 + $0x18] sm:$0xff]   ;;  %v4936_v21 = vpack.c.bf16 %v4906_v17, %v4905_v16  ;;  %v6648_v24 = vunpack.c.l.bf16 %v6675_v56 }
 0x5b8   : > { %7337 = vmatprep.subr.bf16.mxu1 %v7878_v27  ;;  %v6616_v22 = vunpack.c.l.bf16 %v6668_v18  ;;  %v6617_v23 = vunpack.c.h.bf16 %v6668_v18 }
 0x5b9   : > { %7289 = vmatprep.mubr.bf16.mxu1 %v4496_v26  ;;  %v6620_v26 = vunpack.c.l.bf16 %v6669_v46 }
 0x5ba   : > { %7290 = vmatmul.mubr.bf16.gmra.mrb[80].mxu1 %v4497_v25  ;;  %v6649_v25 = vunpack.c.h.bf16 %v6675_v56  ;;  %v4909_v34 = vmul.f32 %v6648_v24, %v6616_v22  ;;  %v7891_v22 = vld [vmem:[%s9623_s7 + $0x8] sm:$0xff]  }
 0x5bb   : > { %7338 = vmatpush3.bf16.msra.mxu1 %v7878_v27  ;;  %v6621_v27 = vunpack.c.h.bf16 %v6669_v46 }
 0x5bc   : > { %7339 = vmatprep.subr.bf16.mxu1 %v7879_v28  ;;  %v4910_v36 = vmul.f32 %v6649_v25, %v6617_v23 }
 0x5be   : > { %v4938_v52 = vpack.c.bf16 %v4910_v36, %v4909_v34  ;;  %v7892_v34 = vld [vmem:[%s9623_s7 + $0x10] sm:$0xff]  }
 0x5bf   : > { %7340 = vmatpush3.bf16.msra.mxu1 %v7879_v28  ;;  %v6652_v28 = vunpack.c.l.bf16 %v6676_v47 }
 0x5c0   : > { %7341 = vmatprep.subr.bf16.mxu1 %v7880_v31 }
 0x5c1   : > { %v4911_v37 = vmul.f32 %v6652_v28, %v6620_v26 }
 0x5c3   : > { %7342 = vmatpush3.bf16.msra.mxu1 %v7880_v31  ;;  %v6653_v31 = vunpack.c.h.bf16 %v6676_v47 }
 0x5c4   : > { %7343 = vmatprep.subr.bf16.mxu1 %v7881_v33 }
 0x5c5   : > { %v4912_v60 = vmul.f32 %v6653_v31, %v6621_v27 }
 0x5c7   : > { %7344 = vmatpush3.bf16.msra.mxu1 %v7881_v33  ;;  %v4939_v54 = vpack.c.bf16 %v4912_v60, %v4911_v37 }
 0x665   : > { %v7263_v55 = vpop.f32.mrb[68].mxu0 }
 0x666   : > { %v4453_v59 = vadd.f32 %v7263_v55, %v9373_v50  ;;  %v4444_v5 = vpop.f32.mrb[69].mxu0  ;;  %v6628_v55 = vunpack.c.l.bf16 %v6671_v42 }
 0x667   : > { %v4445_v58 = vadd.f32 %v4444_v5, %v9373_v50  ;;  %v7264_v0 = vpop.f32.mrb[70].mxu0  ;;  %v6660_v5 = vunpack.c.l.bf16 %v6678_v32  ;;  %v7893_v32 = vld [vmem:[%s9623_s7 + $0x18] sm:$0xff]  }
 0x668   : > { %v4456_v61 = vadd.f32 %v7264_v0, %v9373_v50  ;;  %v4447_v3 = vpop.f32.mrb[71].mxu0  ;;  %v4473_v7 = vmax.f32 %v4453_v59, 0.0  ;;  %v6629_v59 = vunpack.c.h.bf16 %v6671_v42  ;;  %v4914_v0 = vmul.f32 %v6657_v51, %v6625_v45 }
 0x669   : > { %v4448_v1 = vadd.f32 %v4447_v3, %v9373_v50  ;;  %v4471_v12 = vmax.f32 %v4445_v58, 0.0  ;;  %v6644_v50 = vunpack.c.l.bf16 %v6674_v10  ;;  %v4913_v58 = vmul.f32 %v6656_v35, %v6624_v44  ;;  %v6672_v3 = vld [vmem:[%s8198_s27 + $0x38] sm:$0xff]  }
 0x66a   : > { %v4474_v8 = vmax.f32 %v4456_v61, 0.0  ;;  %v4915_v57 = vmul.f32 %v6660_v5, %v6628_v55  ;;  %v4916_v61 = vmul.f32 %v6661_v53, %v6629_v59  ;;  %v6633_v4 = vunpack.c.h.bf16 %v6672_v3 }
 0x66b   : > { %v4472_v13 = vmax.f32 %v4448_v1, 0.0  ;;  %v4907_v19 = vmul.f32 %v6644_v50, %v6612_v30  ;;  %v4940_v62 = vpack.c.bf16 %v4914_v0, %v4913_v58  ;;  %v6632_v1 = vunpack.c.l.bf16 %v6672_v3  ;;  %v7894_v58 = vld [vmem:[%s9623_s7 + $0x20] sm:$0xff]   ;;  %v7895_v0 = vld [vmem:[%s9623_s7 + $0x28] sm:$0xff]  }
 0x66c   : > { %v4499_v29 = vpack.c.bf16 %v4474_v8, %v4473_v7  ;;  %v4941_v7 = vpack.c.bf16 %v4916_v61, %v4915_v57  ;;  %v4918_v9 = vmul.f32 %v6665_v6, %v6633_v4  ;;  %v4502_v10 = vsub.s32 3, %v9364_v48  ;;  %v7896_v57 = vld [vmem:[%s9623_s7 + $0x30] sm:$0xff]   ;;  %v7897_v61 = vld [vmem:[%s9623_s7 + $0x38] sm:$0xff]   ;;  %v7898_v3 = vld [vmem:[%s9623_s7 + $0xc0] sm:$0xff]  }
 0x66d   : > { %v4498_v15 = vpack.c.bf16 %v4472_v13, %v4471_v12  ;;  %v4937_v33 = vpack.c.bf16 %v4908_v20, %v4907_v19  ;;  %v4917_v8 = vmul.f32 %v6664_v2, %v6632_v1  ;;  %7393 = vmatprep.subr.bf16.mxu1 %v7898_v3  ;;  %v7901_v1 = vld [vmem:[%s9623_s7 + $0xd8] sm:$0xff]   ;;  %v7902_v4 = vld [vmem:[%s9623_s7 + $0xe0] sm:$0xff]   ;;  %v7903_v2 = vld [vmem:[%s9623_s7 + $0xe8] sm:$0xff]  }
 0x66e   : > { %v9461_v12 = vrot.slane %v9370_v49, %v4502_v10 }
 0x66f   : > { %7293 = vmatprep.mubr.bf16.mxu1 %v4498_v15  ;;  %v4942_v11 = vpack.c.bf16 %v4918_v9, %v4917_v8  ;;  %v4945_v9 = vsub.s32 0, %v9364_v48 }
 0x670   : > { %7294 = vmatmul.mubr.bf16.gmra.mrb[84].mxu1 %v4499_v29 }
 0x671   : > { %7345 = vmatprep.mubr.bf16.mxu1 %v4935_v14 }
 0x678   : > { %7346 = vmatmul.mubr.bf16.vlgmr.msra.gmra.mrb[88].mxu1 %v4936_v21 }
 0x679   : > { %7349 = vmatprep.mubr.bf16.mxu1 %v4937_v33  ;;  %7394 = vmatpush3.bf16.msra.mxu1 %v7898_v3 }
 0x67a   : > { %7395 = vmatprep.subr.bf16.mxu1 %v7899_v63 }
 0x67d   : > { %v7283_v13 = vpop.f32.mrb[72].mxu1  ;;  %7396 = vmatpush3.bf16.msra.mxu1 %v7899_v63 }
 0x67e   : > { %v4595_v29 = vadd.f32 %v7283_v13, %v9461_v12  ;;  %v4586_v14 = vpop.f32.mrb[73].mxu1 }
 0x67f   : > { %v4587_v30 = vadd.f32 %v4586_v14, %v9461_v12  ;;  %v7284_v15 = vpop.f32.mrb[74].mxu1 }
 0x680   : > { %7350 = vmatmul.mubr.bf16.gmra.mrb[92].mxu1 %v4938_v52  ;;  %v4651_v41 = vmax.f32 %v4595_v29, 0.0  ;;  %v4598_v50 = vadd.f32 %v7284_v15, %v9461_v12  ;;  %v4589_v40 = vpop.f32.mrb[75].mxu1 }
 0x681   : > { %7353 = vmatprep.mubr.bf16.mxu1 %v4939_v54  ;;  %v4649_v16 = vmax.f32 %v4587_v30, 0.0  ;;  %v4590_v17 = vadd.f32 %v4589_v40, %v9461_v12 }
 0x682   : > { %v4652_v18 = vmax.f32 %v4598_v50, 0.0 }
 0x683   : > { %v4650_v56 = vmax.f32 %v4590_v17, 0.0 }
 0x684   : > { %v4683_v19 = vpack.c.bf16 %v4652_v18, %v4651_v41  ;;  %v9523_v41 = vrot.slane %v9370_v49, %v4945_v9 }
 0x685   : > { %v4682_v20 = vpack.c.bf16 %v4650_v56, %v4649_v16  ;;  %v7287_v46 = vpop.f32.mrb[76].mxu1 }
 0x686   : > { %v4611_v47 = vadd.f32 %v7287_v46, %v9461_v12  ;;  %v4602_v21 = vpop.f32.mrb[77].mxu1 }
 0x687   : > { %v4603_v23 = vadd.f32 %v4602_v21, %v9461_v12  ;;  %v7288_v24 = vpop.f32.mrb[78].mxu1  ;;  %7313 = vmatprep.mubr.bf16.mxu0 %v4682_v20 }
 0x688   : > { %7354 = vmatmul.mubr.bf16.gmra.mrb[96].mxu1 %v4940_v62  ;;  %v4655_v25 = vmax.f32 %v4611_v47, 0.0  ;;  %v4614_v26 = vadd.f32 %v7288_v24, %v9461_v12  ;;  %v4605_v27 = vpop.f32.mrb[79].mxu1  ;;  %7314 = vmatmul.mubr.bf16.vlgmr.msra.gmra.mrb[72].mxu0 %v4683_v19  ;;  %v7900_v62 = vld [vmem:[%s9623_s7 + $0xd0] sm:$0xff]  }
 0x689   : > { %7357 = vmatprep.mubr.bf16.mxu1 %v4941_v7  ;;  %v4653_v28 = vmax.f32 %v4603_v23, 0.0  ;;  %v4606_v31 = vadd.f32 %v4605_v27, %v9461_v12  ;;  %7362 = vmatpush3.bf16.msra.mxu0 %v9436_v43 }
 0x68a   : > { %v4656_v33 = vmax.f32 %v4614_v26, 0.0  ;;  %7363 = vmatprep.subr.bf16.mxu0 %v7891_v22  ;;  %7397 = vmatprep.subr.bf16.mxu1 %v7900_v62 }
 0x68b   : > { %v4654_v36 = vmax.f32 %v4606_v31, 0.0  ;;  %7398 = vmatpush3.bf16.msra.mxu1 %v7900_v62 }
 0x68c   : > { %v4685_v37 = vpack.c.bf16 %v4656_v33, %v4655_v25  ;;  %7399 = vmatprep.subr.bf16.mxu1 %v7901_v1 }
 0x68d   : > { %v4684_v60 = vpack.c.bf16 %v4654_v36, %v4653_v28  ;;  %v7291_v38 = vpop.f32.mrb[80].mxu1  ;;  %7364 = vmatpush3.bf16.msra.mxu0 %v7891_v22 }
 0x68e   : > { %v4627_v39 = vadd.f32 %v7291_v38, %v9461_v12  ;;  %v4618_v42 = vpop.f32.mrb[81].mxu1  ;;  %7365 = vmatprep.subr.bf16.mxu0 %v7892_v34 }
 0x68f   : > { %v4619_v43 = vadd.f32 %v4618_v42, %v9461_v12  ;;  %v7292_v44 = vpop.f32.mrb[82].mxu1  ;;  %7317 = vmatprep.mubr.bf16.mxu0 %v4684_v60  ;;  %7400 = vmatpush3.bf16.msra.mxu1 %v7901_v1 }
 0x690   : > { %7358 = vmatmul.mubr.bf16.gmra.mrb[100].mxu1 %v4942_v11  ;;  %v4659_v45 = vmax.f32 %v4627_v39, 0.0  ;;  %v4630_v35 = vadd.f32 %v7292_v44, %v9461_v12  ;;  %v4621_v51 = vpop.f32.mrb[83].mxu1  ;;  %7318 = vmatmul.mubr.bf16.gmra.mrb[76].mxu0 %v4685_v37 }
 0x691   : > { %v4657_v52 = vmax.f32 %v4619_v43, 0.0  ;;  %v4622_v54 = vadd.f32 %v4621_v51, %v9461_v12  ;;  %7366 = vmatpush3.bf16.msra.mxu0 %v7892_v34  ;;  %7401 = vmatprep.subr.bf16.mxu1 %v7902_v4 }
 0x692   : > { %v4660_v55 = vmax.f32 %v4630_v35, 0.0  ;;  %7367 = vmatprep.subr.bf16.mxu0 %v7893_v32 }
 0x693   : > { %v4658_v59 = vmax.f32 %v4622_v54, 0.0  ;;  %7402 = vmatpush3.bf16.msra.mxu1 %v7902_v4 }
 0x694   : > { %v4687_v5 = vpack.c.bf16 %v4660_v55, %v4659_v45  ;;  %7403 = vmatprep.subr.bf16.mxu1 %v7903_v2 }
 0x695   : > { %v4686_v53 = vpack.c.bf16 %v4658_v59, %v4657_v52  ;;  %7368 = vmatpush3.bf16.msra.mxu0 %v7893_v32 }
 0x696   : > { %7369 = vmatprep.subr.bf16.mxu0 %v7894_v58 }
 0x697   : > { %7321 = vmatprep.mubr.bf16.mxu0 %v4686_v53  ;;  %7404 = vmatpush3.bf16.msra.mxu1 %v7903_v2 }
 0x698   : > { %7322 = vmatmul.mubr.bf16.gmra.mrb[80].mxu0 %v4687_v5 }
 0x699   : > { %7370 = vmatpush3.bf16.msra.mxu0 %v7894_v58 }
 0x69a   : > { %7371 = vmatprep.subr.bf16.mxu0 %v7895_v0 }
 0x69d   : > { %7372 = vmatpush3.bf16.msra.mxu0 %v7895_v0 }
 0x69e   : > { %7373 = vmatprep.subr.bf16.mxu0 %v7896_v57 }
 0x6a1   : > { %7374 = vmatpush3.bf16.msra.mxu0 %v7896_v57 }
 0x6a2   : > { %7375 = vmatprep.subr.bf16.mxu0 %v7897_v61 }
 0x6a5   : > { %7376 = vmatpush3.bf16.msra.mxu0 %v7897_v61 }
 0x743   : > { %v7295_v6 = vpop.f32.mrb[84].mxu1 }
 0x744   : > { %v4643_v7 = vadd.f32 %v7295_v6, %v9461_v12  ;;  %v4634_v8 = vpop.f32.mrb[85].mxu1 }
 0x745   : > { %v4635_v11 = vadd.f32 %v4634_v8, %v9461_v12  ;;  %v7296_v10 = vpop.f32.mrb[86].mxu1 }
 0x746   : > { %v4646_v13 = vadd.f32 %v7296_v10, %v9461_v12  ;;  %v4637_v29 = vpop.f32.mrb[87].mxu1  ;;  %v4663_v30 = vmax.f32 %v4643_v7, 0.0 }
 0x747   : > { %v4638_v14 = vadd.f32 %v4637_v29, %v9461_v12  ;;  %v4661_v50 = vmax.f32 %v4635_v11, 0.0 }
 0x748   : > { %v4664_v15 = vmax.f32 %v4646_v13, 0.0 }
 0x749   : > { %v4662_v40 = vmax.f32 %v4638_v14, 0.0 }
 0x74a   : > { %v4689_v16 = vpack.c.bf16 %v4664_v15, %v4663_v30 }
 0x74b   : > { %v4688_v17 = vpack.c.bf16 %v4662_v40, %v4661_v50  ;;  %v7347_v18 = vpop.f32.mrb[88].mxu1  ;;  %v7904_v50 = vld [vmem:[%s9623_s7 + $0xf0] sm:$0xff]   ;;  %v7905_v40 = vld [vmem:[%s9623_s7 + $0xf8] sm:$0xff]  }
 0x74c   : > { %v5038_v56 = vadd.f32 %v7347_v18, %v9523_v41  ;;  %v5029_v19 = vpop.f32.mrb[89].mxu1  ;;  %7405 = vmatprep.subr.bf16.mxu1 %v7904_v50 }
 0x74d   : > { %v5030_v20 = vadd.f32 %v5029_v19, %v9523_v41  ;;  %7325 = vmatprep.mubr.bf16.mxu0 %v4688_v17  ;;  %v7348_v46 = vpop.f32.mrb[90].mxu1  ;;  %7406 = vmatpush3.bf16.msra.mxu1 %v7904_v50 }
 0x74e   : > { %v5041_v12 = vadd.f32 %v7348_v46, %v9523_v41  ;;  %7326 = vmatmul.mubr.bf16.gmra.mrb[84].mxu0 %v4689_v16  ;;  %v5032_v47 = vpop.f32.mrb[91].mxu1  ;;  %v5094_v22 = vmax.f32 %v5038_v56, 0.0  ;;  %7407 = vmatprep.subr.bf16.mxu1 %v7905_v40  ;;  %v5134_v16 = vsub.s32 1, %v9364_v48 }
 0x74f   : > { %v5033_v21 = vadd.f32 %v5032_v47, %v9523_v41  ;;  %v5092_v24 = vmax.f32 %v5030_v20, 0.0 }
 0x750   : > { %v5095_v23 = vmax.f32 %v5041_v12, 0.0  ;;  %v5135_v18 = vrot.slane %v9370_v49, %v5134_v16 }
 0x751   : > { %v5093_v25 = vmax.f32 %v5033_v21, 0.0  ;;  %7408 = vmatpush3.bf16.msra.mxu1 %v7905_v40 }
 0x752   : > { %v5125_v26 = vpack.c.bf16 %v5095_v23, %v5094_v22 }
 0x753   : > { %v5124_v27 = vpack.c.bf16 %v5093_v25, %v5092_v24  ;;  %v7351_v28 = vpop.f32.mrb[92].mxu1 }
 0x754   : > { %v5054_v31 = vadd.f32 %v7351_v28, %v9523_v41  ;;  %v5045_v33 = vpop.f32.mrb[93].mxu1 }
 0x755   : > { %v5046_v34 = vadd.f32 %v5045_v33, %v9523_v41  ;;  %v7352_v36 = vpop.f32.mrb[94].mxu1  ;;  %7377 = vmatprep.mubr.bf16.mxu0 %v5124_v27 }
 0x756   : > { %v5098_v37 = vmax.f32 %v5054_v31, 0.0  ;;  %v5057_v60 = vadd.f32 %v7352_v36, %v9523_v41  ;;  %v5048_v38 = vpop.f32.mrb[95].mxu1  ;;  %7378 = vmatmul.mubr.bf16.vlgmr.msra.gmra.mrb[72].mxu0 %v5125_v26 }
 0x757   : > { %v5096_v39 = vmax.f32 %v5046_v34, 0.0  ;;  %v5049_v42 = vadd.f32 %v5048_v38, %v9523_v41 }
 0x758   : > { %v5099_v32 = vmax.f32 %v5057_v60, 0.0 }
 0x759   : > { %v5097_v43 = vmax.f32 %v5049_v42, 0.0 }
 0x75a   : > { %v5127_v44 = vpack.c.bf16 %v5099_v32, %v5098_v37 }
 0x75b   : > { %v5126_v45 = vpack.c.bf16 %v5097_v43, %v5096_v39  ;;  %v7355_v35 = vpop.f32.mrb[96].mxu1 }
 0x75c   : > { %v5070_v51 = vadd.f32 %v7355_v35, %v9523_v41  ;;  %v5061_v52 = vpop.f32.mrb[97].mxu1 }
 0x75d   : > { %v5062_v54 = vadd.f32 %v5061_v52, %v9523_v41  ;;  %v7356_v55 = vpop.f32.mrb[98].mxu1  ;;  %7381 = vmatprep.mubr.bf16.mxu0 %v5126_v45 }
 0x75e   : > { %v5102_v59 = vmax.f32 %v5070_v51, 0.0  ;;  %v5073_v5 = vadd.f32 %v7356_v55, %v9523_v41  ;;  %v5064_v53 = vpop.f32.mrb[99].mxu1  ;;  %7382 = vmatmul.mubr.bf16.gmra.mrb[76].mxu0 %v5127_v44 }
 0x75f   : > { %v5100_v58 = vmax.f32 %v5062_v54, 0.0  ;;  %v5065_v0 = vadd.f32 %v5064_v53, %v9523_v41 }
 0x760   : > { %v5103_v57 = vmax.f32 %v5073_v5, 0.0 }
 0x761   : > { %v5101_v61 = vmax.f32 %v5065_v0, 0.0 }
 0x762   : > { %v5129_v3 = vpack.c.bf16 %v5103_v57, %v5102_v59 }
 0x763   : > { %v5128_v63 = vpack.c.bf16 %v5101_v61, %v5100_v58  ;;  %v7359_v62 = vpop.f32.mrb[100].mxu1 }
 0x764   : > { %v5086_v1 = vadd.f32 %v7359_v62, %v9523_v41  ;;  %v5077_v4 = vpop.f32.mrb[101].mxu1  ;;  %v8070_v62 = vmov 0.0  }
 0x765   : > { %v5078_v2 = vadd.f32 %v5077_v4, %v9523_v41  ;;  %v7360_v6 = vpop.f32.mrb[102].mxu1  ;;  %7385 = vmatprep.mubr.bf16.mxu0 %v5128_v63  ;;  %7425 = vmatprep.subr.bf16.mxu0 %v8070_v62  ;;  %v8072_v4 = vmov 0  }
 0x766   : > { %v5106_v7 = vmax.f32 %v5086_v1, 0.0  ;;  %v5089_v8 = vadd.f32 %v7360_v6, %v9523_v41  ;;  %v5080_v11 = vpop.f32.mrb[103].mxu1  ;;  %7386 = vmatmul.mubr.bf16.gmra.mrb[80].mxu0 %v5129_v3  ;;  %v5496_v1 = vld [vmem:[#allocation9] sm:$0x1]  ;;  %7793 = vset.pattern.permute.xlu0 %v8072_v4 }
 0x767   : > { %v5104_v10 = vmax.f32 %v5078_v2, 0.0  ;;  %v5081_v13 = vadd.f32 %v5080_v11, %v9523_v41  ;;  %v4692_v41 = vsub.s32 4, %v9364_v48  ;;  %5499 = vperm.xlu0 %7793, %v5496_v1   ;;  %v5324_v2 = vsub.s32 5, %v9364_v48 }
 0x768   : > { %v5107_v29 = vmax.f32 %v5089_v8, 0.0 }
 0x769   : > { %v5105_v14 = vmax.f32 %v5081_v13, 0.0  ;;  %v4693_v17 = vrot.slane %v9370_v49, %v4692_v41  ;;  %v5325_v6 = vrot.slane %v9370_v49, %v5324_v2 }
 0x76a   : > { %v5131_v30 = vpack.c.bf16 %v5107_v29, %v5106_v7 }
 0x76b   : > { %v5130_v15 = vpack.c.bf16 %v5105_v14, %v5104_v10  ;;  %v7447_v56 = vadd.f32 %v5135_v18, %v4693_v17 }
 0x76d   : > { %7389 = vmatprep.mubr.bf16.mxu0 %v5130_v15 }
 0x76e   : > { %7390 = vmatmul.mubr.bf16.gmra.mrb[84].mxu0 %v5131_v30 }
 0x76f   : > { %7441 = vmatprep.mubr.msk.bf16.mxu0 %vm8071_vm0, %v8070_v62 }
 0x7e6   : > { %v5500_v1 = vpop.permute.xlu0 %5499 }
 0x7e7   : > { %v5505_v4 = vrot.slane %v5500_v1, %v4945_v9 }
 0x829   : > { %v7379_v19 = vpop.f32.mrb[72].mxu0 }
 0x82a   : > { %v5218_v20 = vpop.f32.mrb[73].mxu0  ;;  %v7446_v12 = vadd.f32 %v7447_v56, %v7379_v19 }
 0x82b   : > { %v7380_v46 = vpop.f32.mrb[74].mxu0  ;;  %v7448_v22 = vadd.f32 %v7447_v56, %v5218_v20 }
 0x82c   : > { %v7450_v47 = vadd.f32 %v7447_v56, %v7380_v46  ;;  %v5221_v21 = vpop.f32.mrb[75].mxu0 }
 0x82d   : > { %v7452_v23 = vadd.f32 %v7447_v56, %v5221_v21 }
 0x82e   : > { %v5315_v24 = vpack.c.bf16 %v7450_v47, %v7446_v12 }
 0x82f   : > { %v5314_v25 = vpack.c.bf16 %v7452_v23, %v7448_v22 }
 0x831   : > { %v7383_v26 = vpop.f32.mrb[76].mxu0  ;;  %7409 = vmatprep.mubr.bf16.mxu1 %v5314_v25 }
 0x832   : > { %v5234_v27 = vpop.f32.mrb[77].mxu0  ;;  %7410 = vmatmul.mubr.bf16.vlgmr.msra.gmra.mrb[104].mxu1 %v5315_v24  ;;  %v7454_v31 = vadd.f32 %v7447_v56, %v7383_v26 }
 0x833   : > { %v7384_v28 = vpop.f32.mrb[78].mxu0  ;;  %v7456_v36 = vadd.f32 %v7447_v56, %v5234_v27 }
 0x834   : > { %v7458_v33 = vadd.f32 %v7447_v56, %v7384_v28  ;;  %v5237_v34 = vpop.f32.mrb[79].mxu0 }
 0x835   : > { %v7460_v37 = vadd.f32 %v7447_v56, %v5237_v34 }
 0x836   : > { %v5317_v60 = vpack.c.bf16 %v7458_v33, %v7454_v31 }
 0x837   : > { %v5316_v38 = vpack.c.bf16 %v7460_v37, %v7456_v36 }
 0x839   : > { %v7387_v39 = vpop.f32.mrb[80].mxu0  ;;  %7413 = vmatprep.mubr.bf16.mxu1 %v5316_v38 }
 0x83a   : > { %v5250_v42 = vpop.f32.mrb[81].mxu0  ;;  %7414 = vmatmul.mubr.bf16.gmra.mrb[108].mxu1 %v5317_v60  ;;  %v7462_v43 = vadd.f32 %v7447_v56, %v7387_v39 }
 0x83b   : > { %v7388_v32 = vpop.f32.mrb[82].mxu0  ;;  %v7464_v35 = vadd.f32 %v7447_v56, %v5250_v42 }
 0x83c   : > { %v7466_v44 = vadd.f32 %v7447_v56, %v7388_v32  ;;  %v5253_v45 = vpop.f32.mrb[83].mxu0 }
 0x83d   : > { %v7468_v51 = vadd.f32 %v7447_v56, %v5253_v45 }
 0x83e   : > { %v5319_v52 = vpack.c.bf16 %v7466_v44, %v7462_v43 }
 0x83f   : > { %v5318_v54 = vpack.c.bf16 %v7468_v51, %v7464_v35 }
 0x841   : > { %v7391_v55 = vpop.f32.mrb[84].mxu0  ;;  %7417 = vmatprep.mubr.bf16.mxu1 %v5318_v54 }
 0x842   : > { %v5266_v59 = vpop.f32.mrb[85].mxu0  ;;  %7418 = vmatmul.mubr.bf16.gmra.mrb[112].mxu1 %v5319_v52  ;;  %v7470_v53 = vadd.f32 %v7447_v56, %v7391_v55 }
 0x843   : > { %v7392_v5 = vpop.f32.mrb[86].mxu0  ;;  %v7472_v57 = vadd.f32 %v7447_v56, %v5266_v59 }
 0x844   : > { %v7474_v58 = vadd.f32 %v7447_v56, %v7392_v5  ;;  %v5269_v0 = vpop.f32.mrb[87].mxu0 }
 0x845   : > { %v7476_v61 = vadd.f32 %v7447_v56, %v5269_v0 }
 0x846   : > { %v5321_v3 = vpack.c.bf16 %v7474_v58, %v7470_v53 }
 0x847   : > { %v5320_v63 = vpack.c.bf16 %v7476_v61, %v7472_v57 }
 0x849   : > { %7421 = vmatprep.mubr.bf16.mxu1 %v5320_v63  ;;  %v5487_v63 = vld [vmem:[%s9624_s8] sm:$0x1] }
 0x84a   : > { %7422 = vmatmul.mubr.bf16.gmra.mrb[116].mxu1 %v5321_v3 }
 0x905   : > { %v7411_v7 = vpop.f32.mrb[104].mxu1 }
 0x906   : > { %v5417_v8 = vadd.f32 %v7411_v7, %v5325_v6  ;;  %v5408_v11 = vpop.f32.mrb[105].mxu1 }
 0x907   : > { %v5409_v10 = vadd.f32 %v5408_v11, %v5325_v6  ;;  %v7412_v13 = vpop.f32.mrb[106].mxu1 }
 0x908   : > { %v5420_v29 = vadd.f32 %v7412_v13, %v5325_v6  ;;  %v5411_v14 = vpop.f32.mrb[107].mxu1  ;;  %v5473_v15 = vmax.f32 %v5417_v8, 0.0 }
 0x909   : > { %v5412_v30 = vadd.f32 %v5411_v14, %v5325_v6  ;;  %v5471_v40 = vmax.f32 %v5409_v10, 0.0 }
 0x90a   : > { %v5474_v50 = vmax.f32 %v5420_v29, 0.0 }
 0x90b   : > { %v5472_v41 = vmax.f32 %v5412_v30, 0.0 }
 0x90c   : > { %v5489_v16 = vpack.c.bf16 %v5474_v50, %v5473_v15 }
 0x90d   : > { %v5488_v17 = vpack.c.bf16 %v5472_v41, %v5471_v40  ;;  %v7415_v18 = vpop.f32.mrb[108].mxu1 }
 0x90e   : > { %v5433_v56 = vadd.f32 %v7415_v18, %v5325_v6  ;;  %v5424_v19 = vpop.f32.mrb[109].mxu1 }
 0x90f   : > { %v5425_v20 = vadd.f32 %v5424_v19, %v5325_v6  ;;  %v7416_v46 = vpop.f32.mrb[110].mxu1  ;;  %7426 = vmatpush3.bf16.xpose.msra.mxu0 %v5488_v17 }
 0x910   : > { %v5436_v49 = vadd.f32 %v7416_v46, %v5325_v6  ;;  %v5427_v12 = vpop.f32.mrb[111].mxu1  ;;  %7427 = vmatprep.subr.bf16.mxu0 %v8070_v62  ;;  %v5477_v21 = vmax.f32 %v5433_v56, 0.0 }
 0x911   : > { %v5428_v47 = vadd.f32 %v5427_v12, %v5325_v6  ;;  %v5475_v23 = vmax.f32 %v5425_v20, 0.0 }
 0x912   : > { %v5478_v22 = vmax.f32 %v5436_v49, 0.0 }
 0x913   : > { %v5476_v24 = vmax.f32 %v5428_v47, 0.0 }
 0x914   : > { %v5491_v25 = vpack.c.bf16 %v5478_v22, %v5477_v21 }
 0x915   : > { %v5490_v26 = vpack.c.bf16 %v5476_v24, %v5475_v23  ;;  %v7419_v27 = vpop.f32.mrb[112].mxu1 }
 0x916   : > { %v5449_v28 = vadd.f32 %v7419_v27, %v5325_v6  ;;  %v5440_v31 = vpop.f32.mrb[113].mxu1 }
 0x917   : > { %v5441_v33 = vadd.f32 %v5440_v31, %v5325_v6  ;;  %v7420_v34 = vpop.f32.mrb[114].mxu1  ;;  %7428 = vmatpush3.bf16.xpose.msra.mxu0 %v5489_v16 }
 0x918   : > { %v5452_v36 = vadd.f32 %v7420_v34, %v5325_v6  ;;  %v5443_v37 = vpop.f32.mrb[115].mxu1  ;;  %7429 = vmatprep.subr.bf16.mxu0 %v8070_v62  ;;  %v5481_v38 = vmax.f32 %v5449_v28, 0.0 }
 0x919   : > { %v5444_v60 = vadd.f32 %v5443_v37, %v5325_v6  ;;  %v5479_v42 = vmax.f32 %v5441_v33, 0.0 }
 0x91a   : > { %v5482_v39 = vmax.f32 %v5452_v36, 0.0 }
 0x91b   : > { %v5480_v32 = vmax.f32 %v5444_v60, 0.0 }
 0x91c   : > { %v5493_v43 = vpack.c.bf16 %v5482_v39, %v5481_v38 }
 0x91d   : > { %v5492_v44 = vpack.c.bf16 %v5480_v32, %v5479_v42  ;;  %v7423_v45 = vpop.f32.mrb[116].mxu1 }
 0x91e   : > { %v5465_v35 = vadd.f32 %v7423_v45, %v5325_v6  ;;  %v5456_v51 = vpop.f32.mrb[117].mxu1 }
 0x91f   : > { %v5457_v52 = vadd.f32 %v5456_v51, %v5325_v6  ;;  %v7424_v54 = vpop.f32.mrb[118].mxu1  ;;  %7430 = vmatpush3.bf16.xpose.msra.mxu0 %v5490_v26 }
 0x920   : > { %v5468_v55 = vadd.f32 %v7424_v54, %v5325_v6  ;;  %v5459_v59 = vpop.f32.mrb[119].mxu1  ;;  %7431 = vmatprep.subr.bf16.mxu0 %v8070_v62  ;;  %v5485_v53 = vmax.f32 %v5465_v35, 0.0 }
 0x921   : > { %v5460_v5 = vadd.f32 %v5459_v59, %v5325_v6  ;;  %v5483_v0 = vmax.f32 %v5457_v52, 0.0 }
 0x922   : > { %v5486_v58 = vmax.f32 %v5468_v55, 0.0 }
 0x923   : > { %v5484_v57 = vmax.f32 %v5460_v5, 0.0 }
 0x924   : > { %v5495_v61 = vpack.c.bf16 %v5486_v58, %v5485_v53 }
 0x925   : > { %v5494_v3 = vpack.c.bf16 %v5484_v57, %v5483_v0 }
 0x927   : > { %7432 = vmatpush3.bf16.xpose.msra.mxu0 %v5491_v25 }
 0x928   : > { %7433 = vmatprep.subr.bf16.mxu0 %v8070_v62 }
 0x92f   : > { %7434 = vmatpush3.bf16.xpose.msra.mxu0 %v5492_v44 }
 0x930   : > { %7435 = vmatprep.subr.bf16.mxu0 %v8070_v62 }
 0x937   : > { %7436 = vmatpush3.bf16.xpose.msra.mxu0 %v5493_v43 }
 0x938   : > { %7437 = vmatprep.subr.bf16.mxu0 %v8070_v62 }
 0x93f   : > { %7438 = vmatpush3.bf16.xpose.msra.mxu0 %v5494_v3 }
 0x940   : > { %7439 = vmatprep.subr.bf16.mxu0 %v8070_v62 }
 0x947   : > { %7440 = vmatpush3.bf16.xpose.msra.mxu0 %v5495_v61 }
 0x94e   : > { %7442 = vmatmul.mubr.bf16.vlgmr.msra.gmra.mrb[88].mxu0 %v5487_v63 }
 0xa21   : > { %v5540_v2 = vpop.f32.mrb[88].mxu0 }
 0xa22   : > { %v5541_v6 = vadd.f32 %v5540_v2, %v5505_v4  ;;  %v7443_v7 = vpop.f32.mrb[89].mxu0 }
 0xa23   : > { %v5543_v62 = vpop.f32.mrb[90].mxu0 }
 0xa24   : > { %5546 = vst [vmem:[%s8207_s16] sm:$0x1] %v5541_v6  ;;  %v7444_v8 = vpop.f32.mrb[91].mxu0 }
 0xa25   : > { %7943 = shalt.err (!%p7940_p9)
}
 0xa26   : > { %s7944_s16 = scalar_lea.hbm %s9572_s11, 16  ;;  %s7948_s14 = scalar_lea.hbm %s9654_s4, 48 }
 0xa27   : > { %p7945_p10 = scmp.ne.s32.totalorder %s9572_s11, %s7944_s16  ;;  %p7949_p13 = scmp.lt.u32.totalorder %s9572_s11, %s9654_s4 }
 0xa28   : > { %p7950_p0 = scmp.lt.u32.totalorder %s7948_s14, %s7944_s16  ;;  %p7952_p4 = scmp.lt.u32.totalorder %s7944_s16, %s9572_s11 }
 0xa29   : > { %p7946_p11 = pnand %p7945_p10, %p8178_p1 }
 0xa2a   : > { %p7951_p3 = por %p7950_p0, %p7949_p13 }
 0xa2b   : > { %p7947_p12 = pneg %p7946_p11 }
 0xa2c   : > { %p7953_p5 = por %p7952_p4, %p7951_p3 }
 0xa2e   : > { %p7954_p6 = pnand %p7953_p5, %p7947_p12 }
 0xa30   : > { %7957 = shalt.err (!%p7954_p6)
}
 0xa31   : > { %7493 = dma.vmem_to_hbm [thread:$0]  (%p8178_p1), %s9574_s0, 16, %s9572_s11, %s5548_s15  }
 0xa32 PF: > { %s9656_s23 = sld [smem:[#allocation28_spill]]  ;;  %s9657_s20 = sld [smem:[#allocation26_spill]] }
 0xa38   : > { %p7499_p7 = scmp.ge.s32.totalorder %s9656_s23, 2  ;;  %s5572_s17 = sand.u32 1, %s9657_s20  }
 0xa39   : > { %s5573_s1 = scalar_lea.sflag [#allocation11], %s5572_s17 }
 0xa3a   : > { %p7496_p8 = pnand %p7499_p7, %p8182_p2 }
 0xa3c   : > { %8017 = dma.done.wait (!%p7496_p8), %s5573_s1, 16  }
 0xa3d   : > { %8019 = vsyncadd (!%p7496_p8), %s5573_s1, 4294967280  ;;  %s9659_s12 = sld [smem:[#allocation29_spill]]  ;;  %s9660_s10 = sld [smem:[#allocation27_spill]] }
 0xa3e   : > { %s9661_s30 = sld [smem:[#allocation30_spill]]  ;;  %s9662_s28 = smov %s8026_s29 }
 0xa43   : > { %p33_p9 = scmp.ge.s32.totalorder %s9659_s12, 5   ;;  %s9663_s29 = smov %s9660_s10 }
 0xa45   :  { %35 = sbr.rel (!%p33_p9) target bundleno = 30 (0x1e), region = 586 }
 0xa4c   :  { %5577 = vsyncpa [#allocation11], 1 }
 0xa4d   :  { %5579 = vsyncpa [#allocation11 + $0x1], 1 }
 0xa4e   :  { %5580 = vsyncmov [#allocation5] }
 0xa51   :  { %s5581_s13 = vpop.sfrf %5580 }
 0xa52   :  { %p6598_p1 = scmp.ne.s32.totalorder %s5581_s13, 0 }
 0xa54   :  { %5585 = shalt.err (%p6598_p1)  }
 0xa55   :  { %5587 = vsyncmov [#allocation5 + $0x1] }
 0xa58   :  { %s5588_s0 = vpop.sfrf %5587 }
 0xa59   :  { %p6599_p2 = scmp.ne.s32.totalorder %s5588_s0, 0 }
 0xa5b   :  { %5592 = shalt.err (%p6599_p2)  }
 0xa5c   :  { %5594 = vsyncmov [#allocation5 + $0x2] }
 0xa5f   :  { %s5595_s25 = vpop.sfrf %5594 }
 0xa60   :  { %p6600_p10 = scmp.ne.s32.totalorder %s5595_s25, 0 }
 0xa62   :  { %5599 = shalt.err (%p6600_p10)  }
 0xa63   :  { %5601 = vsyncmov [#allocation5 + $0x3] }
 0xa66   :  { %s5602_s5 = vpop.sfrf %5601 }
 0xa67   :  { %p6601_p11 = scmp.ne.s32.totalorder %s5602_s5, 0 }
 0xa69   :  { %5606 = shalt.err (%p6601_p11)  }

</bundles_post_ra>
